<compile_context>
chip_gen: v6e
topology: v6e:2x2x1
jax: 0.10.0
libtpu: 0.0.40
codegen_flags: <defaults>
</compile_context>

<pallas_src>
import jax
import jax.numpy as jnp
from jax.experimental import pallas as pl
from jax.experimental.pallas import tpu as pltpu

EPS = 1e-5


# ---------------------------------------------------------------------------
# Pallas kernels
# ---------------------------------------------------------------------------
def _stage1_kernel(x_ref, s1_ref, b1_ref, wcat_ref,
                   sc_ref, out1_ref, psum_ref, psq_ref):
    """relu(bn1(x)) -> one bf16 matmul for [shortcut | conv1] + bn2 partials."""
    co = sc_ref.shape[1]                                   # 4*planes (lane-dense slab)
    h = jnp.maximum(x_ref[...] * s1_ref[...] + b1_ref[...], 0.0)        # f32
    y = jnp.dot(h.astype(jnp.bfloat16), wcat_ref[...],
                preferred_element_type=jnp.float32)                     # (tm, 4P+P)
    sc_ref[...] = y[:, :co].astype(sc_ref.dtype)           # wide slab at lane offset 0
    o1 = y[:, co:]                                          # narrow slab (offset 4P)
    out1_ref[...] = o1.astype(out1_ref.dtype)
    # per-tile partial BN2 statistics (single-pass sum / sum-of-squares)
    psum_ref[...] = jnp.sum(o1, axis=0, keepdims=True)[None]
    psq_ref[...] = jnp.sum(o1 * o1, axis=0, keepdims=True)[None]


def _stage2_kernel(x_ref, s2_ref, b2_ref, w2_ref,
                   out2_ref, psum_ref, psq_ref, wide_ref):
    """relu(bn2(.)) fused with the 3x3/pad=1 conv on one rb-row block.

    The three width taps are stacked along the contraction axis (K=3*planes),
    so the conv is 3 MXU dots whose LHS are leading-dim slices of a bf16 halo
    scratch (no unaligned sublane tap slices, activation cast to bf16 once).
    """
    j = pl.program_id(1)
    nj = pl.num_programs(1)
    _, _, ww, pc = x_ref.shape
    rb = out2_ref.shape[0] // ww                          # output rows per block
    row0 = j * rb
    s2 = s2_ref[...]
    b2 = b2_ref[...]

    def act(src_row, nrows):                              # BN2 + ReLU, bf16 once
        xr = x_ref[0, pl.ds(src_row, nrows), :, :].astype(jnp.float32)
        return jnp.maximum(xr * s2 + b2, 0.0).astype(jnp.bfloat16)

    def widen(a):                                         # (r, W, P) -> (r, W, 3P)
        nrows = a.shape[0]
        z = jnp.zeros((nrows, 1, pc), jnp.bfloat16)
        left = jnp.concatenate([z, a[:, :ww - 1, :]], axis=1)     # input col c-1 (kw=0)
        right = jnp.concatenate([a[:, 1:, :], z], axis=1)         # input col c+1 (kw=2)
        return jnp.concatenate([left, a, right], axis=-1)

    # centre rows of the halo window (always in-bounds)
    wide_ref[pl.ds(1, rb), :, :] = widen(act(row0, rb))

    zero_row = jnp.zeros((1, ww, 3 * pc), jnp.bfloat16)

    @pl.when(j == 0)                                      # top halo row
    def _():
        wide_ref[pl.ds(0, 1), :, :] = zero_row

    @pl.when(j > 0)
    def _():
        wide_ref[pl.ds(0, 1), :, :] = widen(act(row0 - 1, 1))

    @pl.when(j == nj - 1)                                 # bottom halo row
    def _():
        wide_ref[pl.ds(rb + 1, 1), :, :] = zero_row

    @pl.when(j < nj - 1)
    def _():
        wide_ref[pl.ds(rb + 1, 1), :, :] = widen(act(row0 + rb, 1))

    # 3 dots with K = 3*planes each; LHS are free leading-dim slices.
    acc = jnp.zeros((rb * ww, pc), jnp.float32)
    for kh in range(3):
        tap = wide_ref[pl.ds(kh, rb), :, :].reshape(rb * ww, 3 * pc)
        acc = acc + jnp.dot(tap, w2_ref[kh], preferred_element_type=jnp.float32)

    out2_ref[...] = acc.astype(out2_ref.dtype)
    # per-block partial BN3 statistics
    psum_ref[...] = jnp.sum(acc, axis=0, keepdims=True)[None]
    psq_ref[...] = jnp.sum(acc * acc, axis=0, keepdims=True)[None]


def _stage3_kernel(x_ref, s3_ref, b3_ref, w3_ref, sc_ref, o_ref):
    """relu(bn3(.)) -> bf16 matmul (conv3) + residual add."""
    h = jnp.maximum(x_ref[...].astype(jnp.float32) * s3_ref[...] + b3_ref[...], 0.0)
    y = jnp.dot(h.astype(jnp.bfloat16), w3_ref[...],
                preferred_element_type=jnp.float32)
    o_ref[...] = y + sc_ref[...].astype(jnp.float32)


# ---------------------------------------------------------------------------
# helpers
# ---------------------------------------------------------------------------
def _bn_scale_shift(mean, var, gamma, beta):
    """Fold training-mode BN (batch stats, biased var) into scale/shift."""
    scale = gamma * jax.lax.rsqrt(jnp.maximum(var, 0.0) + EPS)
    shift = beta - mean * scale
    return scale[None, :], shift[None, :]


def _vmem_capacity_bytes():
    try:
        return int(pltpu.get_tpu_info().vmem_capacity_bytes)
    except Exception:
        return 64 << 20          # conservative fallback (v7x per-TC VMEM)


def _vmem_limit(need_bytes, cap):
    """Explicit scoped-VMEM limit: actual need x2, clamped to 90% of physical."""
    return int(min(max(2 * need_bytes, 32 << 20), int(cap * 0.9)))


def _pick_row_tile(m, row_bytes, fixed_bytes, cap):
    """Largest power-of-two row tile that divides m, keeps >=2 grid steps and
    fits (double-buffered) in ~60% of this generation's VMEM."""
    budget = int(cap * 0.6)
    for t in (2048, 1024, 512, 256, 128, 64, 32, 16, 8):
        if m % t or m // t < 2:
            continue
        if 2 * t * row_bytes + fixed_bytes <= budget:
            return t
    # TODO(synk): ragged m needs masked tail tiles; fall back to one step.
    return m


def _pick_row_block(h):
    """Output rows per stage-2 grid step (divisor of H, target 8)."""
    for rb in (8, 4, 2, 1):
        if h % rb == 0:
            return rb
    return 1


# ---------------------------------------------------------------------------
# forward pass
# ---------------------------------------------------------------------------
@jax.jit
def preact_bottleneck_forward(x_nchw, p):
    n, cin, hh, ww = x_nchw.shape
    planes, cout = p["w3"].shape                     # (P, 4P)
    wtot = p["wsc_w1"].shape[1]                      # 4P + P
    m = n * hh * ww
    assert ww % 8 == 0 and m % 8 == 0

    cap = _vmem_capacity_bytes()

    # NCHW -> NHWC -> (M, C): channels ride the lane axis.
    # TODO(synk): keep NHWC end-to-end / fuse the bn1 stats reduction with this
    #             relayout when the block is embedded in a full network.
    x = jnp.transpose(x_nchw, (0, 2, 3, 1)).reshape(m, cin)

    # ---- bn1 stats: single pass E[x], E[x^2] (no producing kernel to fuse into)
    mean1 = jnp.mean(x, axis=0)
    var1 = jnp.mean(x * x, axis=0) - mean1 * mean1
    s1, b1 = _bn_scale_shift(mean1, var1, p["g1"], p["b1"])

    # ---- generation-aware row tiling for the 1x1-conv stages (1 and 3)
    row_bytes = max(4 * cin + 2 * cout + 2 * planes,          # stage 1 per-row bytes
                    2 * planes + 2 * cout + 4 * cout)         # stage 3 per-row bytes
    fixed_bytes = 4 * (cin * wtot + planes * cout) + (1 << 20)
    tm = _pick_row_tile(m, row_bytes, fixed_bytes, cap)
    g = m // tm

    # ---- stage 1: bn1+relu -> [shortcut | conv1] (one bf16 dot) + bn2 partials
    need1 = 2 * tm * (4 * cin + 2 * cout + 2 * planes) + 4 * cin * wtot + (1 << 20)
    cp1 = pltpu.CompilerParams(dimension_semantics=("parallel",),
                               vmem_limit_bytes=_vmem_limit(need1, cap))
    shortcut, out1, ps2, pq2 = pl.pallas_call(
        _stage1_kernel,
        out_shape=(jax.ShapeDtypeStruct((m, cout), jnp.bfloat16),
                   jax.ShapeDtypeStruct((m, planes), jnp.bfloat16),
                   jax.ShapeDtypeStruct((g, 1, planes), jnp.float32),
                   jax.ShapeDtypeStruct((g, 1, planes), jnp.float32)),
        grid=(g,),
        in_specs=[pl.BlockSpec((tm, cin), lambda i: (i, 0)),
                  pl.BlockSpec((1, cin), lambda i: (0, 0)),
                  pl.BlockSpec((1, cin), lambda i: (0, 0)),
                  pl.BlockSpec((cin, wtot), lambda i: (0, 0))],   # VMEM-resident
        out_specs=(pl.BlockSpec((tm, cout), lambda i: (i, 0)),
                   pl.BlockSpec((tm, planes), lambda i: (i, 0)),
                   pl.BlockSpec((1, 1, planes), lambda i: (i, 0, 0)),
                   pl.BlockSpec((1, 1, planes), lambda i: (i, 0, 0))),
        compiler_params=cp1,
    )(x, s1, b1, p["wsc_w1"])

    # ---- finalize bn2 stats from in-kernel partials
    mean2 = jnp.sum(ps2, axis=(0, 1)) / m
    var2 = jnp.sum(pq2, axis=(0, 1)) / m - mean2 * mean2
    s2, b2 = _bn_scale_shift(mean2, var2, p["g2"], p["b2"])

    # ---- stage 2: bn2+relu fused with 3x3 conv, row-blocked grid (N, H/rb)
    rb = _pick_row_block(hh)
    nj = hh // rb
    need2 = (4 * hh * ww * planes + 4 * rb * ww * planes + 4 * 9 * planes * planes
             + 2 * (rb + 2) * ww * 3 * planes + (1 << 20))
    cp2 = pltpu.CompilerParams(dimension_semantics=("parallel", "parallel"),
                               vmem_limit_bytes=_vmem_limit(need2, cap))
    out1_nhwc = out1.reshape(n, hh, ww, planes)
    out2, ps3, pq3 = pl.pallas_call(
        _stage2_kernel,
        out_shape=(jax.ShapeDtypeStruct((m, planes), jnp.bfloat16),
                   jax.ShapeDtypeStruct((n * nj, 1, planes), jnp.float32),
                   jax.ShapeDtypeStruct((n * nj, 1, planes), jnp.float32)),
        grid=(n, nj),
        in_specs=[pl.BlockSpec((1, hh, ww, planes), lambda i, j: (i, 0, 0, 0)),
                  pl.BlockSpec((1, 1, planes), lambda i, j: (0, 0, 0)),
                  pl.BlockSpec((1, 1, planes), lambda i, j: (0, 0, 0)),
                  pl.BlockSpec((3, 3 * planes, planes), lambda i, j: (0, 0, 0))],
        out_specs=(pl.BlockSpec((rb * ww, planes), lambda i, j: (i * nj + j, 0)),
                   pl.BlockSpec((1, 1, planes), lambda i, j: (i * nj + j, 0, 0)),
                   pl.BlockSpec((1, 1, planes), lambda i, j: (i * nj + j, 0, 0))),
        scratch_shapes=[pltpu.VMEM((rb + 2, ww, 3 * planes), jnp.bfloat16)],
        compiler_params=cp2,
    )(out1_nhwc, s2.reshape(1, 1, planes), b2.reshape(1, 1, planes), p["w2"])

    # ---- finalize bn3 stats from in-kernel partials
    mean3 = jnp.sum(ps3, axis=(0, 1)) / m
    var3 = jnp.sum(pq3, axis=(0, 1)) / m - mean3 * mean3
    s3, b3 = _bn_scale_shift(mean3, var3, p["g3"], p["b3"])

    # ---- stage 3: bn3+relu -> conv3 + residual add (bf16 shortcut, f32 out)
    need3 = 2 * tm * (2 * planes + 2 * cout + 4 * cout) + 4 * planes * cout + (1 << 20)
    cp3 = pltpu.CompilerParams(dimension_semantics=("parallel",),
                               vmem_limit_bytes=_vmem_limit(need3, cap))
    out3 = pl.pallas_call(
        _stage3_kernel,
        out_shape=jax.ShapeDtypeStruct((m, cout), jnp.float32),
        grid=(g,),
        in_specs=[pl.BlockSpec((tm, planes), lambda i: (i, 0)),
                  pl.BlockSpec((1, planes), lambda i: (0, 0)),
                  pl.BlockSpec((1, planes), lambda i: (0, 0)),
                  pl.BlockSpec((planes, cout), lambda i: (0, 0)),
                  pl.BlockSpec((tm, cout), lambda i: (i, 0))],
        out_specs=pl.BlockSpec((tm, cout), lambda i: (i, 0)),
        compiler_params=cp3,
    )(out2, s3, b3, p["w3"], shortcut)

    return jnp.transpose(out3.reshape(n, hh, ww, cout), (0, 3, 1, 2))


# ---------------------------------------------------------------------------
# Pure-JAX f32 reference (mirrors the PyTorch module, NCHW)
# ---------------------------------------------------------------------------
def _ref_forward(x, raw):
    def bn(v, g, b):
        mean = v.mean(axis=(0, 2, 3), keepdims=True)
        var = ((v - mean) ** 2).mean(axis=(0, 2, 3), keepdims=True)
        return ((v - mean) / jnp.sqrt(var + EPS)) * g[None, :, None, None] \
            + b[None, :, None, None]

    def conv(v, wt, pad=0, stride=1):
        return jax.lax.conv_general_dilated(
            v, wt, (stride, stride), [(pad, pad), (pad, pad)],
            dimension_numbers=("NCHW", "OIHW", "NCHW"),
            precision=jax.lax.Precision.HIGHEST)

    out = jax.nn.relu(bn(x, raw["g1"], raw["b1"]))
    shortcut = conv(out, raw["wsc"])
    out = conv(out, raw["w1"])
    out = conv(jax.nn.relu(bn(out, raw["g2"], raw["b2"])), raw["w2"], pad=1)
    out = conv(jax.nn.relu(bn(out, raw["g3"], raw["b3"])), raw["w3"])
    return out + shortcut


# ---------------------------------------------------------------------------
if __name__ == "__main__":
    in_planes, planes, stride, expansion = 8, 4, 1, 4
    N, H, W = 2, 16, 16

    key = jax.random.PRNGKey(0)
    ks = jax.random.split(key, 11)

    # Deterministic synthetic parameters (PyTorch OIHW conv weights).
    raw = {
        "w1":  0.2 * jax.random.normal(ks[0], (planes, in_planes, 1, 1), jnp.float32),
        "w2":  0.2 * jax.random.normal(ks[1], (planes, planes, 3, 3), jnp.float32),
        "w3":  0.2 * jax.random.normal(ks[2], (expansion * planes, planes, 1, 1), jnp.float32),
        "wsc": 0.2 * jax.random.normal(ks[3], (expansion * planes, in_planes, 1, 1), jnp.float32),
        "g1": 1.0 + 0.1 * jax.random.normal(ks[4], (in_planes,), jnp.float32),
        "b1": 0.1 * jax.random.normal(ks[5], (in_planes,), jnp.float32),
        "g2": 1.0 + 0.1 * jax.random.normal(ks[6], (planes,), jnp.float32),
        "b2": 0.1 * jax.random.normal(ks[7], (planes,), jnp.float32),
        "g3": 1.0 + 0.1 * jax.random.normal(ks[8], (planes,), jnp.float32),
        "b3": 0.1 * jax.random.normal(ks[9], (planes,), jnp.float32),
    }

    # Matmul-form weights for the channels-last Pallas path (pre-cast to bf16).
    params = {
        # shortcut and conv1 concatenated (shortcut first -> lane-dense slab).
        "wsc_w1": jnp.concatenate(
            [raw["wsc"].reshape(expansion * planes, in_planes).T,    # (Cin, 4P)
             raw["w1"].reshape(planes, in_planes).T],                # (Cin, P)
            axis=1).astype(jnp.bfloat16),                            # (Cin, 5P)
        # 3x3 conv: per-kh weight with the 3 width taps stacked along K.
        # rows ordered [kw=0 channels | kw=1 channels | kw=2 channels].
        "w2": jnp.stack(
            [jnp.concatenate([raw["w2"][:, :, kh, kw].T for kw in range(3)], axis=0)
             for kh in range(3)], axis=0).astype(jnp.bfloat16),      # (3, 3P, P)
        "w3": raw["w3"].reshape(expansion * planes, planes).T.astype(jnp.bfloat16),  # (P, 4P)
        "g1": raw["g1"], "b1": raw["b1"],
        "g2": raw["g2"], "b2": raw["b2"],
        "g3": raw["g3"], "b3": raw["b3"],
    }

    x = jax.random.normal(ks[10], (N, in_planes, H, W), jnp.float32)

    out = jax.block_until_ready(preact_bottleneck_forward(x, params))
    ref = _ref_forward(x, raw)

    assert out.shape == (N, expansion * planes, H, W), out.shape
    err = float(jnp.max(jnp.abs(out - ref)))
    # Tolerance sized for bf16 MXU operands + bf16 intermediates vs f32 reference.
    assert err < 5e-2, f"max abs error {err}"
    print("KERNEL_OK")
</pallas_src>

<mosaic_0001>
module attributes {stable_mosaic.version = 11 : i64} {
  func.func @_stage1_kernel(%arg0: i32, %arg1: memref<256x8xf32, #tpu.memory_space<vmem>>, %arg2: memref<1x8xf32, #tpu.memory_space<vmem>>, %arg3: memref<1x8xf32, #tpu.memory_space<vmem>>, %arg4: memref<8x20xbf16, #tpu.memory_space<vmem>>, %arg5: memref<256x16xbf16, #tpu.memory_space<vmem>>, %arg6: memref<256x4xbf16, #tpu.memory_space<vmem>>, %arg7: memref<1x1x4xf32, #tpu.memory_space<vmem>>, %arg8: memref<1x1x4xf32, #tpu.memory_space<vmem>>) attributes {dimension_semantics = [#tpu.dimension_semantics<parallel>], iteration_bounds = array<i64: 2>, scalar_prefetch = 0 : i64, scratch_operands = 0 : i64, tpu.core_type = #tpu.core_type<tc>, window_params = [{transform_indices = @transform_0, window_bounds = array<i64: 256, 8>}, {pipeline_mode = #tpu.pipeline_mode<synchronous>, transform_indices = @transform_1, window_bounds = array<i64: 1, 8>}, {pipeline_mode = #tpu.pipeline_mode<synchronous>, transform_indices = @transform_2, window_bounds = array<i64: 1, 8>}, {pipeline_mode = #tpu.pipeline_mode<synchronous>, transform_indices = @transform_3, window_bounds = array<i64: 8, 20>}, {transform_indices = @transform_4, window_bounds = array<i64: 256, 16>}, {transform_indices = @transform_5, window_bounds = array<i64: 256, 4>}, {transform_indices = @transform_6, window_bounds = array<i64: 1, 1, 4>}, {transform_indices = @transform_7, window_bounds = array<i64: 1, 1, 4>}]} {
    %c0 = arith.constant 0 : index
    %c0_0 = arith.constant 0 : index
    %0 = vector.load %arg1[%c0, %c0_0] : memref<256x8xf32, #tpu.memory_space<vmem>>, vector<256x8xf32>
    %c0_1 = arith.constant 0 : index
    %c0_2 = arith.constant 0 : index
    %1 = vector.load %arg2[%c0_1, %c0_2] : memref<1x8xf32, #tpu.memory_space<vmem>>, vector<1x8xf32>
    %2 = vector.broadcast %1 : vector<1x8xf32> to vector<256x8xf32>
    %3 = arith.mulf %0, %2 : vector<256x8xf32>
    %c0_3 = arith.constant 0 : index
    %c0_4 = arith.constant 0 : index
    %4 = vector.load %arg3[%c0_3, %c0_4] : memref<1x8xf32, #tpu.memory_space<vmem>>, vector<1x8xf32>
    %5 = vector.broadcast %4 : vector<1x8xf32> to vector<256x8xf32>
    %6 = arith.addf %3, %5 : vector<256x8xf32>
    %cst = arith.constant 0.000000e+00 : f32
    %7 = vector.broadcast %cst : f32 to vector<256x8xf32>
    %8 = arith.maximumf %6, %7 : vector<256x8xf32>
    %9 = arith.truncf %8 : vector<256x8xf32> to vector<256x8xbf16>
    %c0_5 = arith.constant 0 : index
    %c0_6 = arith.constant 0 : index
    %10 = vector.load %arg4[%c0_5, %c0_6] : memref<8x20xbf16, #tpu.memory_space<vmem>>, vector<8x20xbf16>
    %cst_7 = arith.constant dense<0.000000e+00> : vector<256x20xf32>
    %11 = tpu.matmul %9, %10, %cst_7 {dimension_numbers = #tpu.dot_dimension_numbers<[1], [0], [0], [1], [0, 0, 1, 1], [], []>} : vector<256x8xbf16>, vector<8x20xbf16>, vector<256x20xf32> -> vector<256x20xf32>
    %12 = vector.extract_strided_slice %11 {offsets = [0, 0], sizes = [256, 16], strides = [1, 1]} : vector<256x20xf32> to vector<256x16xf32>
    %13 = arith.truncf %12 : vector<256x16xf32> to vector<256x16xbf16>
    %c0_8 = arith.constant 0 : index
    %c0_9 = arith.constant 0 : index
    %14 = vector.load %arg5[%c0_8, %c0_9] : memref<256x16xbf16, #tpu.memory_space<vmem>>, vector<256x16xbf16>
    tpu.vector_store %arg5[%c0_8, %c0_9], %13 {strides = array<i32>} : memref<256x16xbf16, #tpu.memory_space<vmem>>, vector<256x16xbf16>,
    %15 = vector.extract_strided_slice %11 {offsets = [0, 16], sizes = [256, 4], strides = [1, 1]} : vector<256x20xf32> to vector<256x4xf32>
    %16 = arith.truncf %15 : vector<256x4xf32> to vector<256x4xbf16>
    %c0_10 = arith.constant 0 : index
    %c0_11 = arith.constant 0 : index
    %17 = vector.load %arg6[%c0_10, %c0_11] : memref<256x4xbf16, #tpu.memory_space<vmem>>, vector<256x4xbf16>
    tpu.vector_store %arg6[%c0_10, %c0_11], %16 {strides = array<i32>} : memref<256x4xbf16, #tpu.memory_space<vmem>>, vector<256x4xbf16>,
    %cst_12 = arith.constant dense<0.000000e+00> : vector<4xf32>
    %18 = vector.multi_reduction <add>, %15, %cst_12 [0] : vector<256x4xf32> to vector<4xf32>
    %19 = vector.shape_cast %18 : vector<4xf32> to vector<1x4xf32>
    %20 = vector.shape_cast %19 : vector<1x4xf32> to vector<1x1x4xf32>
    %c0_13 = arith.constant 0 : index
    %c0_14 = arith.constant 0 : index
    %c0_15 = arith.constant 0 : index
    %21 = vector.load %arg7[%c0_13, %c0_14, %c0_15] : memref<1x1x4xf32, #tpu.memory_space<vmem>>, vector<1x1x4xf32>
    tpu.vector_store %arg7[%c0_13, %c0_14, %c0_15], %20 {strides = array<i32>} : memref<1x1x4xf32, #tpu.memory_space<vmem>>, vector<1x1x4xf32>,
    %22 = arith.mulf %15, %15 : vector<256x4xf32>
    %cst_16 = arith.constant dense<0.000000e+00> : vector<4xf32>
    %23 = vector.multi_reduction <add>, %22, %cst_16 [0] : vector<256x4xf32> to vector<4xf32>
    %24 = vector.shape_cast %23 : vector<4xf32> to vector<1x4xf32>
    %25 = vector.shape_cast %24 : vector<1x4xf32> to vector<1x1x4xf32>
    %c0_17 = arith.constant 0 : index
    %c0_18 = arith.constant 0 : index
    %c0_19 = arith.constant 0 : index
    %26 = vector.load %arg8[%c0_17, %c0_18, %c0_19] : memref<1x1x4xf32, #tpu.memory_space<vmem>>, vector<1x1x4xf32>
    tpu.vector_store %arg8[%c0_17, %c0_18, %c0_19], %25 {strides = array<i32>} : memref<1x1x4xf32, #tpu.memory_space<vmem>>, vector<1x1x4xf32>,
    return
  }
  func.func @transform_0(%arg0: i32) -> (i32, i32) {
    %c0_i32 = arith.constant 0 : i32
    %c0_i32_0 = arith.constant 0 : i32
    return %arg0, %c0_i32 : i32, i32
  }
  func.func @transform_1(%arg0: i32) -> (i32, i32) {
    %c0_i32 = arith.constant 0 : i32
    %c0_i32_0 = arith.constant 0 : i32
    %c0_i32_1 = arith.constant 0 : i32
    return %c0_i32, %c0_i32_0 : i32, i32
  }
  func.func @transform_2(%arg0: i32) -> (i32, i32) {
    %c0_i32 = arith.constant 0 : i32
    %c0_i32_0 = arith.constant 0 : i32
    %c0_i32_1 = arith.constant 0 : i32
    return %c0_i32, %c0_i32_0 : i32, i32
  }
  func.func @transform_3(%arg0: i32) -> (i32, i32) {
    %c0_i32 = arith.constant 0 : i32
    %c0_i32_0 = arith.constant 0 : i32
    %c0_i32_1 = arith.constant 0 : i32
    return %c0_i32, %c0_i32_0 : i32, i32
  }
  func.func @transform_4(%arg0: i32) -> (i32, i32) {
    %c0_i32 = arith.constant 0 : i32
    %c0_i32_0 = arith.constant 0 : i32
    return %arg0, %c0_i32 : i32, i32
  }
  func.func @transform_5(%arg0: i32) -> (i32, i32) {
    %c0_i32 = arith.constant 0 : i32
    %c0_i32_0 = arith.constant 0 : i32
    return %arg0, %c0_i32 : i32, i32
  }
  func.func @transform_6(%arg0: i32) -> (i32, i32, i32) {
    %c0_i32 = arith.constant 0 : i32
    %c0_i32_0 = arith.constant 0 : i32
    %c0_i32_1 = arith.constant 0 : i32
    return %arg0, %c0_i32, %c0_i32_0 : i32, i32, i32
  }
  func.func @transform_7(%arg0: i32) -> (i32, i32, i32) {
    %c0_i32 = arith.constant 0 : i32
    %c0_i32_0 = arith.constant 0 : i32
    %c0_i32_1 = arith.constant 0 : i32
    return %arg0, %c0_i32, %c0_i32_0 : i32, i32, i32
  }
}

module attributes {stable_mosaic.version = 11 : i64} {
  func.func @_stage3_kernel(%arg0: i32, %arg1: memref<256x4xbf16, #tpu.memory_space<vmem>>, %arg2: memref<1x4xf32, #tpu.memory_space<vmem>>, %arg3: memref<1x4xf32, #tpu.memory_space<vmem>>, %arg4: memref<4x16xbf16, #tpu.memory_space<vmem>>, %arg5: memref<256x16xbf16, #tpu.memory_space<vmem>>, %arg6: memref<256x16xf32, #tpu.memory_space<vmem>>) attributes {dimension_semantics = [#tpu.dimension_semantics<parallel>], iteration_bounds = array<i64: 2>, scalar_prefetch = 0 : i64, scratch_operands = 0 : i64, tpu.core_type = #tpu.core_type<tc>, window_params = [{transform_indices = @transform_0, window_bounds = array<i64: 256, 4>}, {pipeline_mode = #tpu.pipeline_mode<synchronous>, transform_indices = @transform_1, window_bounds = array<i64: 1, 4>}, {pipeline_mode = #tpu.pipeline_mode<synchronous>, transform_indices = @transform_2, window_bounds = array<i64: 1, 4>}, {pipeline_mode = #tpu.pipeline_mode<synchronous>, transform_indices = @transform_3, window_bounds = array<i64: 4, 16>}, {transform_indices = @transform_4, window_bounds = array<i64: 256, 16>}, {transform_indices = @transform_5, window_bounds = array<i64: 256, 16>}]} {
    %c0 = arith.constant 0 : index
    %c0_0 = arith.constant 0 : index
    %0 = vector.load %arg1[%c0, %c0_0] : memref<256x4xbf16, #tpu.memory_space<vmem>>, vector<256x4xbf16>
    %1 = arith.extf %0 : vector<256x4xbf16> to vector<256x4xf32>
    %c0_1 = arith.constant 0 : index
    %c0_2 = arith.constant 0 : index
    %2 = vector.load %arg2[%c0_1, %c0_2] : memref<1x4xf32, #tpu.memory_space<vmem>>, vector<1x4xf32>
    %3 = vector.broadcast %2 : vector<1x4xf32> to vector<256x4xf32>
    %4 = arith.mulf %1, %3 : vector<256x4xf32>
    %c0_3 = arith.constant 0 : index
    %c0_4 = arith.constant 0 : index
    %5 = vector.load %arg3[%c0_3, %c0_4] : memref<1x4xf32, #tpu.memory_space<vmem>>, vector<1x4xf32>
    %6 = vector.broadcast %5 : vector<1x4xf32> to vector<256x4xf32>
    %7 = arith.addf %4, %6 : vector<256x4xf32>
    %cst = arith.constant 0.000000e+00 : f32
    %8 = vector.broadcast %cst : f32 to vector<256x4xf32>
    %9 = arith.maximumf %7, %8 : vector<256x4xf32>
    %10 = arith.truncf %9 : vector<256x4xf32> to vector<256x4xbf16>
    %c0_5 = arith.constant 0 : index
    %c0_6 = arith.constant 0 : index
    %11 = vector.load %arg4[%c0_5, %c0_6] : memref<4x16xbf16, #tpu.memory_space<vmem>>, vector<4x16xbf16>
    %cst_7 = arith.constant dense<0.000000e+00> : vector<256x16xf32>
    %12 = tpu.matmul %10, %11, %cst_7 {dimension_numbers = #tpu.dot_dimension_numbers<[1], [0], [0], [1], [0, 0, 1, 1], [], []>} : vector<256x4xbf16>, vector<4x16xbf16>, vector<256x16xf32> -> vector<256x16xf32>
    %c0_8 = arith.constant 0 : index
    %c0_9 = arith.constant 0 : index
    %13 = vector.load %arg5[%c0_8, %c0_9] : memref<256x16xbf16, #tpu.memory_space<vmem>>, vector<256x16xbf16>
    %14 = arith.extf %13 : vector<256x16xbf16> to vector<256x16xf32>
    %15 = arith.addf %12, %14 : vector<256x16xf32>
    %c0_10 = arith.constant 0 : index
    %c0_11 = arith.constant 0 : index
    %16 = vector.load %arg6[%c0_10, %c0_11] : memref<256x16xf32, #tpu.memory_space<vmem>>, vector<256x16xf32>
    tpu.vector_store %arg6[%c0_10, %c0_11], %15 {strides = array<i32>} : memref<256x16xf32, #tpu.memory_space<vmem>>, vector<256x16xf32>,
    return
  }
  func.func @transform_0(%arg0: i32) -> (i32, i32) {
    %c0_i32 = arith.constant 0 : i32
    %c0_i32_0 = arith.constant 0 : i32
    return %arg0, %c0_i32 : i32, i32
  }
  func.func @transform_1(%arg0: i32) -> (i32, i32) {
    %c0_i32 = arith.constant 0 : i32
    %c0_i32_0 = arith.constant 0 : i32
    %c0_i32_1 = arith.constant 0 : i32
    return %c0_i32, %c0_i32_0 : i32, i32
  }
  func.func @transform_2(%arg0: i32) -> (i32, i32) {
    %c0_i32 = arith.constant 0 : i32
    %c0_i32_0 = arith.constant 0 : i32
    %c0_i32_1 = arith.constant 0 : i32
    return %c0_i32, %c0_i32_0 : i32, i32
  }
  func.func @transform_3(%arg0: i32) -> (i32, i32) {
    %c0_i32 = arith.constant 0 : i32
    %c0_i32_0 = arith.constant 0 : i32
    %c0_i32_1 = arith.constant 0 : i32
    return %c0_i32, %c0_i32_0 : i32, i32
  }
  func.func @transform_4(%arg0: i32) -> (i32, i32) {
    %c0_i32 = arith.constant 0 : i32
    %c0_i32_0 = arith.constant 0 : i32
    return %arg0, %c0_i32 : i32, i32
  }
  func.func @transform_5(%arg0: i32) -> (i32, i32) {
    %c0_i32 = arith.constant 0 : i32
    %c0_i32_0 = arith.constant 0 : i32
    return %arg0, %c0_i32 : i32, i32
  }
}

module attributes {stable_mosaic.version = 11 : i64} {
  func.func @_stage2_kernel(%arg0: i32, %arg1: i32, %arg2: memref<1x16x16x4xbf16, #tpu.memory_space<vmem>>, %arg3: memref<1x1x4xf32, #tpu.memory_space<vmem>>, %arg4: memref<1x1x4xf32, #tpu.memory_space<vmem>>, %arg5: memref<3x12x4xbf16, #tpu.memory_space<vmem>>, %arg6: memref<128x4xbf16, #tpu.memory_space<vmem>>, %arg7: memref<1x1x4xf32, #tpu.memory_space<vmem>>, %arg8: memref<1x1x4xf32, #tpu.memory_space<vmem>>, %arg9: memref<10x16x12xbf16, #tpu.memory_space<vmem>>) attributes {dimension_semantics = [#tpu.dimension_semantics<parallel>, #tpu.dimension_semantics<parallel>], iteration_bounds = array<i64: 2, 2>, scalar_prefetch = 0 : i64, scratch_operands = 1 : i64, tpu.core_type = #tpu.core_type<tc>, window_params = [{transform_indices = @transform_0, window_bounds = array<i64: 1, 16, 16, 4>}, {pipeline_mode = #tpu.pipeline_mode<synchronous>, transform_indices = @transform_1, window_bounds = array<i64: 1, 1, 4>}, {pipeline_mode = #tpu.pipeline_mode<synchronous>, transform_indices = @transform_2, window_bounds = array<i64: 1, 1, 4>}, {pipeline_mode = #tpu.pipeline_mode<synchronous>, transform_indices = @transform_3, window_bounds = array<i64: 3, 12, 4>}, {transform_indices = @transform_4, window_bounds = array<i64: 128, 4>}, {transform_indices = @transform_5, window_bounds = array<i64: 1, 1, 4>}, {transform_indices = @transform_6, window_bounds = array<i64: 1, 1, 4>}]} {
    %c8_i32 = arith.constant 8 : i32
    %0 = arith.muli %arg1, %c8_i32 : i32
    %c0 = arith.constant 0 : index
    %c0_0 = arith.constant 0 : index
    %c0_1 = arith.constant 0 : index
    %1 = vector.load %arg3[%c0, %c0_0, %c0_1] : memref<1x1x4xf32, #tpu.memory_space<vmem>>, vector<1x1x4xf32>
    %c0_2 = arith.constant 0 : index
    %c0_3 = arith.constant 0 : index
    %c0_4 = arith.constant 0 : index
    %2 = vector.load %arg4[%c0_2, %c0_3, %c0_4] : memref<1x1x4xf32, #tpu.memory_space<vmem>>, vector<1x1x4xf32>
    %c0_5 = arith.constant 0 : index
    %3 = arith.index_cast %0 : i32 to index
    %c0_6 = arith.constant 0 : index
    %c0_7 = arith.constant 0 : index
    %4 = vector.load %arg2[%c0_5, %3, %c0_6, %c0_7] : memref<1x16x16x4xbf16, #tpu.memory_space<vmem>>, vector<1x8x16x4xbf16>
    %5 = vector.shape_cast %4 : vector<1x8x16x4xbf16> to vector<8x16x4xbf16>
    %6 = arith.extf %5 : vector<8x16x4xbf16> to vector<8x16x4xf32>
    %7 = vector.broadcast %1 : vector<1x1x4xf32> to vector<8x16x4xf32>
    %8 = arith.mulf %6, %7 : vector<8x16x4xf32>
    %9 = vector.broadcast %2 : vector<1x1x4xf32> to vector<8x16x4xf32>
    %10 = arith.addf %8, %9 : vector<8x16x4xf32>
    %cst = arith.constant 0.000000e+00 : f32
    %11 = vector.broadcast %cst : f32 to vector<8x16x4xf32>
    %12 = arith.maximumf %10, %11 : vector<8x16x4xf32>
    %13 = arith.truncf %12 : vector<8x16x4xf32> to vector<8x16x4xbf16>
    %cst_8 = arith.constant 0.000000e+00 : bf16
    %14 = vector.broadcast %cst_8 : bf16 to vector<8x1x4xbf16>
    %15 = vector.extract_strided_slice %13 {offsets = [0, 0, 0], sizes = [8, 15, 4], strides = [1, 1, 1]} : vector<8x16x4xbf16> to vector<8x15x4xbf16>
    %16 = tpu.concatenate %14, %15 in 1 : vector<8x1x4xbf16>, vector<8x15x4xbf16> -> vector<8x16x4xbf16>
    %17 = vector.extract_strided_slice %13 {offsets = [0, 1, 0], sizes = [8, 15, 4], strides = [1, 1, 1]} : vector<8x16x4xbf16> to vector<8x15x4xbf16>
    %18 = tpu.concatenate %17, %14 in 1 : vector<8x15x4xbf16>, vector<8x1x4xbf16> -> vector<8x16x4xbf16>
    %19 = tpu.concatenate %16, %13, %18 in 2 : vector<8x16x4xbf16>, vector<8x16x4xbf16>, vector<8x16x4xbf16> -> vector<8x16x12xbf16>
    %c1 = arith.constant 1 : index
    %c0_9 = arith.constant 0 : index
    %c0_10 = arith.constant 0 : index
    %20 = vector.load %arg9[%c1, %c0_9, %c0_10] : memref<10x16x12xbf16, #tpu.memory_space<vmem>>, vector<8x16x12xbf16>
    tpu.vector_store %arg9[%c1, %c0_9, %c0_10], %19 {strides = array<i32>} : memref<10x16x12xbf16, #tpu.memory_space<vmem>>, vector<8x16x12xbf16>,
    %cst_11 = arith.constant 0.000000e+00 : bf16
    %21 = vector.broadcast %cst_11 : bf16 to vector<1x16x12xbf16>
    %c0_i32 = arith.constant 0 : i32
    %22 = arith.cmpi eq, %arg1, %c0_i32 : i32
    %23 = arith.extui %22 : i1 to i32
    %c0_i32_12 = arith.constant 0 : i32
    %24 = arith.cmpi ne, %23, %c0_i32_12 : i32
    scf.if %24 {
      %c0_49 = arith.constant 0 : index
      %c0_50 = arith.constant 0 : index
      %c0_51 = arith.constant 0 : index
      %64 = vector.load %arg9[%c0_49, %c0_50, %c0_51] : memref<10x16x12xbf16, #tpu.memory_space<vmem>>, vector<1x16x12xbf16>
      tpu.vector_store %arg9[%c0_49, %c0_50, %c0_51], %21 {strides = array<i32>} : memref<10x16x12xbf16, #tpu.memory_space<vmem>>, vector<1x16x12xbf16>,
    } else {
    }
    %c0_i32_13 = arith.constant 0 : i32
    %25 = arith.cmpi sgt, %arg1, %c0_i32_13 : i32
    %26 = arith.extui %25 : i1 to i32
    %c0_i32_14 = arith.constant 0 : i32
    %27 = arith.cmpi ne, %26, %c0_i32_14 : i32
    scf.if %27 {
      %c1_i32_49 = arith.constant 1 : i32
      %64 = arith.subi %0, %c1_i32_49 : i32
      %c0_50 = arith.constant 0 : index
      %65 = arith.index_cast %64 : i32 to index
      %c0_51 = arith.constant 0 : index
      %c0_52 = arith.constant 0 : index
      %66 = vector.load %arg2[%c0_50, %65, %c0_51, %c0_52] : memref<1x16x16x4xbf16, #tpu.memory_space<vmem>>, vector<1x1x16x4xbf16>
      %67 = vector.shape_cast %66 : vector<1x1x16x4xbf16> to vector<1x16x4xbf16>
      %68 = arith.extf %67 : vector<1x16x4xbf16> to vector<1x16x4xf32>
      %69 = vector.broadcast %1 : vector<1x1x4xf32> to vector<1x16x4xf32>
      %70 = arith.mulf %68, %69 : vector<1x16x4xf32>
      %71 = vector.broadcast %2 : vector<1x1x4xf32> to vector<1x16x4xf32>
      %72 = arith.addf %70, %71 : vector<1x16x4xf32>
      %cst_53 = arith.constant 0.000000e+00 : f32
      %73 = vector.broadcast %cst_53 : f32 to vector<1x16x4xf32>
      %74 = arith.maximumf %72, %73 : vector<1x16x4xf32>
      %75 = arith.truncf %74 : vector<1x16x4xf32> to vector<1x16x4xbf16>
      %cst_54 = arith.constant 0.000000e+00 : bf16
      %76 = vector.broadcast %cst_54 : bf16 to vector<1x1x4xbf16>
      %77 = vector.extract_strided_slice %75 {offsets = [0, 0, 0], sizes = [1, 15, 4], strides = [1, 1, 1]} : vector<1x16x4xbf16> to vector<1x15x4xbf16>
      %78 = tpu.concatenate %76, %77 in 1 : vector<1x1x4xbf16>, vector<1x15x4xbf16> -> vector<1x16x4xbf16>
      %79 = vector.extract_strided_slice %75 {offsets = [0, 1, 0], sizes = [1, 15, 4], strides = [1, 1, 1]} : vector<1x16x4xbf16> to vector<1x15x4xbf16>
      %80 = tpu.concatenate %79, %76 in 1 : vector<1x15x4xbf16>, vector<1x1x4xbf16> -> vector<1x16x4xbf16>
      %81 = tpu.concatenate %78, %75, %80 in 2 : vector<1x16x4xbf16>, vector<1x16x4xbf16>, vector<1x16x4xbf16> -> vector<1x16x12xbf16>
      %c0_55 = arith.constant 0 : index
      %c0_56 = arith.constant 0 : index
      %c0_57 = arith.constant 0 : index
      %82 = vector.load %arg9[%c0_55, %c0_56, %c0_57] : memref<10x16x12xbf16, #tpu.memory_space<vmem>>, vector<1x16x12xbf16>
      tpu.vector_store %arg9[%c0_55, %c0_56, %c0_57], %81 {strides = array<i32>} : memref<10x16x12xbf16, #tpu.memory_space<vmem>>, vector<1x16x12xbf16>,
    } else {
    }
    %c1_i32 = arith.constant 1 : i32
    %28 = arith.cmpi eq, %arg1, %c1_i32 : i32
    %29 = arith.extui %28 : i1 to i32
    %c0_i32_15 = arith.constant 0 : i32
    %30 = arith.cmpi ne, %29, %c0_i32_15 : i32
    scf.if %30 {
      %c9 = arith.constant 9 : index
      %c0_49 = arith.constant 0 : index
      %c0_50 = arith.constant 0 : index
      %64 = vector.load %arg9[%c9, %c0_49, %c0_50] : memref<10x16x12xbf16, #tpu.memory_space<vmem>>, vector<1x16x12xbf16>
      tpu.vector_store %arg9[%c9, %c0_49, %c0_50], %21 {strides = array<i32>} : memref<10x16x12xbf16, #tpu.memory_space<vmem>>, vector<1x16x12xbf16>,
    } else {
    }
    %c1_i32_16 = arith.constant 1 : i32
    %31 = arith.cmpi slt, %arg1, %c1_i32_16 : i32
    %32 = arith.extui %31 : i1 to i32
    %c0_i32_17 = arith.constant 0 : i32
    %33 = arith.cmpi ne, %32, %c0_i32_17 : i32
    scf.if %33 {
      %c8_i32_49 = arith.constant 8 : i32
      %64 = arith.addi %0, %c8_i32_49 : i32
      %c0_50 = arith.constant 0 : index
      %65 = arith.index_cast %64 : i32 to index
      %c0_51 = arith.constant 0 : index
      %c0_52 = arith.constant 0 : index
      %66 = vector.load %arg2[%c0_50, %65, %c0_51, %c0_52] : memref<1x16x16x4xbf16, #tpu.memory_space<vmem>>, vector<1x1x16x4xbf16>
      %67 = vector.shape_cast %66 : vector<1x1x16x4xbf16> to vector<1x16x4xbf16>
      %68 = arith.extf %67 : vector<1x16x4xbf16> to vector<1x16x4xf32>
      %69 = vector.broadcast %1 : vector<1x1x4xf32> to vector<1x16x4xf32>
      %70 = arith.mulf %68, %69 : vector<1x16x4xf32>
      %71 = vector.broadcast %2 : vector<1x1x4xf32> to vector<1x16x4xf32>
      %72 = arith.addf %70, %71 : vector<1x16x4xf32>
      %cst_53 = arith.constant 0.000000e+00 : f32
      %73 = vector.broadcast %cst_53 : f32 to vector<1x16x4xf32>
      %74 = arith.maximumf %72, %73 : vector<1x16x4xf32>
      %75 = arith.truncf %74 : vector<1x16x4xf32> to vector<1x16x4xbf16>
      %cst_54 = arith.constant 0.000000e+00 : bf16
      %76 = vector.broadcast %cst_54 : bf16 to vector<1x1x4xbf16>
      %77 = vector.extract_strided_slice %75 {offsets = [0, 0, 0], sizes = [1, 15, 4], strides = [1, 1, 1]} : vector<1x16x4xbf16> to vector<1x15x4xbf16>
      %78 = tpu.concatenate %76, %77 in 1 : vector<1x1x4xbf16>, vector<1x15x4xbf16> -> vector<1x16x4xbf16>
      %79 = vector.extract_strided_slice %75 {offsets = [0, 1, 0], sizes = [1, 15, 4], strides = [1, 1, 1]} : vector<1x16x4xbf16> to vector<1x15x4xbf16>
      %80 = tpu.concatenate %79, %76 in 1 : vector<1x15x4xbf16>, vector<1x1x4xbf16> -> vector<1x16x4xbf16>
      %81 = tpu.concatenate %78, %75, %80 in 2 : vector<1x16x4xbf16>, vector<1x16x4xbf16>, vector<1x16x4xbf16> -> vector<1x16x12xbf16>
      %c9 = arith.constant 9 : index
      %c0_55 = arith.constant 0 : index
      %c0_56 = arith.constant 0 : index
      %82 = vector.load %arg9[%c9, %c0_55, %c0_56] : memref<10x16x12xbf16, #tpu.memory_space<vmem>>, vector<1x16x12xbf16>
      tpu.vector_store %arg9[%c9, %c0_55, %c0_56], %81 {strides = array<i32>} : memref<10x16x12xbf16, #tpu.memory_space<vmem>>, vector<1x16x12xbf16>,
    } else {
    }
    %cst_18 = arith.constant 0.000000e+00 : f32
    %34 = vector.broadcast %cst_18 : f32 to vector<128x4xf32>
    %c0_19 = arith.constant 0 : index
    %c0_20 = arith.constant 0 : index
    %c0_21 = arith.constant 0 : index
    %35 = vector.load %arg9[%c0_19, %c0_20, %c0_21] : memref<10x16x12xbf16, #tpu.memory_space<vmem>>, vector<8x16x12xbf16>
    %36 = vector.shape_cast %35 : vector<8x16x12xbf16> to vector<128x12xbf16>
    %c0_22 = arith.constant 0 : index
    %c0_23 = arith.constant 0 : index
    %c0_24 = arith.constant 0 : index
    %37 = vector.load %arg5[%c0_22, %c0_23, %c0_24] : memref<3x12x4xbf16, #tpu.memory_space<vmem>>, vector<1x12x4xbf16>
    %38 = vector.shape_cast %37 : vector<1x12x4xbf16> to vector<12x4xbf16>
    %cst_25 = arith.constant dense<0.000000e+00> : vector<128x4xf32>
    %39 = tpu.matmul %36, %38, %cst_25 {dimension_numbers = #tpu.dot_dimension_numbers<[1], [0], [0], [1], [0, 0, 1, 1], [], []>} : vector<128x12xbf16>, vector<12x4xbf16>, vector<128x4xf32> -> vector<128x4xf32>
    %40 = arith.addf %34, %39 : vector<128x4xf32>
    %c1_26 = arith.constant 1 : index
    %c0_27 = arith.constant 0 : index
    %c0_28 = arith.constant 0 : index
    %41 = vector.load %arg9[%c1_26, %c0_27, %c0_28] : memref<10x16x12xbf16, #tpu.memory_space<vmem>>, vector<8x16x12xbf16>
    %42 = vector.shape_cast %41 : vector<8x16x12xbf16> to vector<128x12xbf16>
    %c1_29 = arith.constant 1 : index
    %c0_30 = arith.constant 0 : index
    %c0_31 = arith.constant 0 : index
    %43 = vector.load %arg5[%c1_29, %c0_30, %c0_31] : memref<3x12x4xbf16, #tpu.memory_space<vmem>>, vector<1x12x4xbf16>
    %44 = vector.shape_cast %43 : vector<1x12x4xbf16> to vector<12x4xbf16>
    %cst_32 = arith.constant dense<0.000000e+00> : vector<128x4xf32>
    %45 = tpu.matmul %42, %44, %cst_32 {dimension_numbers = #tpu.dot_dimension_numbers<[1], [0], [0], [1], [0, 0, 1, 1], [], []>} : vector<128x12xbf16>, vector<12x4xbf16>, vector<128x4xf32> -> vector<128x4xf32>
    %46 = arith.addf %40, %45 : vector<128x4xf32>
    %c2 = arith.constant 2 : index
    %c0_33 = arith.constant 0 : index
    %c0_34 = arith.constant 0 : index
    %47 = vector.load %arg9[%c2, %c0_33, %c0_34] : memref<10x16x12xbf16, #tpu.memory_space<vmem>>, vector<8x16x12xbf16>
    %48 = vector.shape_cast %47 : vector<8x16x12xbf16> to vector<128x12xbf16>
    %c2_35 = arith.constant 2 : index
    %c0_36 = arith.constant 0 : index
    %c0_37 = arith.constant 0 : index
    %49 = vector.load %arg5[%c2_35, %c0_36, %c0_37] : memref<3x12x4xbf16, #tpu.memory_space<vmem>>, vector<1x12x4xbf16>
    %50 = vector.shape_cast %49 : vector<1x12x4xbf16> to vector<12x4xbf16>
    %cst_38 = arith.constant dense<0.000000e+00> : vector<128x4xf32>
    %51 = tpu.matmul %48, %50, %cst_38 {dimension_numbers = #tpu.dot_dimension_numbers<[1], [0], [0], [1], [0, 0, 1, 1], [], []>} : vector<128x12xbf16>, vector<12x4xbf16>, vector<128x4xf32> -> vector<128x4xf32>
    %52 = arith.addf %46, %51 : vector<128x4xf32>
    %53 = arith.truncf %52 : vector<128x4xf32> to vector<128x4xbf16>
    %c0_39 = arith.constant 0 : index
    %c0_40 = arith.constant 0 : index
    %54 = vector.load %arg6[%c0_39, %c0_40] : memref<128x4xbf16, #tpu.memory_space<vmem>>, vector<128x4xbf16>
    tpu.vector_store %arg6[%c0_39, %c0_40], %53 {strides = array<i32>} : memref<128x4xbf16, #tpu.memory_space<vmem>>, vector<128x4xbf16>,
    %cst_41 = arith.constant dense<0.000000e+00> : vector<4xf32>
    %55 = vector.multi_reduction <add>, %52, %cst_41 [0] : vector<128x4xf32> to vector<4xf32>
    %56 = vector.shape_cast %55 : vector<4xf32> to vector<1x4xf32>
    %57 = vector.shape_cast %56 : vector<1x4xf32> to vector<1x1x4xf32>
    %c0_42 = arith.constant 0 : index
    %c0_43 = arith.constant 0 : index
    %c0_44 = arith.constant 0 : index
    %58 = vector.load %arg7[%c0_42, %c0_43, %c0_44] : memref<1x1x4xf32, #tpu.memory_space<vmem>>, vector<1x1x4xf32>
    tpu.vector_store %arg7[%c0_42, %c0_43, %c0_44], %57 {strides = array<i32>} : memref<1x1x4xf32, #tpu.memory_space<vmem>>, vector<1x1x4xf32>,
    %59 = arith.mulf %52, %52 : vector<128x4xf32>
    %cst_45 = arith.constant dense<0.000000e+00> : vector<4xf32>
    %60 = vector.multi_reduction <add>, %59, %cst_45 [0] : vector<128x4xf32> to vector<4xf32>
    %61 = vector.shape_cast %60 : vector<4xf32> to vector<1x4xf32>
    %62 = vector.shape_cast %61 : vector<1x4xf32> to vector<1x1x4xf32>
    %c0_46 = arith.constant 0 : index
    %c0_47 = arith.constant 0 : index
    %c0_48 = arith.constant 0 : index
    %63 = vector.load %arg8[%c0_46, %c0_47, %c0_48] : memref<1x1x4xf32, #tpu.memory_space<vmem>>, vector<1x1x4xf32>
    tpu.vector_store %arg8[%c0_46, %c0_47, %c0_48], %62 {strides = array<i32>} : memref<1x1x4xf32, #tpu.memory_space<vmem>>, vector<1x1x4xf32>,
    return
  }
  func.func @transform_0(%arg0: i32, %arg1: i32) -> (i32, i32, i32, i32) {
    %c0_i32 = arith.constant 0 : i32
    %c0_i32_0 = arith.constant 0 : i32
    %c0_i32_1 = arith.constant 0 : i32
    %c0_i32_2 = arith.constant 0 : i32
    return %arg0, %c0_i32, %c0_i32_0, %c0_i32_1 : i32, i32, i32, i32
  }
  func.func @transform_1(%arg0: i32, %arg1: i32) -> (i32, i32, i32) {
    %c0_i32 = arith.constant 0 : i32
    %c0_i32_0 = arith.constant 0 : i32
    %c0_i32_1 = arith.constant 0 : i32
    %c0_i32_2 = arith.constant 0 : i32
    return %c0_i32, %c0_i32_0, %c0_i32_1 : i32, i32, i32
  }
  func.func @transform_2(%arg0: i32, %arg1: i32) -> (i32, i32, i32) {
    %c0_i32 = arith.constant 0 : i32
    %c0_i32_0 = arith.constant 0 : i32
    %c0_i32_1 = arith.constant 0 : i32
    %c0_i32_2 = arith.constant 0 : i32
    return %c0_i32, %c0_i32_0, %c0_i32_1 : i32, i32, i32
  }
  func.func @transform_3(%arg0: i32, %arg1: i32) -> (i32, i32, i32) {
    %c0_i32 = arith.constant 0 : i32
    %c0_i32_0 = arith.constant 0 : i32
    %c0_i32_1 = arith.constant 0 : i32
    %c0_i32_2 = arith.constant 0 : i32
    return %c0_i32, %c0_i32_0, %c0_i32_1 : i32, i32, i32
  }
  func.func @transform_4(%arg0: i32, %arg1: i32) -> (i32, i32) {
    %c2_i32 = arith.constant 2 : i32
    %0 = arith.muli %arg0, %c2_i32 : i32
    %1 = arith.addi %0, %arg1 : i32
    %c0_i32 = arith.constant 0 : i32
    %c0_i32_0 = arith.constant 0 : i32
    return %1, %c0_i32 : i32, i32
  }
  func.func @transform_5(%arg0: i32, %arg1: i32) -> (i32, i32, i32) {
    %c2_i32 = arith.constant 2 : i32
    %0 = arith.muli %arg0, %c2_i32 : i32
    %1 = arith.addi %0, %arg1 : i32
    %c0_i32 = arith.constant 0 : i32
    %c0_i32_0 = arith.constant 0 : i32
    %c0_i32_1 = arith.constant 0 : i32
    return %1, %c0_i32, %c0_i32_0 : i32, i32, i32
  }
  func.func @transform_6(%arg0: i32, %arg1: i32) -> (i32, i32, i32) {
    %c2_i32 = arith.constant 2 : i32
    %0 = arith.muli %arg0, %c2_i32 : i32
    %1 = arith.addi %0, %arg1 : i32
    %c0_i32 = arith.constant 0 : i32
    %c0_i32_0 = arith.constant 0 : i32
    %c0_i32_1 = arith.constant 0 : i32
    return %1, %c0_i32, %c0_i32_0 : i32, i32, i32
  }
}

</mosaic_0001>

<bundles_post_ra>
// kernel: preact_bottleneck_forward.5
= control target key start
LH: loop header
LB: loop body
LE: loop exit
PB: predicated region body
PF: predicated region fallthrough
CT: control target
= control target key end

     0   :  { %s1111_s18 = smov 0   ;;  %s1334_s0 = inlined_call_operand.vmem [shape: bf16[512,4], index: 0, kind: input, shape index: {}]   ;;  %s1335_s1 = inlined_call_operand.vmem [shape: f32[1,4], index: 1, kind: input, shape index: {}]   ;;  %s1336_s2 = inlined_call_operand.vmem [shape: f32[1,4], index: 2, kind: input, shape index: {}]   ;;  %s1337_s3 = inlined_call_operand.vmem [shape: bf16[4,16], index: 3, kind: input, shape index: {}]   ;;  %s1338_s4 = inlined_call_operand.vmem [shape: bf16[512,16], index: 4, kind: input, shape index: {}]   ;;  %s1339_s5 = inlined_call_operand.vmem [shape: f32[512,16], index: 5, kind: output, shape index: {}]  }
   0x1 LB: > { %s821_s19 = sadd.s32 4294967295, %s1079_s18   ;;  %p825_p0 = scmp.ge.s32.totalorder %s1079_s18, 1  ;;  %s1079_s18 = sphi %s1111_s18, %s15_s18  }
   0x2   : > { %p199_p1 = scmp.lt.s32.totalorder %s1079_s18, 3 }
   0x4   : > { %p200_p2 = pnand %p825_p0, %p199_p1 }
   0x5   : > { %s826_s22 = sshll.u32 (!%p200_p2), %s821_s19, 5 }
   0x6   : > { %203 = sbr.rel (%p200_p2) target bundleno = 258 (0x102), region = 40  ;;  %p233_p3 = scmp.lt.s32.totalorder (!%p200_p2), %s826_s22, 63 }
   0xb   : > { %v441_v0 = vld [vmem:[%s1337_s3] sm:$0x3]  ;;  %vm555_vm0 = vcmask 1041408   ;;  %s1341_s22 = smov (!%p233_p3, %s826_s22), 63  ;;  %vm506_vm1 = vcmask 31744   ;;  %vm720_vm2 = vcmask 130048  }
   0xc   : > { %1063 = vmatprep.subr.msk.bf16.mxu0 %vm555_vm0, %v441_v0  ;;  %1064 = vmatprep.subr.msk.bf16.mxu1 %vm555_vm0, %v441_v0  ;;  %v557_v1 = vsel %vm555_vm0, %v441_v0, 0  ;;  %s827_s23 = sshll.u32 %s1341_s22, 2  ;;  %v1135_v2 = vld [vmem:[%s1335_s1] ss:$0 sm:$0xff]  ;;  %s831_s9 = sshll.u32 %s1341_s22, 3 }
   0xd   : > { %1028 = vmatpush3.bf16.msra.mxu0 %v557_v1  ;;  %1062 = vmatpush3.bf16.msra.mxu1 %v557_v1  ;;  %s1130_s26 = scalar_lea.vmem %s1334_s0, %s827_s23  ;;  %v1144_v11 = vld [vmem:[%s1336_s2] ss:$0 sm:$0xff]  ;;  %s1243_s8 = scalar_lea.vmem %s1338_s4, %s827_s23 }
   0xe   : > { %v853_v3 = vld [vmem:[%s1130_s26] sm:$0xff]   ;;  %v980_v5 = vld [vmem:[%s1130_s26 + $0x8] sm:$0xff]   ;;  %v981_v32 = vld [vmem:[%s1130_s26 + $0x10] sm:$0xff]   ;;  %s1253_s12 = scalar_lea.vmem %s1339_s5, %s831_s9 }
   0xf   : > { %v987_v4 = vld [vmem:[%s1130_s26 + $0x40] sm:$0xff]   ;;  %v854_v6 = vunpack.c.l.bf16 %v853_v3  ;;  %v855_v7 = vunpack.c.h.bf16 %v853_v3  ;;  %v988_v10 = vld [vmem:[%s1130_s26 + $0x48] sm:$0xff]   ;;  %v858_v12 = vunpack.c.l.bf16 %v980_v5  ;;  %v859_v13 = vunpack.c.h.bf16 %v980_v5  ;;  %v989_v37 = vld [vmem:[%s1130_s26 + $0x50] sm:$0xff]  }
  0x10   : > { %v886_v8 = vunpack.c.l.bf16 %v987_v4  ;;  %v887_v9 = vunpack.c.h.bf16 %v987_v4  ;;  %v890_v14 = vunpack.c.l.bf16 %v988_v10  ;;  %v891_v15 = vunpack.c.h.bf16 %v988_v10  ;;  %v982_v42 = vld [vmem:[%s1130_s26 + $0x18] sm:$0xff]   ;;  %v983_v5 = vld [vmem:[%s1130_s26 + $0x20] sm:$0xff]  }
  0x11   : > { %v322_v16 = vmul.f32 %v854_v6, %v1135_v2  ;;  %v323_v17 = vmul.f32 %v855_v7, %v1135_v2  ;;  %v324_v20 = vmul.f32 %v858_v12, %v1135_v2  ;;  %v325_v21 = vmul.f32 %v859_v13, %v1135_v2  ;;  %v990_v47 = vld [vmem:[%s1130_s26 + $0x58] sm:$0xff]  }
  0x12   : > { %v338_v18 = vmul.f32 %v886_v8, %v1135_v2  ;;  %v339_v19 = vmul.f32 %v887_v9, %v1135_v2  ;;  %v340_v22 = vmul.f32 %v890_v14, %v1135_v2  ;;  %v341_v23 = vmul.f32 %v891_v15, %v1135_v2  ;;  %v991_v15 = vld [vmem:[%s1130_s26 + $0x60] sm:$0xff]  }
  0x13   : > { %v361_v24 = vadd.f32 %v1144_v11, %v322_v16  ;;  %v362_v25 = vadd.f32 %v1144_v11, %v323_v17  ;;  %v363_v28 = vadd.f32 %v1144_v11, %v324_v20  ;;  %v364_v29 = vadd.f32 %v1144_v11, %v325_v21  ;;  %v984_v20 = vld [vmem:[%s1130_s26 + $0x28] sm:$0xff]  }
  0x14   : > { %v377_v26 = vadd.f32 %v1144_v11, %v338_v18  ;;  %v378_v27 = vadd.f32 %v1144_v11, %v339_v19  ;;  %v379_v30 = vadd.f32 %v1144_v11, %v340_v22  ;;  %v380_v31 = vadd.f32 %v1144_v11, %v341_v23 }
  0x15   : > { %v393_v33 = vmax.f32 %v361_v24, 0.0  ;;  %v394_v34 = vmax.f32 %v362_v25, 0.0  ;;  %v395_v38 = vmax.f32 %v363_v28, 0.0  ;;  %v396_v39 = vmax.f32 %v364_v29, 0.0  ;;  %v992_v25 = vld [vmem:[%s1130_s26 + $0x68] sm:$0xff]  }
  0x16   : > { %v409_v35 = vmax.f32 %v377_v26, 0.0  ;;  %v410_v36 = vmax.f32 %v378_v27, 0.0  ;;  %v411_v40 = vmax.f32 %v379_v30, 0.0  ;;  %v412_v41 = vmax.f32 %v380_v31, 0.0 }
  0x17   : > { %v425_v43 = vpack.c.bf16 %v394_v34, %v393_v33  ;;  %v862_v45 = vunpack.c.l.bf16 %v981_v32  ;;  %v863_v46 = vunpack.c.h.bf16 %v981_v32  ;;  %v426_v48 = vpack.c.bf16 %v396_v39, %v395_v38 }
  0x18   : > { %v433_v44 = vpack.c.bf16 %v410_v36, %v409_v35  ;;  %v434_v49 = vpack.c.bf16 %v412_v41, %v411_v40  ;;  %v894_v50 = vunpack.c.l.bf16 %v989_v37  ;;  %v895_v51 = vunpack.c.h.bf16 %v989_v37 }
  0x19   : > { %1029 = vmatprep.mubr.msk.bf16.mxu0 %vm506_vm1, %v425_v43  ;;  %v326_v52 = vmul.f32 %v862_v45, %v1135_v2  ;;  %v327_v53 = vmul.f32 %v863_v46, %v1135_v2  ;;  %v866_v54 = vunpack.c.l.bf16 %v982_v42  ;;  %v867_v55 = vunpack.c.h.bf16 %v982_v42  ;;  %v985_v42 = vld [vmem:[%s1130_s26 + $0x30] sm:$0xff]  }
  0x1a   : > { %1045 = vmatprep.mubr.msk.bf16.mxu1 %vm506_vm1, %v433_v44  ;;  %1030 = vmatmul.mubr.msk.bf16.vlgmr.msra.gmra.mxu0 %vm506_vm1, %v426_v48  ;;  %v342_v56 = vmul.f32 %v894_v50, %v1135_v2  ;;  %v343_v57 = vmul.f32 %v895_v51, %v1135_v2  ;;  %v898_v58 = vunpack.c.l.bf16 %v990_v47  ;;  %v899_v59 = vunpack.c.h.bf16 %v990_v47 }
  0x1b   : > { %1046 = vmatmul.mubr.msk.bf16.vlgmr.msra.gmra.mxu1 %vm506_vm1, %v434_v49  ;;  %v365_v60 = vadd.f32 %v1144_v11, %v326_v52  ;;  %v366_v61 = vadd.f32 %v1144_v11, %v327_v53  ;;  %v328_v62 = vmul.f32 %v866_v54, %v1135_v2  ;;  %v329_v63 = vmul.f32 %v867_v55, %v1135_v2  ;;  %v993_v55 = vld [vmem:[%s1130_s26 + $0x70] sm:$0xff]  }
  0x1c   : > { %v381_v0 = vadd.f32 %v1144_v11, %v342_v56  ;;  %v382_v1 = vadd.f32 %v1144_v11, %v343_v57  ;;  %v344_v3 = vmul.f32 %v898_v58, %v1135_v2  ;;  %v345_v4 = vmul.f32 %v899_v59, %v1135_v2 }
  0x1d   : > { %v397_v6 = vmax.f32 %v365_v60, 0.0  ;;  %v398_v7 = vmax.f32 %v366_v61, 0.0  ;;  %v367_v8 = vadd.f32 %v1144_v11, %v328_v62  ;;  %v368_v9 = vadd.f32 %v1144_v11, %v329_v63  ;;  %v986_v60 = vld [vmem:[%s1130_s26 + $0x38] sm:$0xff]  }
  0x1e   : > { %v413_v10 = vmax.f32 %v381_v0, 0.0  ;;  %v414_v12 = vmax.f32 %v382_v1, 0.0  ;;  %v383_v13 = vadd.f32 %v1144_v11, %v344_v3  ;;  %v384_v14 = vadd.f32 %v1144_v11, %v345_v4  ;;  %v994_v1 = vld [vmem:[%s1130_s26 + $0x78] sm:$0xff]  }
  0x1f   : > { %v427_v16 = vpack.c.bf16 %v398_v7, %v397_v6  ;;  %v399_v17 = vmax.f32 %v367_v8, 0.0  ;;  %v400_v18 = vmax.f32 %v368_v9, 0.0  ;;  %v870_v19 = vunpack.c.l.bf16 %v983_v5 }
  0x20   : > { %v435_v21 = vpack.c.bf16 %v414_v12, %v413_v10  ;;  %v415_v22 = vmax.f32 %v383_v13, 0.0  ;;  %v416_v23 = vmax.f32 %v384_v14, 0.0  ;;  %v871_v24 = vunpack.c.h.bf16 %v983_v5 }
  0x21   : > { %1033 = vmatprep.mubr.msk.bf16.mxu0 %vm506_vm1, %v427_v16  ;;  %v428_v26 = vpack.c.bf16 %v400_v18, %v399_v17  ;;  %v330_v27 = vmul.f32 %v870_v19, %v1135_v2  ;;  %v902_v28 = vunpack.c.l.bf16 %v991_v15  ;;  %v903_v29 = vunpack.c.h.bf16 %v991_v15 }
  0x22   : > { %1049 = vmatprep.mubr.msk.bf16.mxu1 %vm506_vm1, %v435_v21  ;;  %v436_v30 = vpack.c.bf16 %v416_v23, %v415_v22  ;;  %v331_v31 = vmul.f32 %v871_v24, %v1135_v2  ;;  %v874_v32 = vunpack.c.l.bf16 %v984_v20  ;;  %v875_v33 = vunpack.c.h.bf16 %v984_v20 }
  0x23   : > { %1034 = vmatmul.mubr.msk.bf16.gmra.mxu0 %vm506_vm1, %v428_v26  ;;  %v369_v34 = vadd.f32 %v1144_v11, %v330_v27  ;;  %v346_v35 = vmul.f32 %v902_v28, %v1135_v2  ;;  %v347_v36 = vmul.f32 %v903_v29, %v1135_v2  ;;  %v906_v37 = vunpack.c.l.bf16 %v992_v25 }
  0x24   : > { %1050 = vmatmul.mubr.msk.bf16.gmra.mxu1 %vm506_vm1, %v436_v30  ;;  %v370_v38 = vadd.f32 %v1144_v11, %v331_v31  ;;  %v332_v39 = vmul.f32 %v874_v32, %v1135_v2  ;;  %v333_v40 = vmul.f32 %v875_v33, %v1135_v2  ;;  %v907_v41 = vunpack.c.h.bf16 %v992_v25 }
  0x25   : > { %v401_v43 = vmax.f32 %v369_v34, 0.0  ;;  %v385_v44 = vadd.f32 %v1144_v11, %v346_v35  ;;  %v386_v45 = vadd.f32 %v1144_v11, %v347_v36  ;;  %v348_v46 = vmul.f32 %v906_v37, %v1135_v2 }
  0x26   : > { %v402_v47 = vmax.f32 %v370_v38, 0.0  ;;  %v371_v48 = vadd.f32 %v1144_v11, %v332_v39  ;;  %v372_v49 = vadd.f32 %v1144_v11, %v333_v40  ;;  %v349_v50 = vmul.f32 %v907_v41, %v1135_v2  ;;  %v917_v40 = vld [vmem:[%s1243_s8] sm:$0xff]  }
  0x27   : > { %v417_v51 = vmax.f32 %v385_v44, 0.0  ;;  %v418_v52 = vmax.f32 %v386_v45, 0.0  ;;  %v387_v53 = vadd.f32 %v1144_v11, %v348_v46  ;;  %v878_v54 = vunpack.c.l.bf16 %v985_v42  ;;  %v1002_v41 = vld [vmem:[%s1243_s8 + $0x40] sm:$0xff]  }
  0x28   : > { %v429_v56 = vpack.c.bf16 %v402_v47, %v401_v43  ;;  %v403_v57 = vmax.f32 %v371_v48, 0.0  ;;  %v404_v58 = vmax.f32 %v372_v49, 0.0  ;;  %v388_v59 = vadd.f32 %v1144_v11, %v349_v50 }
  0x29   : > { %v437_v61 = vpack.c.bf16 %v418_v52, %v417_v51  ;;  %v419_v62 = vmax.f32 %v387_v53, 0.0  ;;  %v879_v63 = vunpack.c.h.bf16 %v985_v42  ;;  %v334_v0 = vmul.f32 %v878_v54, %v1135_v2 }
  0x2a   : > { %1037 = vmatprep.mubr.msk.bf16.mxu0 %vm506_vm1, %v429_v56  ;;  %v430_v3 = vpack.c.bf16 %v404_v58, %v403_v57  ;;  %v420_v4 = vmax.f32 %v388_v59, 0.0  ;;  %v910_v5 = vunpack.c.l.bf16 %v993_v55  ;;  %v911_v6 = vunpack.c.h.bf16 %v993_v55  ;;  %v997_v58 = vld [vmem:[%s1243_s8 + $0x18] sm:$0xff]  }
  0x2b   : > { %1053 = vmatprep.mubr.msk.bf16.mxu1 %vm506_vm1, %v437_v61  ;;  %v335_v7 = vmul.f32 %v879_v63, %v1135_v2  ;;  %v373_v8 = vadd.f32 %v1144_v11, %v334_v0  ;;  %v882_v9 = vunpack.c.l.bf16 %v986_v60  ;;  %v883_v10 = vunpack.c.h.bf16 %v986_v60  ;;  %v1005_v61 = vld [vmem:[%s1243_s8 + $0x58] sm:$0xff]   ;;  %v996_v0 = vld [vmem:[%s1243_s8 + $0x10] sm:$0xff]  }
  0x2c   : > { %1038 = vmatmul.mubr.msk.bf16.gmra.mxu0 %vm506_vm1, %v430_v3  ;;  %v438_v12 = vpack.c.bf16 %v420_v4, %v419_v62  ;;  %v350_v13 = vmul.f32 %v910_v5, %v1135_v2  ;;  %v351_v14 = vmul.f32 %v911_v6, %v1135_v2  ;;  %v914_v15 = vunpack.c.l.bf16 %v994_v1  ;;  %v1004_v5 = vld [vmem:[%s1243_s8 + $0x50] sm:$0xff]  }
  0x2d   : > { %v374_v16 = vadd.f32 %v1144_v11, %v335_v7  ;;  %v405_v17 = vmax.f32 %v373_v8, 0.0  ;;  %v336_v18 = vmul.f32 %v882_v9, %v1135_v2  ;;  %v337_v19 = vmul.f32 %v883_v10, %v1135_v2 }
  0x2e   : > { %1054 = vmatmul.mubr.msk.bf16.gmra.mxu1 %vm506_vm1, %v438_v12  ;;  %v389_v20 = vadd.f32 %v1144_v11, %v350_v13  ;;  %v390_v21 = vadd.f32 %v1144_v11, %v351_v14  ;;  %v915_v22 = vunpack.c.h.bf16 %v994_v1  ;;  %v352_v23 = vmul.f32 %v914_v15, %v1135_v2 }
  0x2f   : > { %v406_v24 = vmax.f32 %v374_v16, 0.0  ;;  %v375_v25 = vadd.f32 %v1144_v11, %v336_v18  ;;  %v376_v26 = vadd.f32 %v1144_v11, %v337_v19  ;;  %v918_v44 = vunpack.c.l.bf16 %v917_v40 }
  0x30   : > { %v421_v27 = vmax.f32 %v389_v20, 0.0  ;;  %v422_v28 = vmax.f32 %v390_v21, 0.0  ;;  %v353_v29 = vmul.f32 %v915_v22, %v1135_v2  ;;  %v391_v30 = vadd.f32 %v1144_v11, %v352_v23  ;;  %v995_v2 = vld [vmem:[%s1243_s8 + $0x8] sm:$0xff]  }
  0x31   : > { %v431_v31 = vpack.c.bf16 %v406_v24, %v405_v17  ;;  %v407_v32 = vmax.f32 %v375_v25, 0.0  ;;  %v408_v33 = vmax.f32 %v376_v26, 0.0  ;;  %v922_v42 = vunpack.c.l.bf16 %v995_v2  ;;  %v999_v22 = vld [vmem:[%s1243_s8 + $0x28] sm:$0xff]  }
  0x32   : > { %v439_v34 = vpack.c.bf16 %v422_v28, %v421_v27  ;;  %v392_v35 = vadd.f32 %v1144_v11, %v353_v29  ;;  %v423_v36 = vmax.f32 %v391_v30, 0.0  ;;  %v1003_v11 = vld [vmem:[%s1243_s8 + $0x48] sm:$0xff]   ;;  %v950_v45 = vunpack.c.l.bf16 %v1002_v41  ;;  %v998_v29 = vld [vmem:[%s1243_s8 + $0x20] sm:$0xff]  }
  0x33   : > { %1041 = vmatprep.mubr.msk.bf16.mxu0 %vm506_vm1, %v431_v31  ;;  %v432_v37 = vpack.c.bf16 %v408_v33, %v407_v32  ;;  %v954_v43 = vunpack.c.l.bf16 %v1003_v11  ;;  %v923_v50 = vunpack.c.h.bf16 %v995_v2  ;;  %v955_v51 = vunpack.c.h.bf16 %v1003_v11  ;;  %v1007_v28 = vld [vmem:[%s1243_s8 + $0x68] sm:$0xff]  }
  0x34   : > { %1057 = vmatprep.mubr.msk.bf16.mxu1 %vm506_vm1, %v439_v34  ;;  %v424_v38 = vmax.f32 %v392_v35, 0.0  ;;  %v919_v56 = vunpack.c.h.bf16 %v917_v40  ;;  %v951_v57 = vunpack.c.h.bf16 %v1002_v41  ;;  %v930_v4 = vunpack.c.l.bf16 %v997_v58  ;;  %v1006_v35 = vld [vmem:[%s1243_s8 + $0x60] sm:$0xff]  }
  0x35   : > { %1042 = vmatmul.mubr.msk.bf16.gmra.mxu0 %vm506_vm1, %v432_v37  ;;  %v962_v8 = vunpack.c.l.bf16 %v1005_v61  ;;  %v926_v9 = vunpack.c.l.bf16 %v996_v0  ;;  %v958_v12 = vunpack.c.l.bf16 %v1004_v5  ;;  %v931_v15 = vunpack.c.h.bf16 %v997_v58 }
  0x36   : > { %v440_v39 = vpack.c.bf16 %v424_v38, %v423_v36  ;;  %v963_v18 = vunpack.c.h.bf16 %v1005_v61  ;;  %v927_v21 = vunpack.c.h.bf16 %v996_v0  ;;  %v959_v25 = vunpack.c.h.bf16 %v1004_v5 }
  0x37   : > { %v938_v32 = vunpack.c.l.bf16 %v999_v22  ;;  %v970_v37 = vunpack.c.l.bf16 %v1007_v28  ;;  %v934_v38 = vunpack.c.l.bf16 %v998_v29  ;;  %v966_v11 = vunpack.c.l.bf16 %v1006_v35 }
  0x38   : > { %1058 = vmatmul.mubr.msk.bf16.gmra.mxu1 %vm506_vm1, %v440_v39  ;;  %v939_v40 = vunpack.c.h.bf16 %v999_v22 }
  0xda   : > { %v1031_v46 = vpop.f32.mrf.mxu0 }
  0xdb   : > { %v1047_v47 = vpop.f32.mrf.mxu1  ;;  %v602_v48 = vadd.f32 %v1031_v46, %v922_v42  ;;  %v935_v46 = vunpack.c.h.bf16 %v998_v29 }
  0xdc   : > { %v666_v49 = vadd.f32 %v1047_v47, %v954_v43  ;;  %v593_v52 = vpop.f32.mrf.mxu0  ;;  %v1001_v47 = vld [vmem:[%s1243_s8 + $0x38] sm:$0xff]  }
  0xdd   : > { %v657_v53 = vpop.f32.mrf.mxu1  ;;  %723 = vst.msk [vmem:[%s1253_s12 + $0x10] sm:$0xff] %vm720_vm2, %v602_v48  ;;  %v594_v54 = vadd.f32 %v918_v44, %v593_v52  ;;  %v967_v52 = vunpack.c.h.bf16 %v1006_v35 }
  0xde   : > { %739 = vst.msk [vmem:[%s1253_s12 + $0x90] sm:$0xff] %vm720_vm2, %v666_v49  ;;  %v658_v55 = vadd.f32 %v950_v45, %v657_v53  ;;  %v1032_v59 = vpop.f32.mrf.mxu0  ;;  %v971_v45 = vunpack.c.h.bf16 %v1007_v28  ;;  %v1000_v53 = vld [vmem:[%s1243_s8 + $0x30] sm:$0xff]  }
  0xdf   : > { %v1048_v60 = vpop.f32.mrf.mxu1  ;;  %721 = vst.msk [vmem:[%s1253_s12] sm:$0xff] %vm720_vm2, %v594_v54  ;;  %v605_v62 = vadd.f32 %v1032_v59, %v923_v50  ;;  %v942_v61 = vunpack.c.l.bf16 %v1000_v53 }
  0xe0   : > { %737 = vst.msk [vmem:[%s1253_s12 + $0x80] sm:$0xff] %vm720_vm2, %v658_v55  ;;  %v669_v63 = vadd.f32 %v1048_v60, %v955_v51  ;;  %v596_v1 = vpop.f32.mrf.mxu0 }
  0xe1   : > { %v660_v3 = vpop.f32.mrf.mxu1  ;;  %724 = vst.msk [vmem:[%s1253_s12 + $0x18] sm:$0xff] %vm720_vm2, %v605_v62  ;;  %v597_v6 = vadd.f32 %v919_v56, %v596_v1  ;;  %v946_v56 = vunpack.c.l.bf16 %v1001_v47  ;;  %v1008_v62 = vld [vmem:[%s1243_s8 + $0x70] sm:$0xff]  }
  0xe2   : > { %740 = vst.msk [vmem:[%s1253_s12 + $0x98] sm:$0xff] %vm720_vm2, %v669_v63  ;;  %v661_v7 = vadd.f32 %v951_v57, %v660_v3  ;;  %v1009_v57 = vld [vmem:[%s1243_s8 + $0x78] sm:$0xff]  }
  0xe3   : > { %722 = vst.msk [vmem:[%s1253_s12 + $0x8] sm:$0xff] %vm720_vm2, %v597_v6  ;;  %v1035_v10 = vpop.f32.mrf.mxu0  ;;  %v978_v1 = vunpack.c.l.bf16 %v1009_v57  ;;  %v974_v6 = vunpack.c.l.bf16 %v1008_v62 }
  0xe4   : > { %738 = vst.msk [vmem:[%s1253_s12 + $0x88] sm:$0xff] %vm720_vm2, %v661_v7  ;;  %v618_v13 = vadd.f32 %v1035_v10, %v930_v4  ;;  %v1051_v14 = vpop.f32.mrf.mxu1  ;;  %v947_v4 = vunpack.c.h.bf16 %v1001_v47 }
  0xe5   : > { %v682_v16 = vadd.f32 %v1051_v14, %v962_v8  ;;  %v609_v17 = vpop.f32.mrf.mxu0 }
  0xe6   : > { %727 = vst.msk [vmem:[%s1253_s12 + $0x30] sm:$0xff] %vm720_vm2, %v618_v13  ;;  %v610_v19 = vadd.f32 %v926_v9, %v609_v17  ;;  %v673_v20 = vpop.f32.mrf.mxu1  ;;  %v943_v9 = vunpack.c.h.bf16 %v1000_v53  ;;  %v979_v13 = vunpack.c.h.bf16 %v1009_v57 }
  0xe7   : > { %743 = vst.msk [vmem:[%s1253_s12 + $0xb0] sm:$0xff] %vm720_vm2, %v682_v16  ;;  %v674_v23 = vadd.f32 %v958_v12, %v673_v20  ;;  %v1036_v24 = vpop.f32.mrf.mxu0 }
  0xe8   : > { %725 = vst.msk [vmem:[%s1253_s12 + $0x20] sm:$0xff] %vm720_vm2, %v610_v19  ;;  %v621_v26 = vadd.f32 %v1036_v24, %v931_v15  ;;  %v1052_v27 = vpop.f32.mrf.mxu1 }
  0xe9   : > { %741 = vst.msk [vmem:[%s1253_s12 + $0xa0] sm:$0xff] %vm720_vm2, %v674_v23  ;;  %v685_v30 = vadd.f32 %v1052_v27, %v963_v18  ;;  %v612_v31 = vpop.f32.mrf.mxu0  ;;  %v975_v18 = vunpack.c.h.bf16 %v1008_v62 }
  0xea   : > { %728 = vst.msk [vmem:[%s1253_s12 + $0x38] sm:$0xff] %vm720_vm2, %v621_v26  ;;  %v613_v33 = vadd.f32 %v927_v21, %v612_v31  ;;  %v676_v34 = vpop.f32.mrf.mxu1 }
  0xeb   : > { %744 = vst.msk [vmem:[%s1253_s12 + $0xb8] sm:$0xff] %vm720_vm2, %v685_v30  ;;  %v677_v36 = vadd.f32 %v959_v25, %v676_v34 }
  0xec   : > { %726 = vst.msk [vmem:[%s1253_s12 + $0x28] sm:$0xff] %vm720_vm2, %v613_v33  ;;  %v1039_v39 = vpop.f32.mrf.mxu0 }
  0xed   : > { %742 = vst.msk [vmem:[%s1253_s12 + $0xa8] sm:$0xff] %vm720_vm2, %v677_v36  ;;  %v634_v2 = vadd.f32 %v1039_v39, %v938_v32 }
  0xee   : > { %v1055_v41 = vpop.f32.mrf.mxu1  ;;  %v625_v42 = vpop.f32.mrf.mxu0 }
  0xef   : > { %731 = vst.msk [vmem:[%s1253_s12 + $0x50] sm:$0xff] %vm720_vm2, %v634_v2  ;;  %v698_v43 = vadd.f32 %v1055_v41, %v970_v37  ;;  %v626_v44 = vadd.f32 %v934_v38, %v625_v42 }
  0xf0   : > { %v689_v48 = vpop.f32.mrf.mxu1  ;;  %v1040_v49 = vpop.f32.mrf.mxu0 }
  0xf1   : > { %747 = vst.msk [vmem:[%s1253_s12 + $0xd0] sm:$0xff] %vm720_vm2, %v698_v43  ;;  %729 = vst.msk [vmem:[%s1253_s12 + $0x40] sm:$0xff] %vm720_vm2, %v626_v44  ;;  %v690_v50 = vadd.f32 %v966_v11, %v689_v48  ;;  %v637_v51 = vadd.f32 %v1040_v49, %v939_v40 }
  0xf2   : > { %v1056_v54 = vpop.f32.mrf.mxu1  ;;  %v628_v55 = vpop.f32.mrf.mxu0 }
  0xf3   : > { %745 = vst.msk [vmem:[%s1253_s12 + $0xc0] sm:$0xff] %vm720_vm2, %v690_v50  ;;  %732 = vst.msk [vmem:[%s1253_s12 + $0x58] sm:$0xff] %vm720_vm2, %v637_v51  ;;  %v701_v58 = vadd.f32 %v1056_v54, %v971_v45  ;;  %v629_v59 = vadd.f32 %v935_v46, %v628_v55 }
  0xf4   : > { %v692_v60 = vpop.f32.mrf.mxu1 }
  0xf5   : > { %748 = vst.msk [vmem:[%s1253_s12 + $0xd8] sm:$0xff] %vm720_vm2, %v701_v58  ;;  %730 = vst.msk [vmem:[%s1253_s12 + $0x48] sm:$0xff] %vm720_vm2, %v629_v59  ;;  %v693_v63 = vadd.f32 %v967_v52, %v692_v60  ;;  %v1043_v0 = vpop.f32.mrf.mxu0 }
  0xf6   : > { %v650_v3 = vadd.f32 %v1043_v0, %v946_v56 }
  0xf7   : > { %746 = vst.msk [vmem:[%s1253_s12 + $0xc8] sm:$0xff] %vm720_vm2, %v693_v63  ;;  %v641_v5 = vpop.f32.mrf.mxu0 }
  0xf8   : > { %735 = vst.msk [vmem:[%s1253_s12 + $0x70] sm:$0xff] %vm720_vm2, %v650_v3  ;;  %v1059_v7 = vpop.f32.mrf.mxu1  ;;  %v642_v8 = vadd.f32 %v942_v61, %v641_v5 }
  0xf9   : > { %v714_v10 = vadd.f32 %v1059_v7, %v978_v1  ;;  %v1044_v12 = vpop.f32.mrf.mxu0 }
  0xfa   : > { %733 = vst.msk [vmem:[%s1253_s12 + $0x60] sm:$0xff] %vm720_vm2, %v642_v8  ;;  %v705_v14 = vpop.f32.mrf.mxu1  ;;  %v653_v15 = vadd.f32 %v1044_v12, %v947_v4 }
  0xfb   : > { %751 = vst.msk [vmem:[%s1253_s12 + $0xf0] sm:$0xff] %vm720_vm2, %v714_v10  ;;  %v706_v16 = vadd.f32 %v974_v6, %v705_v14  ;;  %v644_v17 = vpop.f32.mrf.mxu0 }
  0xfc   : > { %736 = vst.msk [vmem:[%s1253_s12 + $0x78] sm:$0xff] %vm720_vm2, %v653_v15  ;;  %v1060_v19 = vpop.f32.mrf.mxu1  ;;  %v645_v20 = vadd.f32 %v943_v9, %v644_v17 }
  0xfd   : > { %749 = vst.msk [vmem:[%s1253_s12 + $0xe0] sm:$0xff] %vm720_vm2, %v706_v16  ;;  %v717_v21 = vadd.f32 %v1060_v19, %v979_v13 }
  0xfe   : > { %734 = vst.msk [vmem:[%s1253_s12 + $0x68] sm:$0xff] %vm720_vm2, %v645_v20  ;;  %v708_v22 = vpop.f32.mrf.mxu1 }
  0xff   : > { %752 = vst.msk [vmem:[%s1253_s12 + $0xf8] sm:$0xff] %vm720_vm2, %v717_v21  ;;  %v709_v23 = vadd.f32 %v975_v18, %v708_v22 }
 0x101   : > { %750 = vst.msk [vmem:[%s1253_s12 + $0xe8] sm:$0xff] %vm720_vm2, %v709_v23 }
 0x102 PF: > { %s15_s18 = sadd.s32 1, %s1079_s18  }
 0x103   : > { %p12_p4 = scmp.ge.s32.totalorder %s15_s18, 4  }
 0x105   :  { %14 = sbr.rel (!%p12_p4) target bundleno = 1 (0x1), region = 73 }

// kernel: preact_bottleneck_forward.3
= control target key start
LH: loop header
LB: loop body
LE: loop exit
PB: predicated region body
PF: predicated region fallthrough
CT: control target
= control target key end

     0   :  { %s1506_s24 = smov 0   ;;  %s2082_s0 = inlined_call_operand.vmem [shape: f32[512,8], index: 0, kind: input, shape index: {}]   ;;  %s2083_s1 = inlined_call_operand.vmem [shape: f32[1,8], index: 1, kind: input, shape index: {}]   ;;  %s2084_s2 = inlined_call_operand.vmem [shape: f32[1,8], index: 2, kind: input, shape index: {}]   ;;  %s2085_s3 = inlined_call_operand.vmem [shape: bf16[8,20], index: 3, kind: input, shape index: {}]   ;;  %s2086_s4 = inlined_call_operand.vmem [shape: bf16[512,16], index: 4, kind: output, shape index: {0}]   ;;  %s2087_s5 = inlined_call_operand.vmem [shape: bf16[512,4], index: 5, kind: output, shape index: {1}]   ;;  %s2088_s6 = inlined_call_operand.vmem [shape: f32[2,1,4], index: 6, kind: output, shape index: {2}]   ;;  %s2089_s7 = inlined_call_operand.vmem [shape: f32[2,1,4], index: 7, kind: output, shape index: {3}]  }
   0x1 LB: > { %s1512_s25 = sadd.s32 4294967295, %s1463_s24   ;;  %p1302_p0 = scmp.ge.s32.totalorder %s1463_s24, 1  ;;  %s1463_s24 = sphi %s1506_s24, %s18_s24  }
   0x2   : > { %p245_p1 = scmp.lt.s32.totalorder %s1463_s24, 3 }
   0x4   : > { %p246_p2 = pnand %p1302_p0, %p245_p1 }
   0x5   : > { %s1303_s28 = sshll.u32 (!%p246_p2), %s1512_s25, 5  ;;  %s1465_s18 = smov (!%p246_p2), 112  }
   0x6   : > { %249 = sbr.rel (%p246_p2) target bundleno = 416 (0x1a0), region = 36  ;;  %p289_p3 = scmp.lt.s32.totalorder (!%p246_p2), %s1303_s28, 63 }
   0x7   : > { %p306_p4 = scmp.lt.s32.totalorder (!%p246_p2), %s1512_s25, 1 }
   0xb   : > { %v471_v0 = vld [vmem:[%s2085_s3] sm:$0xf]  ;;  %vm521_vm0 = vcmask 1043456   ;;  %s2091_s28 = smov (!%p289_p3, %s1303_s28), 63  ;;  %vm472_vm1 = vcmask 64512   ;;  %vm814_vm2 = vcmask 125952  }
   0xc   : > { %1446 = vmatprep.subr.msk.bf16.mxu0 %vm521_vm0, %v471_v0  ;;  %1447 = vmatprep.subr.msk.bf16.mxu1 %vm521_vm0, %v471_v0  ;;  %v523_v1 = vsel %vm521_vm0, %v471_v0, 0  ;;  %s1304_s29 = sshll.u32 %s2091_s28, 3  ;;  %v1526_v2 = vld [vmem:[%s2083_s1] ss:$0 sm:$0xff]  ;;  %s1306_s14 = sshll.u32 %s2091_s28, 2  ;;  %vm976_vm3 = vcmask 162944  }
   0xd   : > { %1411 = vmatpush3.bf16.msra.mxu0 %v523_v1  ;;  %1445 = vmatpush3.bf16.msra.mxu1 %v523_v1  ;;  %s1531_s11 = scalar_lea.vmem %s2082_s0, %s1304_s29  ;;  %v1536_v3 = vld [vmem:[%s2084_s2] ss:$0 sm:$0xff]  ;;  %s1656_s17 = scalar_lea.vmem %s2086_s4, %s1306_s14  ;;  %vm943_vm4 = vcmask 27648   ;;  %vm1050_vm5 = vcmask 24576  }
   0xe   : > { %v313_v4 = vld [vmem:[%s1531_s11] sm:$0xff]  ;;  %v314_v5 = vld [vmem:[%s1531_s11 + $0x8] sm:$0xff]  ;;  %v315_v11 = vld [vmem:[%s1531_s11 + $0x10] sm:$0xff]  ;;  %s2005_s21 = scalar_lea.vmem %s2087_s5, %s1306_s14  ;;  %s2093_s25 = smov (!%p306_p4, %s1512_s25), 1 }
   0xf   : > { %v329_v6 = vld [vmem:[%s1531_s11 + $0x80] sm:$0xff]  ;;  %v352_v7 = vmul.f32 %v1526_v2, %v313_v4  ;;  %v353_v8 = vmul.f32 %v1526_v2, %v314_v5  ;;  %v330_v9 = vld [vmem:[%s1531_s11 + $0x88] sm:$0xff]  ;;  %v316_v12 = vld [vmem:[%s1531_s11 + $0x18] sm:$0xff]  ;;  %v354_v14 = vmul.f32 %v1526_v2, %v315_v11  ;;  %s308_s26 = scalar_lea.vmem %s2088_s6, %s2093_s25  ;;  %s311_s29 = scalar_lea.vmem %s2089_s7, %s2093_s25 }
  0x10   : > { %v368_v10 = vmul.f32 %v1526_v2, %v329_v6  ;;  %v369_v13 = vmul.f32 %v1526_v2, %v330_v9  ;;  %v355_v15 = vmul.f32 %v1526_v2, %v316_v12  ;;  %v331_v16 = vld [vmem:[%s1531_s11 + $0x90] sm:$0xff]  ;;  %v332_v17 = vld [vmem:[%s1531_s11 + $0x98] sm:$0xff]  ;;  %v317_v26 = vld [vmem:[%s1531_s11 + $0x20] sm:$0xff] }
  0x11   : > { %v391_v18 = vadd.f32 %v1536_v3, %v352_v7  ;;  %v392_v19 = vadd.f32 %v1536_v3, %v353_v8  ;;  %v370_v21 = vmul.f32 %v1526_v2, %v331_v16  ;;  %v393_v23 = vadd.f32 %v1536_v3, %v354_v14  ;;  %v318_v27 = vld [vmem:[%s1531_s11 + $0x28] sm:$0xff]  ;;  %v319_v32 = vld [vmem:[%s1531_s11 + $0x30] sm:$0xff]  ;;  %v320_v37 = vld [vmem:[%s1531_s11 + $0x38] sm:$0xff] }
  0x12   : > { %v407_v20 = vadd.f32 %v1536_v3, %v368_v10  ;;  %v408_v22 = vadd.f32 %v1536_v3, %v369_v13  ;;  %v394_v24 = vadd.f32 %v1536_v3, %v355_v15  ;;  %v371_v25 = vmul.f32 %v1526_v2, %v332_v17  ;;  %v321_v38 = vld [vmem:[%s1531_s11 + $0x40] sm:$0xff]  ;;  %v322_v43 = vld [vmem:[%s1531_s11 + $0x48] sm:$0xff]  ;;  %v323_v57 = vld [vmem:[%s1531_s11 + $0x50] sm:$0xff] }
  0x13   : > { %v423_v28 = vmax.f32 %v391_v18, 0.0  ;;  %v424_v29 = vmax.f32 %v392_v19, 0.0  ;;  %v409_v31 = vadd.f32 %v1536_v3, %v370_v21  ;;  %v425_v34 = vmax.f32 %v393_v23, 0.0  ;;  %v333_v52 = vld [vmem:[%s1531_s11 + $0xa0] sm:$0xff]  ;;  %v334_v53 = vld [vmem:[%s1531_s11 + $0xa8] sm:$0xff]  ;;  %v324_v62 = vld [vmem:[%s1531_s11 + $0x58] sm:$0xff] }
  0x14   : > { %v439_v30 = vmax.f32 %v407_v20, 0.0  ;;  %v440_v33 = vmax.f32 %v408_v22, 0.0  ;;  %v426_v35 = vmax.f32 %v394_v24, 0.0  ;;  %v410_v36 = vadd.f32 %v1536_v3, %v371_v25  ;;  %v335_v5 = vld [vmem:[%s1531_s11 + $0xb0] sm:$0xff]  ;;  %v336_v6 = vld [vmem:[%s1531_s11 + $0xb8] sm:$0xff]  ;;  %v325_v15 = vld [vmem:[%s1531_s11 + $0x60] sm:$0xff] }
  0x15   : > { %v455_v39 = vpack.c.bf16 %v424_v29, %v423_v28  ;;  %v441_v40 = vmax.f32 %v409_v31, 0.0  ;;  %v356_v41 = vmul.f32 %v1526_v2, %v317_v26  ;;  %v357_v42 = vmul.f32 %v1526_v2, %v318_v27  ;;  %v326_v20 = vld [vmem:[%s1531_s11 + $0x68] sm:$0xff]  ;;  %v327_v21 = vld [vmem:[%s1531_s11 + $0x70] sm:$0xff]  ;;  %v328_v26 = vld [vmem:[%s1531_s11 + $0x78] sm:$0xff] }
  0x16   : > { %v463_v44 = vpack.c.bf16 %v440_v33, %v439_v30  ;;  %v456_v45 = vpack.c.bf16 %v426_v35, %v425_v34  ;;  %v442_v46 = vmax.f32 %v410_v36, 0.0  ;;  %v358_v47 = vmul.f32 %v1526_v2, %v319_v32  ;;  %v337_v31 = vld [vmem:[%s1531_s11 + $0xc0] sm:$0xff]  ;;  %v338_v36 = vld [vmem:[%s1531_s11 + $0xc8] sm:$0xff] }
  0x17   : > { %1412 = vmatprep.mubr.msk.bf16.mxu0 %vm472_vm1, %v455_v39  ;;  %v395_v48 = vadd.f32 %v1536_v3, %v356_v41  ;;  %v396_v49 = vadd.f32 %v1536_v3, %v357_v42  ;;  %v359_v50 = vmul.f32 %v1526_v2, %v320_v37  ;;  %v360_v51 = vmul.f32 %v1526_v2, %v321_v38  ;;  %v339_v41 = vld [vmem:[%s1531_s11 + $0xd0] sm:$0xff] }
  0x18   : > { %1428 = vmatprep.mubr.msk.bf16.mxu1 %vm472_vm1, %v463_v44  ;;  %1413 = vmatmul.mubr.msk.bf16.vlgmr.msra.gmra.mxu0 %vm472_vm1, %v456_v45  ;;  %v464_v54 = vpack.c.bf16 %v442_v46, %v441_v40  ;;  %v397_v55 = vadd.f32 %v1536_v3, %v358_v47  ;;  %v361_v56 = vmul.f32 %v1526_v2, %v322_v43  ;;  %v340_v45 = vld [vmem:[%s1531_s11 + $0xd8] sm:$0xff]  ;;  %v341_v46 = vld [vmem:[%s1531_s11 + $0xe0] sm:$0xff] }
  0x19   : > { %v427_v58 = vmax.f32 %v395_v48, 0.0  ;;  %v428_v59 = vmax.f32 %v396_v49, 0.0  ;;  %v398_v60 = vadd.f32 %v1536_v3, %v359_v50  ;;  %v399_v61 = vadd.f32 %v1536_v3, %v360_v51  ;;  %v342_v51 = vld [vmem:[%s1531_s11 + $0xe8] sm:$0xff] }
  0x1a   : > { %1429 = vmatmul.mubr.msk.bf16.vlgmr.msra.gmra.mxu1 %vm472_vm1, %v464_v54  ;;  %v429_v63 = vmax.f32 %v397_v55, 0.0  ;;  %v400_v0 = vadd.f32 %v1536_v3, %v361_v56  ;;  %v372_v1 = vmul.f32 %v1526_v2, %v333_v52  ;;  %v373_v4 = vmul.f32 %v1526_v2, %v334_v53 }
  0x1b   : > { %v457_v7 = vpack.c.bf16 %v428_v59, %v427_v58  ;;  %v430_v8 = vmax.f32 %v398_v60, 0.0  ;;  %v431_v9 = vmax.f32 %v399_v61, 0.0  ;;  %v362_v10 = vmul.f32 %v1526_v2, %v323_v57  ;;  %v343_v60 = vld [vmem:[%s1531_s11 + $0xf0] sm:$0xff]  ;;  %v344_v61 = vld [vmem:[%s1531_s11 + $0xf8] sm:$0xff] }
  0x1c   : > { %v432_v11 = vmax.f32 %v400_v0, 0.0  ;;  %v411_v12 = vadd.f32 %v1536_v3, %v372_v1  ;;  %v412_v13 = vadd.f32 %v1536_v3, %v373_v4  ;;  %v363_v14 = vmul.f32 %v1526_v2, %v324_v62 }
  0x1d   : > { %1416 = vmatprep.mubr.msk.bf16.mxu0 %vm472_vm1, %v457_v7  ;;  %v458_v16 = vpack.c.bf16 %v430_v8, %v429_v63  ;;  %v401_v17 = vadd.f32 %v1536_v3, %v362_v10  ;;  %v374_v18 = vmul.f32 %v1526_v2, %v335_v5  ;;  %v375_v19 = vmul.f32 %v1526_v2, %v336_v6 }
  0x1e   : > { %v459_v22 = vpack.c.bf16 %v432_v11, %v431_v9  ;;  %v443_v23 = vmax.f32 %v411_v12, 0.0  ;;  %v444_v24 = vmax.f32 %v412_v13, 0.0  ;;  %v402_v25 = vadd.f32 %v1536_v3, %v363_v14 }
  0x1f   : > { %v433_v27 = vmax.f32 %v401_v17, 0.0  ;;  %v413_v28 = vadd.f32 %v1536_v3, %v374_v18  ;;  %v414_v29 = vadd.f32 %v1536_v3, %v375_v19  ;;  %v364_v30 = vmul.f32 %v1526_v2, %v325_v15 }
  0x20   : > { %1417 = vmatmul.mubr.msk.bf16.gmra.mxu0 %vm472_vm1, %v458_v16  ;;  %v465_v32 = vpack.c.bf16 %v444_v24, %v443_v23  ;;  %v434_v33 = vmax.f32 %v402_v25, 0.0  ;;  %v365_v34 = vmul.f32 %v1526_v2, %v326_v20  ;;  %v366_v35 = vmul.f32 %v1526_v2, %v327_v21 }
  0x21   : > { %1420 = vmatprep.mubr.msk.bf16.mxu0 %vm472_vm1, %v459_v22  ;;  %v445_v37 = vmax.f32 %v413_v28, 0.0  ;;  %v446_v38 = vmax.f32 %v414_v29, 0.0  ;;  %v403_v39 = vadd.f32 %v1536_v3, %v364_v30  ;;  %v367_v40 = vmul.f32 %v1526_v2, %v328_v26 }
  0x22   : > { %1432 = vmatprep.mubr.msk.bf16.mxu1 %vm472_vm1, %v465_v32  ;;  %v404_v42 = vadd.f32 %v1536_v3, %v365_v34  ;;  %v405_v43 = vadd.f32 %v1536_v3, %v366_v35  ;;  %v376_v44 = vmul.f32 %v1526_v2, %v337_v31  ;;  %v377_v50 = vmul.f32 %v1526_v2, %v338_v36 }
  0x23   : > { %v466_v47 = vpack.c.bf16 %v446_v38, %v445_v37  ;;  %v435_v48 = vmax.f32 %v403_v39, 0.0  ;;  %v406_v49 = vadd.f32 %v1536_v3, %v367_v40  ;;  %v460_v52 = vpack.c.bf16 %v434_v33, %v433_v27 }
  0x24   : > { %v436_v53 = vmax.f32 %v404_v42, 0.0  ;;  %v415_v54 = vadd.f32 %v1536_v3, %v376_v44  ;;  %v378_v55 = vmul.f32 %v1526_v2, %v339_v41  ;;  %v437_v56 = vmax.f32 %v405_v43, 0.0 }
  0x25   : > { %1433 = vmatmul.mubr.msk.bf16.gmra.mxu1 %vm472_vm1, %v466_v47  ;;  %v416_v57 = vadd.f32 %v1536_v3, %v377_v50  ;;  %v379_v58 = vmul.f32 %v1526_v2, %v340_v45  ;;  %v380_v59 = vmul.f32 %v1526_v2, %v341_v46  ;;  %v381_v1 = vmul.f32 %v1526_v2, %v342_v51 }
  0x26   : > { %v461_v62 = vpack.c.bf16 %v436_v53, %v435_v48  ;;  %v447_v63 = vmax.f32 %v415_v54, 0.0  ;;  %v417_v0 = vadd.f32 %v1536_v3, %v378_v55  ;;  %v438_v4 = vmax.f32 %v406_v49, 0.0 }
  0x27   : > { %v448_v5 = vmax.f32 %v416_v57, 0.0  ;;  %v418_v6 = vadd.f32 %v1536_v3, %v379_v58  ;;  %v419_v7 = vadd.f32 %v1536_v3, %v380_v59  ;;  %v420_v9 = vadd.f32 %v1536_v3, %v381_v1 }
  0x28   : > { %1421 = vmatmul.mubr.msk.bf16.gmra.mxu0 %vm472_vm1, %v460_v52  ;;  %v449_v8 = vmax.f32 %v417_v0, 0.0  ;;  %v382_v10 = vmul.f32 %v1526_v2, %v343_v60  ;;  %v383_v11 = vmul.f32 %v1526_v2, %v344_v61  ;;  %v462_v19 = vpack.c.bf16 %v438_v4, %v437_v56 }
  0x29   : > { %1424 = vmatprep.mubr.msk.bf16.mxu0 %vm472_vm1, %v461_v62  ;;  %v467_v12 = vpack.c.bf16 %v448_v5, %v447_v63  ;;  %v450_v13 = vmax.f32 %v418_v6, 0.0  ;;  %v451_v14 = vmax.f32 %v419_v7, 0.0  ;;  %v452_v15 = vmax.f32 %v420_v9, 0.0 }
  0x2a   : > { %v421_v16 = vadd.f32 %v1536_v3, %v382_v10  ;;  %v422_v17 = vadd.f32 %v1536_v3, %v383_v11 }
  0x2b   : > { %1436 = vmatprep.mubr.msk.bf16.mxu1 %vm472_vm1, %v467_v12  ;;  %v468_v18 = vpack.c.bf16 %v450_v13, %v449_v8  ;;  %v469_v20 = vpack.c.bf16 %v452_v15, %v451_v14 }
  0x2c   : > { %v453_v2 = vmax.f32 %v421_v16, 0.0  ;;  %v454_v21 = vmax.f32 %v422_v17, 0.0 }
  0x2d   : > { %1437 = vmatmul.mubr.msk.bf16.gmra.mxu1 %vm472_vm1, %v468_v18 }
  0x2e   : > { %1440 = vmatprep.mubr.msk.bf16.mxu1 %vm472_vm1, %v469_v20  ;;  %v470_v22 = vpack.c.bf16 %v454_v21, %v453_v2 }
  0x30   : > { %1425 = vmatmul.mubr.msk.bf16.gmra.mxu0 %vm472_vm1, %v462_v19 }
  0x35   : > { %1441 = vmatmul.mubr.msk.bf16.gmra.mxu1 %vm472_vm1, %v470_v22 }
  0xd8   : > { %v1414_v23 = vpop.f32.mrf.mxu0 }
  0xd9   : > { %v1363_v3 = vpack.c.bf16 %v1414_v23, %v1414_v23  ;;  %v1054_v32 = vmul.f32 %v1414_v23, %v1414_v23  ;;  %v980_v40 = vsel %vm976_vm3, %v1414_v23, 0.0 }
  0xda   : > { %v1658_v24 = vpop.f32.mrf.mxu1  ;;  %v559_v25 = vpop.f32.mrf.mxu0 }
  0xdb   : > { %v1361_v26 = vpack.c.bf16 %v559_v25, %v559_v25  ;;  %851 = vrot.lane.b32.xlu1 %v1363_v3, %s1465_s18  ;;  %817 = vst.msk [vmem:[%s1656_s17 + $0x8] sm:$0xf] %vm814_vm2, %v1363_v3  ;;  %v1379_v27 = vpack.c.bf16 %v1658_v24, %v1658_v24  ;;  %v1052_v30 = vmul.f32 %v559_v25, %v559_v25  ;;  %v977_v36 = vsel %vm976_vm3, %v559_v25, 0.0 }
  0xdc   : > { %v1415_v28 = vpop.f32.mrf.mxu0  ;;  %v1665_v29 = vpop.f32.mrf.mxu1  ;;  %v1087_v53 = vsel %vm976_vm3, %v1054_v32, 0.0 }
  0xdd   : > { %815 = vst.msk [vmem:[%s1656_s17] sm:$0xf] %vm814_vm2, %v1361_v26  ;;  %v1364_v31 = vpack.c.bf16 %v1415_v28, %v1415_v28  ;;  %883 = vrot.lane.b32.xlu0 %v1379_v27, %s1465_s18  ;;  %833 = vst.msk [vmem:[%s1656_s17 + $0x48] sm:$0xf] %vm814_vm2, %v1379_v27  ;;  %v1377_v34 = vpack.c.bf16 %v1665_v29, %v1665_v29  ;;  %v1084_v45 = vsel %vm976_vm3, %v1052_v30, 0.0  ;;  %v982_v54 = vsel %vm976_vm3, %v1415_v28, 0.0 }
  0xde   : > { %v562_v33 = vpop.f32.mrf.mxu0  ;;  %v1674_v35 = vpop.f32.mrf.mxu1  ;;  %v1055_v46 = vmul.f32 %v1415_v28, %v1415_v28 }
  0xdf   : > { %818 = vst.msk [vmem:[%s1656_s17 + $0xc] sm:$0xf] %vm814_vm2, %v1364_v31  ;;  %v1362_v37 = vpack.c.bf16 %v562_v33, %v562_v33  ;;  %v978_v38 = vsel %vm976_vm3, %v562_v33, 0.0  ;;  %v1053_v39 = vmul.f32 %v562_v33, %v562_v33  ;;  %853 = vrot.lane.b32.xlu1 %v1364_v31, %s1465_s18  ;;  %831 = vst.msk [vmem:[%s1656_s17 + $0x40] sm:$0xf] %vm814_vm2, %v1377_v34 }
  0xe0   : > { %v979_v41 = vadd.f32 %v978_v38, %v977_v36  ;;  %v1418_v42 = vpop.f32.mrf.mxu0  ;;  %v1380_v43 = vpack.c.bf16 %v1674_v35, %v1674_v35  ;;  %v1686_v44 = vpop.f32.mrf.mxu1  ;;  %v1089_v60 = vsel %vm976_vm3, %v1055_v46, 0.0 }
  0xe1   : > { %816 = vst.msk [vmem:[%s1656_s17 + $0x4] sm:$0xf] %vm814_vm2, %v1362_v37  ;;  %v1085_v47 = vsel %vm976_vm3, %v1053_v39, 0.0  ;;  %v1692_v48 = vpack.c.bf16 %v1418_v42, %v1418_v42  ;;  %847 = vrot.lane.b32.xlu0 %v1361_v26, %s1465_s18  ;;  %v1378_v52 = vpack.c.bf16 %v1686_v44, %v1686_v44  ;;  %v1058_v0 = vmul.f32 %v1418_v42, %v1418_v42 }
  0xe2   : > { %v981_v49 = vadd.f32 %v980_v40, %v979_v41  ;;  %v1086_v50 = vadd.f32 %v1085_v47, %v1084_v45  ;;  %834 = vst.msk [vmem:[%s1656_s17 + $0x4c] sm:$0xf] %vm814_vm2, %v1380_v43  ;;  %v575_v51 = vpop.f32.mrf.mxu0  ;;  %v988_v15 = vsel %vm976_vm3, %v1418_v42, 0.0 }
  0xe3   : > { %821 = vst.msk [vmem:[%s1656_s17 + $0x18] sm:$0xf] %vm814_vm2, %v1692_v48  ;;  %v1704_v55 = vpack.c.bf16 %v575_v51, %v575_v51  ;;  %v1056_v56 = vmul.f32 %v575_v51, %v575_v51  ;;  %885 = vrot.lane.b32.xlu1 %v1380_v43, %s1465_s18  ;;  %832 = vst.msk [vmem:[%s1656_s17 + $0x44] sm:$0xf] %vm814_vm2, %v1378_v52  ;;  %v984_v61 = vsel %vm976_vm3, %v575_v51, 0.0  ;;  %v1095_v23 = vsel %vm976_vm3, %v1058_v0, 0.0 }
  0xe4   : > { %v1088_v57 = vadd.f32 %v1087_v53, %v1086_v50  ;;  %v983_v58 = vadd.f32 %v982_v54, %v981_v49  ;;  %v1419_v59 = vpop.f32.mrf.mxu0 }
  0xe5   : > { %819 = vst.msk [vmem:[%s1656_s17 + $0x10] sm:$0xf] %vm814_vm2, %v1704_v55  ;;  %v1368_v62 = vpack.c.bf16 %v1419_v59, %v1419_v59  ;;  %v1714_v63 = vpop.f32.mrf.mxu1  ;;  %879 = vrot.lane.b32.xlu0 %v1377_v34, %s1465_s18  ;;  %v1091_v7 = vsel %vm976_vm3, %v1056_v56, 0.0  ;;  %v1059_v16 = vmul.f32 %v1419_v59, %v1419_v59  ;;  %v990_v3 = vsel %vm976_vm3, %v1419_v59, 0.0 }
  0xe6   : > { %v985_v1 = vadd.f32 %v984_v61, %v983_v58  ;;  %v1090_v4 = vadd.f32 %v1089_v60, %v1088_v57  ;;  %v578_v5 = vpop.f32.mrf.mxu0  ;;  %v1383_v6 = vpack.c.bf16 %v1714_v63, %v1714_v63 }
  0xe7   : > { %822 = vst.msk [vmem:[%s1656_s17 + $0x1c] sm:$0xf] %vm814_vm2, %v1368_v62  ;;  %v1722_v8 = vpack.c.bf16 %v578_v5, %v578_v5  ;;  %v986_v9 = vsel %vm976_vm3, %v578_v5, 0.0  ;;  %v1057_v10 = vmul.f32 %v578_v5, %v578_v5  ;;  %881 = vrot.lane.b32.xlu1 %v1378_v52, %s1465_s18  ;;  %v1726_v11 = vpop.f32.mrf.mxu1  ;;  %v1097_v32 = vsel %vm976_vm3, %v1059_v16, 0.0 }
  0xe8   : > { %v1092_v12 = vadd.f32 %v1091_v7, %v1090_v4  ;;  %v987_v13 = vadd.f32 %v986_v9, %v985_v1  ;;  %v1422_v14 = vpop.f32.mrf.mxu0  ;;  %837 = vst.msk [vmem:[%s1656_s17 + $0x58] sm:$0xf] %vm814_vm2, %v1383_v6  ;;  %v1742_v22 = vpack.c.bf16 %v1726_v11, %v1726_v11 }
  0xe9   : > { %820 = vst.msk [vmem:[%s1656_s17 + $0x14] sm:$0xf] %vm814_vm2, %v1722_v8  ;;  %v1093_v17 = vsel %vm976_vm3, %v1057_v10, 0.0  ;;  %v1735_v18 = vpack.c.bf16 %v1422_v14, %v1422_v14  ;;  %v1737_v19 = vpop.f32.mrf.mxu1  ;;  %849 = vrot.lane.b32.xlu0 %v1362_v37, %s1465_s18  ;;  %v1062_v45 = vmul.f32 %v1422_v14, %v1422_v14  ;;  %v996_v53 = vsel %vm976_vm3, %v1422_v14, 0.0 }
  0xea   : > { %v989_v20 = vadd.f32 %v988_v15, %v987_v13  ;;  %v1094_v2 = vadd.f32 %v1093_v17, %v1092_v12  ;;  %v591_v21 = vpop.f32.mrf.mxu0  ;;  %835 = vst.msk [vmem:[%s1656_s17 + $0x50] sm:$0xf] %vm814_vm2, %v1742_v22  ;;  %v1384_v39 = vpack.c.bf16 %v1737_v19, %v1737_v19 }
  0xeb   : > { %825 = vst.msk [vmem:[%s1656_s17 + $0x28] sm:$0xf] %vm814_vm2, %v1735_v18  ;;  %v1749_v25 = vpack.c.bf16 %v591_v21, %v591_v21  ;;  %v1060_v26 = vmul.f32 %v591_v21, %v591_v21  ;;  %861 = vrot.lane.b32.xlu1 %v1368_v62, %s1465_s18  ;;  %v1752_v27 = vpop.f32.mrf.mxu1  ;;  %v992_v33 = vsel %vm976_vm3, %v591_v21, 0.0  ;;  %v1103_v0 = vsel %vm976_vm3, %v1062_v45, 0.0 }
  0xec   : > { %v1096_v28 = vadd.f32 %v1095_v23, %v1094_v2  ;;  %v991_v30 = vadd.f32 %v990_v3, %v989_v20  ;;  %v1423_v31 = vpop.f32.mrf.mxu0  ;;  %838 = vst.msk [vmem:[%s1656_s17 + $0x5c] sm:$0xf] %vm814_vm2, %v1384_v39  ;;  %v1382_v58 = vpack.c.bf16 %v1752_v27, %v1752_v27 }
  0xed   : > { %823 = vst.msk [vmem:[%s1656_s17 + $0x20] sm:$0xf] %vm814_vm2, %v1749_v25  ;;  %v1762_v34 = vpack.c.bf16 %v1423_v31, %v1423_v31  ;;  %v1764_v36 = vpop.f32.mrf.mxu1  ;;  %859 = vrot.lane.b32.xlu0 %v1692_v48, %s1465_s18  ;;  %v1099_v41 = vsel %vm976_vm3, %v1060_v26, 0.0  ;;  %v1063_v54 = vmul.f32 %v1423_v31, %v1423_v31  ;;  %v998_v1 = vsel %vm976_vm3, %v1423_v31, 0.0 }
  0xee   : > { %v993_v37 = vadd.f32 %v992_v33, %v991_v30  ;;  %v1098_v38 = vadd.f32 %v1097_v32, %v1096_v28  ;;  %v594_v40 = vpop.f32.mrf.mxu0  ;;  %836 = vst.msk [vmem:[%s1656_s17 + $0x54] sm:$0xf] %vm814_vm2, %v1382_v58 }
  0xef   : > { %826 = vst.msk [vmem:[%s1656_s17 + $0x2c] sm:$0xf] %vm814_vm2, %v1762_v34  ;;  %v1774_v42 = vpack.c.bf16 %v594_v40, %v594_v40  ;;  %v1776_v43 = vpop.f32.mrf.mxu1  ;;  %v994_v47 = vsel %vm976_vm3, %v594_v40, 0.0  ;;  %v1061_v48 = vmul.f32 %v594_v40, %v594_v40  ;;  %893 = vrot.lane.b32.xlu1 %v1384_v39, %s1465_s18  ;;  %v1105_v13 = vsel %vm976_vm3, %v1063_v54, 0.0 }
  0xf0   : > { %v1100_v46 = vadd.f32 %v1099_v41, %v1098_v38  ;;  %v1426_v49 = vpop.f32.mrf.mxu0  ;;  %v995_v50 = vadd.f32 %v994_v47, %v993_v37  ;;  %v1837_v3 = vpack.c.bf16 %v1776_v43, %v1776_v43  ;;  %v1068_v37 = vmul.f32 %v1665_v29, %v1665_v29 }
  0xf1   : > { %824 = vst.msk [vmem:[%s1656_s17 + $0x24] sm:$0xf] %vm814_vm2, %v1774_v42  ;;  %v1785_v51 = vpack.c.bf16 %v1426_v49, %v1426_v49  ;;  %v1787_v52 = vpop.f32.mrf.mxu1  ;;  %v1101_v56 = vsel %vm976_vm3, %v1061_v48, 0.0  ;;  %891 = vrot.lane.b32.xlu0 %v1383_v6, %s1465_s18  ;;  %v1809_v6 = vpack.c.bf16 %v1764_v36, %v1764_v36  ;;  %v1066_v21 = vmul.f32 %v1426_v49, %v1426_v49 }
  0xf2   : > { %v607_v57 = vpop.f32.mrf.mxu0  ;;  %v997_v59 = vadd.f32 %v996_v53, %v995_v50  ;;  %v1102_v60 = vadd.f32 %v1101_v56, %v1100_v46  ;;  %v1004_v30 = vsel %vm976_vm3, %v1426_v49, 0.0  ;;  %839 = vst.msk [vmem:[%s1656_s17 + $0x60] sm:$0xf] %vm814_vm2, %v1837_v3  ;;  %v1388_v33 = vpack.c.bf16 %v1787_v52, %v1787_v52 }
  0xf3   : > { %829 = vst.msk [vmem:[%s1656_s17 + $0x38] sm:$0xf] %vm814_vm2, %v1785_v51  ;;  %v1797_v61 = vpack.c.bf16 %v607_v57, %v607_v57  ;;  %v1799_v62 = vpop.f32.mrf.mxu1  ;;  %v1064_v4 = vmul.f32 %v607_v57, %v607_v57  ;;  %857 = vrot.lane.b32.xlu1 %v1722_v8, %s1465_s18  ;;  %v1000_v8 = vsel %vm976_vm3, %v607_v57, 0.0  ;;  %841 = vst.msk [vmem:[%s1656_s17 + $0x68] sm:$0xf] %vm814_vm2, %v1809_v6  ;;  %v1111_v41 = vsel %vm976_vm3, %v1066_v21, 0.0 }
  0xf4   : > { %v1427_v5 = vpop.f32.mrf.mxu0  ;;  %v1104_v7 = vadd.f32 %v1103_v0, %v1102_v60  ;;  %v999_v9 = vadd.f32 %v998_v1, %v997_v59  ;;  %842 = vst.msk [vmem:[%s1656_s17 + $0x6c] sm:$0xf] %vm814_vm2, %v1388_v33  ;;  %v1008_v50 = vsel %vm976_vm3, %v1665_v29, 0.0  ;;  %v1010_v59 = vsel %vm976_vm3, %v1686_v44, 0.0 }
  0xf5   : > { %827 = vst.msk [vmem:[%s1656_s17 + $0x30] sm:$0xf] %vm814_vm2, %v1797_v61  ;;  %v1814_v10 = vpack.c.bf16 %v1427_v5, %v1427_v5  ;;  %v1816_v12 = vpop.f32.mrf.mxu1  ;;  %855 = vrot.lane.b32.xlu0 %v1704_v55, %s1465_s18  ;;  %v1107_v23 = vsel %vm976_vm3, %v1064_v4, 0.0  ;;  %v1067_v31 = vmul.f32 %v1427_v5, %v1427_v5  ;;  %v1006_v45 = vsel %vm976_vm3, %v1427_v5, 0.0 }
  0xf6   : > { %v610_v14 = vpop.f32.mrf.mxu0  ;;  %v1001_v15 = vadd.f32 %v1000_v8, %v999_v9  ;;  %v1106_v16 = vadd.f32 %v1105_v13, %v1104_v7  ;;  %v1865_v46 = vpack.c.bf16 %v1816_v12, %v1816_v12  ;;  %v1012_v4 = vsel %vm976_vm3, %v1658_v24, 0.0 }
  0xf7   : > { %830 = vst.msk [vmem:[%s1656_s17 + $0x3c] sm:$0xf] %vm814_vm2, %v1814_v10  ;;  %v1828_v17 = vpack.c.bf16 %v610_v14, %v610_v14  ;;  %v1002_v20 = vsel %vm976_vm3, %v610_v14, 0.0  ;;  %v1831_v2 = vpop.f32.mrf.mxu1  ;;  %v1065_v55 = vmul.f32 %v610_v14, %v610_v14  ;;  %889 = vrot.lane.b32.xlu1 %v1382_v58, %s1465_s18  ;;  %v1113_v53 = vsel %vm976_vm3, %v1067_v31, 0.0 }
  0xf8   : > { %v1108_v26 = vadd.f32 %v1107_v23, %v1106_v16  ;;  %v1003_v28 = vadd.f32 %v1002_v20, %v1001_v15  ;;  %845 = vst.msk [vmem:[%s1656_s17 + $0x78] sm:$0xf] %vm814_vm2, %v1865_v46  ;;  %v1883_v54 = vpack.c.bf16 %v1831_v2, %v1831_v2  ;;  %v1070_v58 = vmul.f32 %v1658_v24, %v1658_v24 }
  0xf9   : > { %828 = vst.msk [vmem:[%s1656_s17 + $0x34] sm:$0xf] %vm814_vm2, %v1828_v17  ;;  %v1109_v32 = vsel %vm976_vm3, %v1065_v55, 0.0  ;;  %887 = vrot.lane.b32.xlu0 %v1742_v22, %s1465_s18  ;;  %v1853_v40 = vpop.f32.mrf.mxu1  ;;  %v1386_v22 = vpack.c.bf16 %v1799_v62, %v1799_v62  ;;  %v1071_v5 = vmul.f32 %v1674_v35, %v1674_v35  ;;  %v1014_v8 = vsel %vm976_vm3, %v1674_v35, 0.0 }
  0xfa   : > { %v1005_v38 = vadd.f32 %v1004_v30, %v1003_v28  ;;  %v1110_v39 = vadd.f32 %v1109_v32, %v1108_v26  ;;  %v1392_v57 = vpack.c.bf16 %v1853_v40, %v1853_v40  ;;  %843 = vst.msk [vmem:[%s1656_s17 + $0x70] sm:$0xf] %vm814_vm2, %v1883_v54  ;;  %v1119_v13 = vsel %vm976_vm3, %v1070_v58, 0.0 }
  0xfb   : > { %869 = vrot.lane.b32.xlu1 %v1762_v34, %s1465_s18  ;;  %v1867_v49 = vpop.f32.mrf.mxu1  ;;  %v1069_v34 = vmul.f32 %v1686_v44, %v1686_v44  ;;  %840 = vst.msk [vmem:[%s1656_s17 + $0x64] sm:$0xf] %vm814_vm2, %v1386_v22  ;;  %v1072_v24 = vmul.f32 %v1726_v11, %v1726_v11  ;;  %v1016_v16 = vsel %vm976_vm3, %v1726_v11, 0.0  ;;  %v1073_v20 = vmul.f32 %v1752_v27, %v1752_v27 }
  0xfc   : > { %v1007_v47 = vadd.f32 %v1006_v45, %v1005_v38  ;;  %v1112_v48 = vadd.f32 %v1111_v41, %v1110_v39  ;;  %v1898_v60 = vpack.c.bf16 %v1867_v49, %v1867_v49  ;;  %846 = vst.msk [vmem:[%s1656_s17 + $0x7c] sm:$0xf] %vm814_vm2, %v1392_v57  ;;  %v1074_v23 = vmul.f32 %v1714_v63, %v1714_v63 }
  0xfd   : > { %867 = vrot.lane.b32.xlu0 %v1735_v18, %s1465_s18  ;;  %v1115_v18 = vsel %vm976_vm3, %v1068_v37, 0.0  ;;  %v1117_v44 = vsel %vm976_vm3, %v1069_v34, 0.0  ;;  %v1018_v55 = vsel %vm976_vm3, %v1752_v27, 0.0  ;;  %v1020_v28 = vsel %vm976_vm3, %v1714_v63, 0.0 }
  0xfe   : > { %v1009_v56 = vadd.f32 %v1008_v50, %v1007_v47  ;;  %v1114_v29 = vadd.f32 %v1113_v53, %v1112_v48  ;;  %844 = vst.msk [vmem:[%s1656_s17 + $0x74] sm:$0xf] %vm814_vm2, %v1898_v60  ;;  %v1125_v30 = vsel %vm976_vm3, %v1073_v20, 0.0  ;;  %v1022_v27 = vsel %vm976_vm3, %v1737_v19, 0.0 }
  0xff   : > { %901 = vrot.lane.b32.xlu1 %v1388_v33, %s1465_s18  ;;  %v1127_v33 = vsel %vm976_vm3, %v1074_v23, 0.0  ;;  %v1076_v37 = vmul.f32 %v1776_v43, %v1776_v43  ;;  %v1077_v41 = vmul.f32 %v1799_v62, %v1799_v62  ;;  %v1026_v47 = vsel %vm976_vm3, %v1799_v62, 0.0 }
 0x100   : > { %v1011_v0 = vadd.f32 %v1010_v59, %v1009_v56  ;;  %v1116_v1 = vadd.f32 %v1115_v18, %v1114_v29  ;;  %v1028_v50 = vsel %vm976_vm3, %v1764_v36, 0.0  ;;  %v1030_v62 = vsel %vm976_vm3, %v1787_v52, 0.0 }
 0x101   : > { %899 = vrot.lane.b32.xlu0 %v1809_v6, %s1465_s18  ;;  %v1121_v6 = vsel %vm976_vm3, %v1071_v5, 0.0  ;;  %v1133_v34 = vsel %vm976_vm3, %v1077_v41, 0.0  ;;  %v1081_v59 = vmul.f32 %v1867_v49, %v1867_v49 }
 0x102   : > { %v1013_v7 = vadd.f32 %v1012_v4, %v1011_v0  ;;  %v1118_v9 = vadd.f32 %v1117_v44, %v1116_v1  ;;  %v1082_v1 = vmul.f32 %v1816_v12, %v1816_v12  ;;  %v1034_v4 = vsel %vm976_vm3, %v1867_v49, 0.0 }
 0x103   : > { %865 = vrot.lane.b32.xlu1 %v1774_v42, %s1465_s18  ;;  %v1123_v42 = vsel %vm976_vm3, %v1072_v24, 0.0  ;;  %v1036_v44 = vsel %vm976_vm3, %v1816_v12, 0.0 }
 0x104   : > { %v1120_v14 = vadd.f32 %v1119_v13, %v1118_v9  ;;  %v1015_v15 = vadd.f32 %v1014_v8, %v1013_v7  ;;  %v1141_v7 = vsel %vm976_vm3, %v1081_v59, 0.0  ;;  %v1143_v49 = vsel %vm976_vm3, %v1082_v1, 0.0 }
 0x105   : > { %863 = vrot.lane.b32.xlu0 %v1749_v25, %s1465_s18  ;;  %v1075_v25 = vmul.f32 %v1737_v19, %v1737_v19 }
 0x106   : > { %v1017_v35 = vadd.f32 %v1016_v16, %v1015_v15  ;;  %v1122_v21 = vadd.f32 %v1121_v6, %v1120_v14 }
 0x107   : > { %897 = vrot.lane.b32.xlu1 %v1386_v22, %s1465_s18  ;;  %v1129_v39 = vsel %vm976_vm3, %v1075_v25, 0.0  ;;  %v1078_v22 = vmul.f32 %v1764_v36, %v1764_v36 }
 0x108   : > { %v1019_v26 = vadd.f32 %v1018_v55, %v1017_v35  ;;  %v1124_v11 = vadd.f32 %v1123_v42, %v1122_v21 }
 0x109   : > { %895 = vrot.lane.b32.xlu0 %v1837_v3, %s1465_s18  ;;  %v1024_v3 = vsel %vm976_vm3, %v1776_v43, 0.0  ;;  %v1135_v29 = vsel %vm976_vm3, %v1078_v22, 0.0 }
 0x10a   : > { %v1021_v31 = vadd.f32 %v1020_v28, %v1019_v26  ;;  %v1126_v32 = vadd.f32 %v1125_v30, %v1124_v11 }
 0x10b   : > { %877 = vrot.lane.b32.xlu1 %v1814_v10, %s1465_s18  ;;  %v1131_v10 = vsel %vm976_vm3, %v1076_v37, 0.0 }
 0x10c   : > { %v1023_v63 = vadd.f32 %v1022_v27, %v1021_v31  ;;  %v1128_v38 = vadd.f32 %v1127_v33, %v1126_v32 }
 0x10d   : > { %875 = vrot.lane.b32.xlu0 %v1785_v51, %s1465_s18  ;;  %v1079_v51 = vmul.f32 %v1787_v52, %v1787_v52 }
 0x10e   : > { %v1025_v19 = vadd.f32 %v1024_v3, %v1023_v63  ;;  %v1130_v45 = vadd.f32 %v1129_v39, %v1128_v38 }
 0x10f   : > { %909 = vrot.lane.b32.xlu1 %v1392_v57, %s1465_s18  ;;  %v1080_v57 = vmul.f32 %v1831_v2, %v1831_v2  ;;  %v1137_v18 = vsel %vm976_vm3, %v1079_v51, 0.0 }
 0x110   : > { %v1132_v48 = vadd.f32 %v1131_v10, %v1130_v45  ;;  %v1027_v43 = vadd.f32 %v1026_v47, %v1025_v19 }
 0x111   : > { %907 = vrot.lane.b32.xlu0 %v1865_v46, %s1465_s18  ;;  %v1032_v46 = vsel %vm976_vm3, %v1831_v2, 0.0 }
 0x112   : > { %v1029_v53 = vadd.f32 %v1028_v50, %v1027_v43  ;;  %v1134_v56 = vadd.f32 %v1133_v34, %v1132_v48 }
 0x113   : > { %873 = vrot.lane.b32.xlu1 %v1828_v17, %s1465_s18  ;;  %v1139_v17 = vsel %vm976_vm3, %v1080_v57, 0.0 }
 0x114   : > { %v1136_v36 = vadd.f32 %v1135_v29, %v1134_v56  ;;  %v1031_v58 = vadd.f32 %v1030_v62, %v1029_v53 }
 0x115   : > { %871 = vrot.lane.b32.xlu0 %v1797_v61, %s1465_s18  ;;  %v1083_v61 = vmul.f32 %v1853_v40, %v1853_v40 }
 0x116   : > { %v1033_v52 = vadd.f32 %v1032_v46, %v1031_v58  ;;  %v1138_v0 = vadd.f32 %v1137_v18, %v1136_v36 }
 0x117   : > { %905 = vrot.lane.b32.xlu1 %v1898_v60, %s1465_s18  ;;  %v1038_v60 = vsel %vm976_vm3, %v1853_v40, 0.0  ;;  %v1145_v14 = vsel %vm976_vm3, %v1083_v61, 0.0 }
 0x118   : > { %v1140_v2 = vadd.f32 %v1139_v17, %v1138_v0  ;;  %v1035_v5 = vadd.f32 %v1034_v4, %v1033_v52 }
 0x119   : > { %903 = vrot.lane.b32.xlu0 %v1883_v54, %s1465_s18 }
 0x11a   : > { %v1037_v9 = vadd.f32 %v1036_v44, %v1035_v5  ;;  %v1142_v13 = vadd.f32 %v1141_v7, %v1140_v2 }
 0x11c   : > { %v1039_v8 = vadd.f32 %v1038_v60, %v1037_v9  ;;  %v1144_v24 = vadd.f32 %v1143_v49, %v1142_v13 }
 0x11e   : > { %v1040_v12 = vrot.slane %v1039_v8, 4  ;;  %v1146_v15 = vadd.f32 %v1145_v14, %v1144_v24 }
 0x120   : > { %v1041_v6 = vadd.f32 %v1040_v12, %v1039_v8  ;;  %v1147_v16 = vrot.slane %v1146_v15, 4 }
 0x122   : > { %v1042_v20 = vrot.slane %v1041_v6, 2  ;;  %v1148_v35 = vadd.f32 %v1147_v16, %v1146_v15 }
 0x124   : > { %v1043_v21 = vadd.f32 %v1042_v20, %v1041_v6  ;;  %v1149_v54 = vrot.slane %v1148_v35, 2 }
 0x126   : > { %v1044_v23 = vrot.slane %v1043_v21, 1  ;;  %v1150_v42 = vadd.f32 %v1149_v54, %v1148_v35 }
 0x128   : > { %v1045_v55 = vadd.f32 %v1044_v23, %v1043_v21  ;;  %v1151_v26 = vrot.slane %v1150_v42, 1 }
 0x12a   : > { %1047 = vrot.lane.b32.xlu0 %v1045_v55, %s1465_s18  ;;  %v1152_v40 = vadd.f32 %v1151_v26, %v1150_v42 }
 0x12c   : > { %1154 = vrot.lane.b32.xlu1 %v1152_v40, %s1465_s18 }
 0x14d   : > { %v852_v11 = vpop.permute.xlu1 %851 }
 0x14e   : > { %946 = vst.msk [vmem:[%s2005_s21 + $0x8] sm:$0xf] %vm943_vm4, %v852_v11 }
 0x14f   : > { %v884_v28 = vpop.permute.xlu0 %883 }
 0x150   : > { %962 = vst.msk [vmem:[%s2005_s21 + $0x48] sm:$0xf] %vm943_vm4, %v884_v28 }
 0x151   : > { %v854_v25 = vpop.permute.xlu1 %853 }
 0x152   : > { %947 = vst.msk [vmem:[%s2005_s21 + $0xc] sm:$0xf] %vm943_vm4, %v854_v25 }
 0x153   : > { %v848_v30 = vpop.permute.xlu0 %847 }
 0x154   : > { %944 = vst.msk [vmem:[%s2005_s21] sm:$0xf] %vm943_vm4, %v848_v30 }
 0x155   : > { %v886_v31 = vpop.permute.xlu1 %885 }
 0x156   : > { %963 = vst.msk [vmem:[%s2005_s21 + $0x4c] sm:$0xf] %vm943_vm4, %v886_v31 }
 0x157   : > { %v880_v32 = vpop.permute.xlu0 %879 }
 0x158   : > { %960 = vst.msk [vmem:[%s2005_s21 + $0x40] sm:$0xf] %vm943_vm4, %v880_v32 }
 0x159   : > { %v882_v33 = vpop.permute.xlu1 %881 }
 0x15a   : > { %961 = vst.msk [vmem:[%s2005_s21 + $0x44] sm:$0xf] %vm943_vm4, %v882_v33 }
 0x15b   : > { %v850_v27 = vpop.permute.xlu0 %849 }
 0x15c   : > { %945 = vst.msk [vmem:[%s2005_s21 + $0x4] sm:$0xf] %vm943_vm4, %v850_v27 }
 0x15d   : > { %v862_v37 = vpop.permute.xlu1 %861 }
 0x15e   : > { %951 = vst.msk [vmem:[%s2005_s21 + $0x1c] sm:$0xf] %vm943_vm4, %v862_v37 }
 0x15f   : > { %v860_v63 = vpop.permute.xlu0 %859 }
 0x160   : > { %950 = vst.msk [vmem:[%s2005_s21 + $0x18] sm:$0xf] %vm943_vm4, %v860_v63 }
 0x161   : > { %v894_v38 = vpop.permute.xlu1 %893 }
 0x162   : > { %967 = vst.msk [vmem:[%s2005_s21 + $0x5c] sm:$0xf] %vm943_vm4, %v894_v38 }
 0x163   : > { %v892_v39 = vpop.permute.xlu0 %891 }
 0x164   : > { %966 = vst.msk [vmem:[%s2005_s21 + $0x58] sm:$0xf] %vm943_vm4, %v892_v39 }
 0x165   : > { %v858_v3 = vpop.permute.xlu1 %857 }
 0x166   : > { %949 = vst.msk [vmem:[%s2005_s21 + $0x14] sm:$0xf] %vm943_vm4, %v858_v3 }
 0x167   : > { %v856_v41 = vpop.permute.xlu0 %855 }
 0x168   : > { %948 = vst.msk [vmem:[%s2005_s21 + $0x10] sm:$0xf] %vm943_vm4, %v856_v41 }
 0x169   : > { %v890_v19 = vpop.permute.xlu1 %889 }
 0x16a   : > { %965 = vst.msk [vmem:[%s2005_s21 + $0x54] sm:$0xf] %vm943_vm4, %v890_v19 }
 0x16b   : > { %v888_v45 = vpop.permute.xlu0 %887 }
 0x16c   : > { %964 = vst.msk [vmem:[%s2005_s21 + $0x50] sm:$0xf] %vm943_vm4, %v888_v45 }
 0x16d   : > { %v870_v22 = vpop.permute.xlu1 %869 }
 0x16e   : > { %955 = vst.msk [vmem:[%s2005_s21 + $0x2c] sm:$0xf] %vm943_vm4, %v870_v22 }
 0x16f   : > { %v868_v10 = vpop.permute.xlu0 %867 }
 0x170   : > { %954 = vst.msk [vmem:[%s2005_s21 + $0x28] sm:$0xf] %vm943_vm4, %v868_v10 }
 0x171   : > { %v902_v47 = vpop.permute.xlu1 %901 }
 0x172   : > { %971 = vst.msk [vmem:[%s2005_s21 + $0x6c] sm:$0xf] %vm943_vm4, %v902_v47 }
 0x173   : > { %v900_v48 = vpop.permute.xlu0 %899 }
 0x174   : > { %970 = vst.msk [vmem:[%s2005_s21 + $0x68] sm:$0xf] %vm943_vm4, %v900_v48 }
 0x175   : > { %v866_v43 = vpop.permute.xlu1 %865 }
 0x176   : > { %953 = vst.msk [vmem:[%s2005_s21 + $0x24] sm:$0xf] %vm943_vm4, %v866_v43 }
 0x177   : > { %v864_v50 = vpop.permute.xlu0 %863 }
 0x178   : > { %952 = vst.msk [vmem:[%s2005_s21 + $0x20] sm:$0xf] %vm943_vm4, %v864_v50 }
 0x179   : > { %v898_v51 = vpop.permute.xlu1 %897 }
 0x17a   : > { %969 = vst.msk [vmem:[%s2005_s21 + $0x64] sm:$0xf] %vm943_vm4, %v898_v51 }
 0x17b   : > { %v896_v34 = vpop.permute.xlu0 %895 }
 0x17c   : > { %968 = vst.msk [vmem:[%s2005_s21 + $0x60] sm:$0xf] %vm943_vm4, %v896_v34 }
 0x17d   : > { %v878_v53 = vpop.permute.xlu1 %877 }
 0x17e   : > { %959 = vst.msk [vmem:[%s2005_s21 + $0x3c] sm:$0xf] %vm943_vm4, %v878_v53 }
 0x17f   : > { %v876_v56 = vpop.permute.xlu0 %875 }
 0x180   : > { %958 = vst.msk [vmem:[%s2005_s21 + $0x38] sm:$0xf] %vm943_vm4, %v876_v56 }
 0x181   : > { %v910_v29 = vpop.permute.xlu1 %909 }
 0x182   : > { %975 = vst.msk [vmem:[%s2005_s21 + $0x7c] sm:$0xf] %vm943_vm4, %v910_v29 }
 0x183   : > { %v908_v62 = vpop.permute.xlu0 %907 }
 0x184   : > { %974 = vst.msk [vmem:[%s2005_s21 + $0x78] sm:$0xf] %vm943_vm4, %v908_v62 }
 0x185   : > { %v874_v57 = vpop.permute.xlu1 %873 }
 0x186   : > { %957 = vst.msk [vmem:[%s2005_s21 + $0x34] sm:$0xf] %vm943_vm4, %v874_v57 }
 0x187   : > { %v872_v36 = vpop.permute.xlu0 %871 }
 0x188   : > { %956 = vst.msk [vmem:[%s2005_s21 + $0x30] sm:$0xf] %vm943_vm4, %v872_v36 }
 0x189   : > { %v906_v58 = vpop.permute.xlu1 %905 }
 0x18a   : > { %973 = vst.msk [vmem:[%s2005_s21 + $0x74] sm:$0xf] %vm943_vm4, %v906_v58 }
 0x18b   : > { %v904_v18 = vpop.permute.xlu0 %903 }
 0x18c   : > { %972 = vst.msk [vmem:[%s2005_s21 + $0x70] sm:$0xf] %vm943_vm4, %v904_v18 }
 0x19c   : > { %v1048_v46 = vpop.permute.xlu0 %1047 }
 0x19d   : > { %1051 = vst.msk [vmem:[%s308_s26] sm:$0x1] %vm1050_vm5, %v1048_v46 }
 0x19e   : > { %v1155_v59 = vpop.permute.xlu1 %1154 }
 0x19f   : > { %1157 = vst.msk [vmem:[%s311_s29] sm:$0x1] %vm1050_vm5, %v1155_v59 }
 0x1a0 PF: > { %s18_s24 = sadd.s32 1, %s1463_s24  }
 0x1a1   : > { %p15_p5 = scmp.ge.s32.totalorder %s18_s24, 4  }
 0x1a3   :  { %17 = sbr.rel (!%p15_p5) target bundleno = 1 (0x1), region = 102 }

// kernel: preact_bottleneck_forward.4
= control target key start
LH: loop header
LB: loop body
LE: loop exit
PB: predicated region body
PF: predicated region fallthrough
CT: control target
= control target key end

     0   :  { %s2152_s21 = smov 0   ;;  %s2154_s22 = smov 0   ;;  %s2600_s0 = inlined_call_operand.vmem [shape: bf16[2,16,16,4], index: 0, kind: input, shape index: {}]   ;;  %s2601_s1 = inlined_call_operand.vmem [shape: f32[1,1,4], index: 1, kind: input, shape index: {}]   ;;  %s2602_s2 = inlined_call_operand.vmem [shape: f32[1,1,4], index: 2, kind: input, shape index: {}]   ;;  %s2603_s3 = inlined_call_operand.vmem [shape: bf16[3,12,4], index: 3, kind: input, shape index: {}]   ;;  %s2604_s4 = inlined_call_operand.vmem [shape: bf16[512,4], index: 4, kind: output, shape index: {0}]   ;;  %s2605_s5 = inlined_call_operand.vmem [shape: f32[4,1,4], index: 5, kind: output, shape index: {1}]   ;;  %s2606_s6 = inlined_call_operand.vmem [shape: f32[4,1,4], index: 6, kind: output, shape index: {2}]  }
   0x1   :  { %s2156_s23 = smov 0   ;;  %s2158_s24 = smov 0  }
   0x2   :  { %s2160_s25 = smov 0  }
   0x3 LB: > { %s26_s26 = sadd.s32 1, %s2099_s23  ;;  %s29_s27 = sadd.s32 1, %s2103_s24  ;;  %s2107_s25 = sphi %s2160_s25, %s17_s25   ;;  %s2103_s24 = sphi %s2158_s24, %s2614_s24   ;;  %s2099_s23 = sphi %s2156_s23, %s2613_s23   ;;  %s2095_s22 = sphi %s2154_s22, %s2612_s22   ;;  %s2091_s21 = sphi %s2152_s21, %s2611_s21  }
   0x4   : > { %p27_p0 = scmp.ge.s32.totalorder %s26_s26, 2  ;;  %p1721_p1 = scmp.ge.s32.totalorder %s2107_s25, 1 }
   0x5   : > { %p241_p2 = scmp.lt.s32.totalorder %s2107_s25, 5 }
   0x6   : > { %s2616_s26 = smov (%p27_p0, %s26_s26), 0  ;;  %s2618_s27 = smov (!%p27_p0, %s29_s27), %s2103_s24 }
   0x7   : > { %p242_p3 = pnand %p1721_p1, %p241_p2  ;;  %p31_p4 = scmp.ge.s32.totalorder %s2618_s27, 2 }
   0x8   : > { %p283_p5 = scmp.lt.s32.totalorder (!%p242_p3), %s2095_s22, 1  ;;  %s1840_s29 = sshll.u32 (!%p242_p3), %s2091_s21, 6 }
   0x9   : > { %s2620_s27 = smov (%p31_p4, %s2618_s27), 0  ;;  %245 = sbr.rel (%p242_p3) target bundleno = 748 (0x2ec), region = 36 }
   0xa   : > { %s2109_s15 = smov (!%p242_p3), 4   ;;  %s1724_s16 = sshll.u32 (!%p242_p3), %s2095_s22, 1 }
   0xb   : > { %s289_s17 = sadd.s32 (!%p242_p3), %s2091_s21, %s1724_s16  ;;  %s2110_s19 = smov (!%p242_p3), 8  }
   0xc   : > { %s1725_s18 = sshll.u32 (!%p242_p3), %s289_s17, 4  ;;  %p300_p7 = scmp.lt.s32.totalorder (!%p242_p3), %s289_s17, 3 }
   0xd   : > { %p291_p6 = scmp.lt.s32.totalorder (!%p242_p3), %s1725_s18, 63  ;;  %s1729_s14 = sshll.u32 (!%p242_p3), %s2091_s21, 3 }
   0xe   : > { %s284_s28 = scalar_select %p283_p5, %s2095_s22, 1  ;;  %v2197_v0 = vld [vmem:[%s2601_s1] ss:$0 sm:$0xff]  ;;  %vm518_vm0 = vcmask 1047552   ;;  %vm519_vm1 = vsmask.f32 7424 }
   0xf   : > { %v2209_v9 = vld [vmem:[%s2602_s2] ss:$0 sm:$0xff]  ;;  %vm2285_vm2 = vmand %vm518_vm0, %vm519_vm1  ;;  %s2622_s18 = smov (!%p291_p6, %s1725_s18), 63  ;;  %s2624_s17 = smov (!%p300_p7, %s289_s17), 3  ;;  %vm483_vm3 = vcmask 1040384   ;;  %vm577_vm6 = vcmask 31744  }
  0x10   : > { %s1838_s30 = sshll.u32 %s284_s28, 7  ;;  %s1726_s20 = sshll.u32 %s2622_s18, 2  ;;  %vm484_vm4 = vsmask.f32 256  ;;  %vm602_vm7 = vcmask 64512   ;;  %vm676_vm8 = vcmask 93184  }
  0x11   : > { %s2192_s9 = scalar_lea.vmem %s2600_s0, %s1838_s30  ;;  %s302_s8 = scalar_lea.vmem %s2605_s5, %s2624_s17  ;;  %vm2355_vm5 = vmand %vm483_vm3, %vm484_vm4 }
  0x12   : > { %s2200_s12 = scalar_lea.vmem %s2192_s9, %s1840_s29  ;;  %s2322_s29 = scalar_lea.vmem %s2604_s4, %s1726_s20 }
  0x13   : > { %v1900_v1 = vld [vmem:[%s2200_s12 + $0x10] sm:$0xff]   ;;  %v1860_v2 = vld [vmem:[%s2200_s12] sm:$0xff]   ;;  %v1901_v3 = vld [vmem:[%s2200_s12 + $0x18] sm:$0xff]   ;;  %s309_s13 = scalar_lea.vmem %s2606_s6, %s2624_s17  ;;  %p1750_p8 = scmp.ne.s32.totalorder %s2091_s21, 0 }
  0x14   : > { %v1869_v4 = vunpack.c.l.bf16 %v1900_v1  ;;  %v1870_v5 = vunpack.c.h.bf16 %v1900_v1  ;;  %v1861_v6 = vunpack.c.l.bf16 %v1860_v2  ;;  %v1862_v7 = vunpack.c.h.bf16 %v1860_v2  ;;  %v1899_v8 = vld [vmem:[%s2200_s12 + $0x8] sm:$0xff]   ;;  %v1902_v35 = vld [vmem:[%s2200_s12 + $0x20] sm:$0xff]   ;;  %v1905_v40 = vld [vmem:[%s2200_s12 + $0x38] sm:$0xff]  }
  0x15   : > { %v1873_v10 = vunpack.c.l.bf16 %v1901_v3  ;;  %v1874_v11 = vunpack.c.h.bf16 %v1901_v3  ;;  %v1865_v12 = vunpack.c.l.bf16 %v1899_v8  ;;  %v1866_v13 = vunpack.c.h.bf16 %v1899_v8  ;;  %v1903_v30 = vld [vmem:[%s2200_s12 + $0x28] sm:$0xff]   ;;  %v1904_v45 = vld [vmem:[%s2200_s12 + $0x30] sm:$0xff]  }
  0x16   : > { %v361_v14 = vmul.f32 %v1869_v4, %v2197_v0  ;;  %v362_v15 = vmul.f32 %v1870_v5, %v2197_v0  ;;  %v357_v16 = vmul.f32 %v1861_v6, %v2197_v0  ;;  %v358_v17 = vmul.f32 %v1862_v7, %v2197_v0 }
  0x17   : > { %v363_v18 = vmul.f32 %v1873_v10, %v2197_v0  ;;  %v364_v19 = vmul.f32 %v1874_v11, %v2197_v0  ;;  %v359_v20 = vmul.f32 %v1865_v12, %v2197_v0  ;;  %v360_v21 = vmul.f32 %v1866_v13, %v2197_v0 }
  0x18   : > { %v383_v22 = vadd.f32 %v2209_v9, %v361_v14  ;;  %v384_v23 = vadd.f32 %v2209_v9, %v362_v15  ;;  %v379_v24 = vadd.f32 %v2209_v9, %v357_v16  ;;  %v380_v25 = vadd.f32 %v2209_v9, %v358_v17 }
  0x19   : > { %v385_v26 = vadd.f32 %v2209_v9, %v363_v18  ;;  %v386_v27 = vadd.f32 %v2209_v9, %v364_v19  ;;  %v381_v28 = vadd.f32 %v2209_v9, %v359_v20  ;;  %v382_v29 = vadd.f32 %v2209_v9, %v360_v21 }
  0x1a   : > { %v399_v31 = vmax.f32 %v383_v22, 0.0  ;;  %v400_v32 = vmax.f32 %v384_v23, 0.0  ;;  %v395_v33 = vmax.f32 %v379_v24, 0.0  ;;  %v396_v34 = vmax.f32 %v380_v25, 0.0 }
  0x1b   : > { %v401_v36 = vmax.f32 %v385_v26, 0.0  ;;  %v402_v37 = vmax.f32 %v386_v27, 0.0  ;;  %v397_v38 = vmax.f32 %v381_v28, 0.0  ;;  %v398_v39 = vmax.f32 %v382_v29, 0.0 }
  0x1c   : > { %v2230_v41 = vpack.c.bf16 %v400_v32, %v399_v31  ;;  %v2232_v42 = vpack.c.bf16 %v396_v34, %v395_v33  ;;  %v1881_v43 = vunpack.c.l.bf16 %v1903_v30  ;;  %v1882_v44 = vunpack.c.h.bf16 %v1903_v30 }
  0x1d   : > { %v2235_v46 = vpack.c.bf16 %v402_v37, %v401_v36  ;;  %v2237_v47 = vpack.c.bf16 %v398_v39, %v397_v38  ;;  %v1877_v48 = vunpack.c.l.bf16 %v1902_v35  ;;  %v1878_v49 = vunpack.c.h.bf16 %v1902_v35 }
  0x1e   : > { %541 = vrot.lane.b32.xlu1 %v2230_v41, %s2109_s15  ;;  %537 = vrot.lane.b32.xlu0 %v2232_v42, %s2109_s15  ;;  %v367_v50 = vmul.f32 %v1881_v43, %v2197_v0  ;;  %v368_v51 = vmul.f32 %v1882_v44, %v2197_v0  ;;  %v1889_v52 = vunpack.c.l.bf16 %v1905_v40  ;;  %v1890_v53 = vunpack.c.h.bf16 %v1905_v40 }
  0x1f   : > { %v365_v54 = vmul.f32 %v1877_v48, %v2197_v0  ;;  %v366_v55 = vmul.f32 %v1878_v49, %v2197_v0  ;;  %v1885_v56 = vunpack.c.l.bf16 %v1904_v45  ;;  %v1886_v57 = vunpack.c.h.bf16 %v1904_v45 }
  0x20   : > { %v389_v58 = vadd.f32 %v2209_v9, %v367_v50  ;;  %v390_v59 = vadd.f32 %v2209_v9, %v368_v51  ;;  %v371_v60 = vmul.f32 %v1889_v52, %v2197_v0  ;;  %v372_v61 = vmul.f32 %v1890_v53, %v2197_v0 }
  0x21   : > { %v387_v62 = vadd.f32 %v2209_v9, %v365_v54  ;;  %v388_v63 = vadd.f32 %v2209_v9, %v366_v55  ;;  %v369_v1 = vmul.f32 %v1885_v56, %v2197_v0  ;;  %v370_v2 = vmul.f32 %v1886_v57, %v2197_v0 }
  0x22   : > { %543 = vrot.lane.b32.xlu1 %v2235_v46, %s2109_s15  ;;  %539 = vrot.lane.b32.xlu0 %v2237_v47, %s2109_s15  ;;  %v405_v3 = vmax.f32 %v389_v58, 0.0  ;;  %v406_v4 = vmax.f32 %v390_v59, 0.0  ;;  %v393_v5 = vadd.f32 %v2209_v9, %v371_v60  ;;  %v394_v6 = vadd.f32 %v2209_v9, %v372_v61 }
  0x23   : > { %v403_v7 = vmax.f32 %v387_v62, 0.0  ;;  %v404_v8 = vmax.f32 %v388_v63, 0.0  ;;  %v391_v10 = vadd.f32 %v2209_v9, %v369_v1  ;;  %v392_v11 = vadd.f32 %v2209_v9, %v370_v2 }
  0x24   : > { %v2263_v12 = vpack.c.bf16 %v406_v4, %v405_v3  ;;  %v409_v13 = vmax.f32 %v393_v5, 0.0  ;;  %v410_v14 = vmax.f32 %v394_v6, 0.0  ;;  %v427_v15 = vshrl.u32 %v2237_v47, 16 }
  0x25   : > { %v2266_v16 = vpack.c.bf16 %v404_v8, %v403_v7  ;;  %v407_v17 = vmax.f32 %v391_v10, 0.0  ;;  %v408_v18 = vmax.f32 %v392_v11, 0.0  ;;  %v430_v19 = vshll.u32 %v2237_v47, 16 }
  0x26   : > { %547 = vrot.lane.b32.xlu1 %v2263_v12, %s2109_s15  ;;  %v2271_v20 = vpack.c.bf16 %v410_v14, %v409_v13  ;;  %v420_v21 = vshrl.u32 %v2232_v42, 16  ;;  %v423_v22 = vshll.u32 %v2232_v42, 16  ;;  %v441_v25 = vshrl.u32 %v2235_v46, 16 }
  0x27   : > { %545 = vrot.lane.b32.xlu0 %v2266_v16, %s2109_s15  ;;  %v2277_v23 = vpack.c.bf16 %v408_v18, %v407_v17  ;;  %v496_v24 = vrot.slane %v430_v19, 1  ;;  %v444_v26 = vshll.u32 %v2235_v46, 16  ;;  %v429_v28 = vrot.slane %v427_v15, 7 }
  0x28   : > { %v494_v29 = vrot.slane %v423_v22, 1  ;;  %v434_v30 = vshrl.u32 %v2230_v41, 16  ;;  %v437_v31 = vshll.u32 %v2230_v41, 16  ;;  %v422_v33 = vrot.slane %v420_v21, 7 }
  0x29   : > { %v497_v32 = vor.u32 %v496_v24, %v427_v15  ;;  %v443_v34 = vrot.slane %v441_v25, 7  ;;  %v500_v35 = vrot.slane %v444_v26, 1  ;;  %v455_v38 = vshrl.u32 %v2263_v12, 16 }
  0x2a   : > { %551 = vrot.lane.b32.xlu1 %v2271_v20, %s2109_s15  ;;  %v495_v36 = vor.u32 %v494_v29, %v420_v21  ;;  %v498_v37 = vrot.slane %v437_v31, 1  ;;  %v458_v39 = vshll.u32 %v2263_v12, 16  ;;  %v436_v42 = vrot.slane %v434_v30, 7 }
  0x2b   : > { %549 = vrot.lane.b32.xlu0 %v2277_v23, %s2109_s15  ;;  %v522_v40 = vsel %vm2285_vm2, %v497_v32, 0  ;;  %v501_v41 = vor.u32 %v500_v35, %v441_v25  ;;  %v448_v43 = vshrl.u32 %v2266_v16, 16  ;;  %v451_v48 = vshll.u32 %v2266_v16, 16 }
  0x2c   : > { %v521_v44 = vsel %vm2285_vm2, %v495_v36, 0  ;;  %v499_v45 = vor.u32 %v498_v37, %v434_v30  ;;  %v504_v46 = vrot.slane %v458_v39, 1  ;;  %v457_v50 = vrot.slane %v455_v38, 7 }
  0x2d   : > { %v524_v49 = vsel %vm2285_vm2, %v501_v41, 0  ;;  %v450_v51 = vrot.slane %v448_v43, 7  ;;  %v472_v52 = vshll.u32 %v2271_v20, 16  ;;  %v502_v54 = vrot.slane %v451_v48, 1 }
  0x2e   : > { %563 = vrot.lane.b32.xlu1 %v522_v40, %s2110_s19  ;;  %v523_v53 = vsel %vm2285_vm2, %v499_v45, 0  ;;  %v469_v55 = vshrl.u32 %v2271_v20, 16  ;;  %v462_v56 = vshrl.u32 %v2277_v23, 16  ;;  %v505_v57 = vor.u32 %v504_v46, %v455_v38 }
  0x2f   : > { %561 = vrot.lane.b32.xlu0 %v521_v44, %s2110_s19  ;;  %v508_v58 = vrot.slane %v472_v52, 1  ;;  %v465_v59 = vshll.u32 %v2277_v23, 16  ;;  %v2315_v60 = vor.u32 %v437_v31, %v436_v42  ;;  %v503_v61 = vor.u32 %v502_v54, %v448_v43 }
  0x30   : > { %v471_v62 = vrot.slane %v469_v55, 7  ;;  %v464_v63 = vrot.slane %v462_v56, 7  ;;  %v425_v1 = vor.u32 %v423_v22, %v422_v33  ;;  %v446_v3 = vor.u32 %v444_v26, %v443_v34 }
  0x31   : > { %v506_v2 = vrot.slane %v465_v59, 1  ;;  %v432_v4 = vor.u32 %v430_v19, %v429_v28  ;;  %v2331_v5 = vor.u32 %v458_v39, %v457_v50  ;;  %v526_v6 = vsel %vm2285_vm2, %v505_v57, 0 }
  0x32   : > { %567 = vrot.lane.b32.xlu1 %v524_v49, %s2110_s19  ;;  %v509_v7 = vor.u32 %v508_v58, %v469_v55  ;;  %v453_v8 = vor.u32 %v451_v48, %v450_v51  ;;  %v525_v10 = vsel %vm2285_vm2, %v503_v61, 0  ;;  %v2343_v47 = vor.u32 %v472_v52, %v471_v62 }
  0x33   : > { %565 = vrot.lane.b32.xlu0 %v523_v53, %s2110_s19  ;;  %v507_v11 = vor.u32 %v506_v2, %v462_v56  ;;  %v2345_v12 = vor.u32 %v465_v59, %v464_v63  ;;  %v487_v23 = vsel %vm2355_vm5, 0, %v432_v4  ;;  %v486_v25 = vsel %vm2355_vm5, 0, %v425_v1 }
  0x34   : > { %v528_v13 = vsel %vm2285_vm2, %v509_v7, 0  ;;  %v489_v30 = vsel %vm2355_vm5, 0, %v446_v3  ;;  %v488_v33 = vsel %vm2355_vm5, 0, %v2315_v60  ;;  %v491_v42 = vsel %vm2355_vm5, 0, %v2331_v5 }
  0x35   : > { %v527_v14 = vsel %vm2285_vm2, %v507_v11, 0  ;;  %v490_v45 = vsel %vm2355_vm5, 0, %v453_v8  ;;  %v493_v55 = vsel %vm2355_vm5, 0, %v2343_v47  ;;  %v492_v58 = vsel %vm2355_vm5, 0, %v2345_v12 }
  0x36   : > { %571 = vrot.lane.b32.xlu1 %v526_v6, %s2110_s19 }
  0x37   : > { %569 = vrot.lane.b32.xlu0 %v525_v10, %s2110_s19 }
  0x3a   : > { %575 = vrot.lane.b32.xlu1 %v528_v13, %s2110_s19 }
  0x3b   : > { %573 = vrot.lane.b32.xlu0 %v527_v14, %s2110_s19 }
  0x90   : > { %v542_v15 = vpop.permute.xlu1 %541  ;;  %v538_v16 = vpop.permute.xlu0 %537 }
  0x91   : > { %v580_v29 = vsel %vm577_vm6, %v486_v25, %v538_v16  ;;  %v586_v41 = vsel %vm577_vm6, %v488_v33, %v542_v15 }
  0x94   : > { %v544_v17 = vpop.permute.xlu1 %543  ;;  %v540_v18 = vpop.permute.xlu0 %539 }
  0x95   : > { %v583_v26 = vsel %vm577_vm6, %v487_v23, %v540_v18  ;;  %v589_v39 = vsel %vm577_vm6, %v489_v30, %v544_v17 }
  0x98   : > { %v548_v19 = vpop.permute.xlu1 %547 }
  0x99   : > { %v546_v20 = vpop.permute.xlu0 %545  ;;  %v595_v52 = vsel %vm577_vm6, %v491_v42, %v548_v19 }
  0x9a   : > { %v592_v54 = vsel %vm577_vm6, %v490_v45, %v546_v20 }
  0x9c   : > { %v552_v22 = vpop.permute.xlu1 %551 }
  0x9d   : > { %v550_v24 = vpop.permute.xlu0 %549  ;;  %v601_v1 = vsel %vm577_vm6, %v493_v55, %v552_v22 }
  0x9e   : > { %v598_v3 = vsel %vm577_vm6, %v492_v58, %v550_v24 }
  0xa0   : > { %v564_v28 = vpop.permute.xlu1 %563 }
  0xa1   : > { %v606_v31 = vsel %vm602_vm7, %v583_v26, %v564_v28  ;;  %v562_v32 = vpop.permute.xlu0 %561 }
  0xa2   : > { %v1736_v34 = vcombine.low %v606_v31, %v606_v31  ;;  %v1737_v35 = vcombine.high %v606_v31, %v606_v31  ;;  %v604_v36 = vsel %vm602_vm7, %v580_v29, %v562_v32 }
  0xa3   : > { %v1734_v37 = vcombine.low %v604_v36, %v604_v36  ;;  %v1735_v38 = vcombine.high %v604_v36, %v604_v36 }
  0xa4   : > { %679 = vst.msk [vmem:[#allocation2 + $0x10] sm:$0xf] %vm676_vm8, %v1736_v34  ;;  %680 = vst.msk [vmem:[#allocation2 + $0x14] sm:$0xf] %vm676_vm8, %v1737_v35  ;;  %v568_v40 = vpop.permute.xlu1 %567 }
  0xa5   : > { %677 = vst.msk [vmem:[#allocation2 + $0x8] sm:$0xf] %vm676_vm8, %v1734_v37  ;;  %678 = vst.msk [vmem:[#allocation2 + $0xc] sm:$0xf] %vm676_vm8, %v1735_v38  ;;  %v610_v43 = vsel %vm602_vm7, %v589_v39, %v568_v40  ;;  %v566_v44 = vpop.permute.xlu0 %565 }
  0xa6   : > { %v1740_v46 = vcombine.low %v610_v43, %v610_v43  ;;  %v1741_v48 = vcombine.high %v610_v43, %v610_v43  ;;  %v608_v49 = vsel %vm602_vm7, %v586_v41, %v566_v44 }
  0xa7   : > { %v1738_v50 = vcombine.low %v608_v49, %v608_v49  ;;  %v1739_v51 = vcombine.high %v608_v49, %v608_v49 }
  0xa8   : > { %683 = vst.msk [vmem:[#allocation2 + $0x20] sm:$0xf] %vm676_vm8, %v1740_v46  ;;  %684 = vst.msk [vmem:[#allocation2 + $0x24] sm:$0xf] %vm676_vm8, %v1741_v48  ;;  %v572_v53 = vpop.permute.xlu1 %571 }
  0xa9   : > { %681 = vst.msk [vmem:[#allocation2 + $0x18] sm:$0xf] %vm676_vm8, %v1738_v50  ;;  %682 = vst.msk [vmem:[#allocation2 + $0x1c] sm:$0xf] %vm676_vm8, %v1739_v51  ;;  %v614_v56 = vsel %vm602_vm7, %v595_v52, %v572_v53  ;;  %v570_v57 = vpop.permute.xlu0 %569 }
  0xaa   : > { %v1744_v59 = vcombine.low %v614_v56, %v614_v56  ;;  %v1745_v60 = vcombine.high %v614_v56, %v614_v56  ;;  %v612_v61 = vsel %vm602_vm7, %v592_v54, %v570_v57 }
  0xab   : > { %v1742_v62 = vcombine.low %v612_v61, %v612_v61  ;;  %v1743_v63 = vcombine.high %v612_v61, %v612_v61 }
  0xac   : > { %687 = vst.msk [vmem:[#allocation2 + $0x30] sm:$0xf] %vm676_vm8, %v1744_v59  ;;  %688 = vst.msk [vmem:[#allocation2 + $0x34] sm:$0xf] %vm676_vm8, %v1745_v60  ;;  %v576_v2 = vpop.permute.xlu1 %575 }
  0xad   : > { %685 = vst.msk [vmem:[#allocation2 + $0x28] sm:$0xf] %vm676_vm8, %v1742_v62  ;;  %686 = vst.msk [vmem:[#allocation2 + $0x2c] sm:$0xf] %vm676_vm8, %v1743_v63  ;;  %v618_v4 = vsel %vm602_vm7, %v601_v1, %v576_v2  ;;  %v574_v5 = vpop.permute.xlu0 %573  ;;  %696 = sbr.rel (%p1750_p8) target bundleno = 180 (0xb4), region = 40 }
  0xae   : > { %v1748_v6 = vcombine.low %v618_v4, %v618_v4  ;;  %v1749_v7 = vcombine.high %v618_v4, %v618_v4  ;;  %v616_v8 = vsel %vm602_vm7, %v598_v3, %v574_v5 }
  0xaf   : > { %v1746_v10 = vcombine.low %v616_v8, %v616_v8  ;;  %v1747_v11 = vcombine.high %v616_v8, %v616_v8 }
  0xb0   : > { %691 = vst.msk [vmem:[#allocation2 + $0x40] sm:$0xf] %vm676_vm8, %v1748_v6  ;;  %692 = vst.msk [vmem:[#allocation2 + $0x44] sm:$0xf] %vm676_vm8, %v1749_v7 }
  0xb1   : > { %689 = vst.msk [vmem:[#allocation2 + $0x38] sm:$0xf] %vm676_vm8, %v1746_v10  ;;  %690 = vst.msk [vmem:[#allocation2 + $0x3c] sm:$0xf] %vm676_vm8, %v1747_v11 }
  0xb2   : > { %v2111_v47 = vmov 0  }
  0xb3   : > { %697 = vst.msk [vmem:[#allocation2] sm:$0xf] %vm676_vm8, %v2111_v47  ;;  %698 = vst.msk [vmem:[#allocation2 + $0x4] sm:$0xf] %vm676_vm8, %v2111_v47 }
  0xb4 PF: > { %p1751_p9 = scmp.le.s32.totalorder %s2091_s21, 0 }
  0xb5   : > { %s1752_s15 = sadd.s32 (!%p1751_p9), 4294967295, %s1729_s14  ;;  %s2112_s19 = smov (!%p1751_p9), 4  }
  0xb6   : > { %702 = sbr.rel (%p1751_p9) target bundleno = 324 (0x144), region = 44  ;;  %s1841_s16 = sshll.u32 (!%p1751_p9), %s1752_s15, 3 }
  0xb7   : > { %s706_s18 = scalar_lea.vmem (!%p1751_p9), %s2192_s9, %s1841_s16  ;;  %s2113_s9 = smov (!%p1751_p9), 8  }
  0xbb   : > { %v1892_v12 = vld [vmem:[%s706_s18] sm:$0xff]  }
  0xbc   : > { %v1893_v13 = vunpack.c.l.bf16 %v1892_v12  ;;  %v1894_v14 = vunpack.c.h.bf16 %v1892_v12 }
  0xbe   : > { %v711_v15 = vmul.f32 %v1893_v13, %v2197_v0  ;;  %v712_v16 = vmul.f32 %v1894_v14, %v2197_v0 }
  0xc0   : > { %v713_v17 = vadd.f32 %v2209_v9, %v711_v15  ;;  %v714_v18 = vadd.f32 %v2209_v9, %v712_v16 }
  0xc2   : > { %v715_v19 = vmax.f32 %v713_v17, 0.0  ;;  %v716_v20 = vmax.f32 %v714_v18, 0.0 }
  0xc4   : > { %v717_v22 = vpack.c.bf16 %v716_v20, %v715_v19 }
  0xc6   : > { %732 = vrot.lane.b32.xlu0 %v717_v22, %s2112_s19  ;;  %v719_v23 = vshrl.u32 %v717_v22, 16  ;;  %v722_v24 = vshll.u32 %v717_v22, 16 }
  0xc8   : > { %v727_v25 = vrot.slane %v722_v24, 1  ;;  %v721_v26 = vrot.slane %v719_v23, 7 }
  0xca   : > { %v728_v28 = vor.u32 %v727_v25, %v719_v23  ;;  %v724_v29 = vor.u32 %v722_v24, %v721_v26 }
  0xcc   : > { %v730_v30 = vsel %vm2285_vm2, %v728_v28, 0  ;;  %v726_v32 = vsel %vm2355_vm5, 0, %v724_v29 }
  0xcd   : > { %735 = vrot.lane.b32.xlu0 %v730_v30, %s2113_s9 }
 0x138   : > { %v733_v31 = vpop.permute.xlu0 %732 }
 0x139   : > { %v739_v33 = vsel %vm577_vm6, %v726_v32, %v733_v31 }
 0x13f   : > { %v736_v34 = vpop.permute.xlu0 %735 }
 0x140   : > { %v741_v35 = vsel %vm602_vm7, %v739_v33, %v736_v34 }
 0x141   : > { %v1755_v36 = vcombine.low %v741_v35, %v741_v35  ;;  %v1756_v37 = vcombine.high %v741_v35, %v741_v35 }
 0x143   : > { %749 = vst.msk [vmem:[#allocation2] sm:$0xf] %vm676_vm8, %v1755_v36  ;;  %750 = vst.msk [vmem:[#allocation2 + $0x4] sm:$0xf] %vm676_vm8, %v1756_v37 }
 0x144 PF: > { %p1757_p10 = scmp.ne.s32.totalorder %s2091_s21, 1 }
 0x146   : > { %754 = sbr.rel (%p1757_p10) target bundleno = 333 (0x14d), region = 48 }
 0x14b   : > { %v2114_v38 = vmov 0  }
 0x14c   : > { %756 = vst.msk [vmem:[#allocation2 + $0x48] sm:$0xf] %vm676_vm8, %v2114_v38  ;;  %757 = vst.msk [vmem:[#allocation2 + $0x4c] sm:$0xf] %vm676_vm8, %v2114_v38 }
 0x14d PF: > { %p1758_p11 = scmp.ge.s32.totalorder %s2091_s21, 1 }
 0x14e   : > { %s2115_s20 = smov (!%p1758_p11), 4   ;;  %s2116_s21 = smov (!%p1758_p11), 8  }
 0x14f   : > { %761 = sbr.rel (%p1758_p11) target bundleno = 477 (0x1dd), region = 52 }
 0x154   : > { %v1906_v39 = vld [vmem:[%s2200_s12 + $0x40] sm:$0xff]  }
 0x155   : > { %v1897_v40 = vunpack.c.l.bf16 %v1906_v39  ;;  %v1898_v41 = vunpack.c.h.bf16 %v1906_v39 }
 0x157   : > { %v770_v42 = vmul.f32 %v1897_v40, %v2197_v0  ;;  %v771_v43 = vmul.f32 %v1898_v41, %v2197_v0 }
 0x159   : > { %v772_v44 = vadd.f32 %v2209_v9, %v770_v42  ;;  %v773_v45 = vadd.f32 %v2209_v9, %v771_v43 }
 0x15b   : > { %v774_v46 = vmax.f32 %v772_v44, 0.0  ;;  %v775_v48 = vmax.f32 %v773_v45, 0.0 }
 0x15d   : > { %v776_v49 = vpack.c.bf16 %v775_v48, %v774_v46 }
 0x15f   : > { %791 = vrot.lane.b32.xlu0 %v776_v49, %s2115_s20  ;;  %v778_v50 = vshrl.u32 %v776_v49, 16  ;;  %v781_v51 = vshll.u32 %v776_v49, 16 }
 0x161   : > { %v786_v52 = vrot.slane %v781_v51, 1  ;;  %v780_v53 = vrot.slane %v778_v50, 7 }
 0x163   : > { %v787_v54 = vor.u32 %v786_v52, %v778_v50  ;;  %v783_v55 = vor.u32 %v781_v51, %v780_v53 }
 0x165   : > { %v789_v56 = vsel %vm2285_vm2, %v787_v54, 0  ;;  %v785_v9 = vsel %vm2355_vm5, 0, %v783_v55 }
 0x166   : > { %794 = vrot.lane.b32.xlu0 %v789_v56, %s2116_s21 }
 0x1d1   : > { %v792_v0 = vpop.permute.xlu0 %791 }
 0x1d2   : > { %v798_v57 = vsel %vm577_vm6, %v785_v9, %v792_v0 }
 0x1d8   : > { %v795_v58 = vpop.permute.xlu0 %794 }
 0x1d9   : > { %v800_v59 = vsel %vm602_vm7, %v798_v57, %v795_v58 }
 0x1da   : > { %v1763_v60 = vcombine.low %v800_v59, %v800_v59  ;;  %v1764_v61 = vcombine.high %v800_v59, %v800_v59 }
 0x1dc   : > { %809 = vst.msk [vmem:[#allocation2 + $0x48] sm:$0xf] %vm676_vm8, %v1763_v60  ;;  %810 = vst.msk [vmem:[#allocation2 + $0x4c] sm:$0xf] %vm676_vm8, %v1764_v61 }
 0x1dd PF: > { %v2042_v27 = vld [vmem:[%s2603_s3 + $0x8] sm:$0x3f]   ;;  %vm918_vm9 = vcmask 1045504   ;;  %vm893_vm10 = vcmask 97280   ;;  %v2045_v1 = vld [vmem:[#allocation2 + $0x10] sm:$0xff]   ;;  %v2049_v6 = vld [vmem:[#allocation2 + $0x18] sm:$0xff]  }
 0x1de   : > { %v2043_v62 = vld [vmem:[#allocation2 + $0x8] sm:$0xff]   ;;  %1990 = vmatprep.subr.msk.bf16.mxu0 %vm918_vm9, %v2042_v27  ;;  %1991 = vmatprep.subr.msk.bf16.mxu1 %vm918_vm9, %v2042_v27  ;;  %v920_v21 = vsel %vm918_vm9, %v2042_v27, 0  ;;  %v2046_v2 = vld [vmem:[#allocation2 + $0x30] sm:$0xff]   ;;  %v2047_v3 = vld [vmem:[%s2603_s3] sm:$0x3f]   ;;  %vm1457_vm11 = vcmask 27648  }
 0x1df   : > { %1935 = vmatpush3.bf16.msra.mxu0 %v920_v21  ;;  %1989 = vmatpush3.bf16.msra.mxu1 %v920_v21  ;;  %v2044_v63 = vld [vmem:[#allocation2 + $0x28] sm:$0xff]   ;;  %v2048_v4 = vld [vmem:[%s2603_s3 + $0x10] sm:$0x3f]   ;;  %v1089_v5 = vsel %vm918_vm9, %v2047_v3, 0  ;;  %v2050_v8 = vld [vmem:[#allocation2 + $0x38] sm:$0xff]   ;;  %vm1511_vm12 = vcmask 24576  }
 0x1e0   : > { %1936 = vmatprep.mubr.msk.bf16.mxu0 %vm893_vm10, %v2043_v62  ;;  %1944 = vmatprep.mubr.msk.bf16.mxu1 %vm893_vm10, %v2044_v63  ;;  %v1278_v7 = vsel %vm918_vm9, %v2048_v4, 0  ;;  %v2051_v10 = vld [vmem:[#allocation2 + $0x20] sm:$0xff]   ;;  %v2054_v12 = vld [vmem:[#allocation2 + $0x10] sm:$0xff]   ;;  %v2055_v13 = vld [vmem:[#allocation2 + $0x8] sm:$0xff]  }
 0x1e1   : > { %1992 = vmatprep.subr.msk.bf16.mxu1 %vm918_vm9, %v2047_v3  ;;  %1993 = vmatprep.subr.msk.bf16.mxu0 %vm918_vm9, %v2048_v4  ;;  %v2052_v11 = vld [vmem:[#allocation2 + $0x40] sm:$0xff]   ;;  %v2056_v14 = vld [vmem:[#allocation2 + $0x18] sm:$0xff]   ;;  %v2057_v16 = vld [vmem:[#allocation2 + $0x10] sm:$0xff]  }
 0x1e2   : > { %1937 = vmatmul.mubr.msk.bf16.vlgmr.msra.gmra.mxu0 %vm893_vm10, %v2045_v1  ;;  %1945 = vmatmul.mubr.msk.bf16.vlgmr.msra.gmra.mxu1 %vm893_vm10, %v2046_v2  ;;  %v2053_v47 = vld [vmem:[#allocation2] sm:$0xff]   ;;  %v2060_v17 = vld [vmem:[#allocation2 + $0x28] sm:$0xff]   ;;  %v2059_v18 = vld [vmem:[#allocation2 + $0x18] sm:$0xff]  }
 0x1e3   : > { %1953 = vmatpush3.bf16.msra.mxu1 %v1089_v5  ;;  %1971 = vmatpush3.bf16.msra.mxu0 %v1278_v7  ;;  %v2058_v15 = vld [vmem:[#allocation2 + $0x20] sm:$0xff]   ;;  %v2062_v19 = vld [vmem:[#allocation2 + $0x30] sm:$0xff]   ;;  %v2064_v22 = vld [vmem:[#allocation2 + $0x38] sm:$0xff]  }
 0x1e4   : > { %1940 = vmatprep.mubr.msk.bf16.mxu0 %vm893_vm10, %v2049_v6  ;;  %1948 = vmatprep.mubr.msk.bf16.mxu1 %vm893_vm10, %v2050_v8  ;;  %v2061_v20 = vld [vmem:[#allocation2 + $0x20] sm:$0xff]   ;;  %v2063_v23 = vld [vmem:[#allocation2 + $0x28] sm:$0xff]   ;;  %v2065_v25 = vld [vmem:[#allocation2 + $0x30] sm:$0xff]  }
 0x1e5   : > { %v2066_v24 = vld [vmem:[#allocation2 + $0x40] sm:$0xff]   ;;  %v2068_v26 = vld [vmem:[#allocation2 + $0x48] sm:$0xff]   ;;  %v2067_v28 = vld [vmem:[#allocation2 + $0x38] sm:$0xff]  }
 0x1ea   : > { %1941 = vmatmul.mubr.msk.bf16.gmra.mxu0 %vm893_vm10, %v2051_v10  ;;  %1949 = vmatmul.mubr.msk.bf16.gmra.mxu1 %vm893_vm10, %v2052_v11 }
 0x1eb   : > { %1972 = vmatprep.mubr.msk.bf16.mxu0 %vm893_vm10, %v2054_v12  ;;  %1954 = vmatprep.mubr.msk.bf16.mxu1 %vm893_vm10, %v2053_v47 }
 0x1f2   : > { %1973 = vmatmul.mubr.msk.bf16.vlgmr.msra.gmra.mxu0 %vm893_vm10, %v2056_v14  ;;  %1955 = vmatmul.mubr.msk.bf16.vlgmr.msra.gmra.mxu1 %vm893_vm10, %v2055_v13 }
 0x1f3   : > { %1976 = vmatprep.mubr.msk.bf16.mxu0 %vm893_vm10, %v2058_v15  ;;  %1958 = vmatprep.mubr.msk.bf16.mxu1 %vm893_vm10, %v2057_v16 }
 0x1fa   : > { %1977 = vmatmul.mubr.msk.bf16.gmra.mxu0 %vm893_vm10, %v2060_v17  ;;  %1959 = vmatmul.mubr.msk.bf16.gmra.mxu1 %vm893_vm10, %v2059_v18 }
 0x1fb   : > { %1980 = vmatprep.mubr.msk.bf16.mxu0 %vm893_vm10, %v2062_v19  ;;  %1962 = vmatprep.mubr.msk.bf16.mxu1 %vm893_vm10, %v2061_v20 }
 0x202   : > { %1981 = vmatmul.mubr.msk.bf16.gmra.mxu0 %vm893_vm10, %v2064_v22  ;;  %1963 = vmatmul.mubr.msk.bf16.gmra.mxu1 %vm893_vm10, %v2063_v23 }
 0x203   : > { %1984 = vmatprep.mubr.msk.bf16.mxu0 %vm893_vm10, %v2066_v24  ;;  %1966 = vmatprep.mubr.msk.bf16.mxu1 %vm893_vm10, %v2065_v25 }
 0x20a   : > { %1985 = vmatmul.mubr.msk.bf16.gmra.mxu0 %vm893_vm10, %v2068_v26  ;;  %1967 = vmatmul.mubr.msk.bf16.gmra.mxu1 %vm893_vm10, %v2067_v28 }
 0x2a2   : > { %v1938_v29 = vpop.f32.mrf.mxu0  ;;  %v2487_v30 = vpop.f32.mrf.mxu1 }
 0x2a4   : > { %v956_v31 = vpop.f32.mrf.mxu0  ;;  %v2489_v32 = vpop.f32.mrf.mxu1 }
 0x2a6   : > { %v1939_v33 = vpop.f32.mrf.mxu0  ;;  %v2491_v34 = vpop.f32.mrf.mxu1 }
 0x2a8   : > { %v959_v35 = vpop.f32.mrf.mxu0  ;;  %v2493_v36 = vpop.f32.mrf.mxu1 }
 0x2aa   : > { %v1942_v37 = vpop.f32.mrf.mxu0  ;;  %v2495_v38 = vpop.f32.mrf.mxu1 }
 0x2ac   : > { %v972_v39 = vpop.f32.mrf.mxu0  ;;  %v2497_v40 = vpop.f32.mrf.mxu1 }
 0x2ae   : > { %v1943_v41 = vpop.f32.mrf.mxu0  ;;  %v2499_v42 = vpop.f32.mrf.mxu1 }
 0x2b0   : > { %v975_v43 = vpop.f32.mrf.mxu0  ;;  %v2501_v44 = vpop.f32.mrf.mxu1 }
 0x2b2   : > { %v1974_v45 = vpop.f32.mrf.mxu0  ;;  %v1956_v46 = vpop.f32.mrf.mxu1 }
 0x2b3   : > { %v1134_v48 = vadd.f32 %v1956_v46, %v1938_v29 }
 0x2b4   : > { %v1314_v49 = vpop.f32.mrf.mxu0  ;;  %v1125_v50 = vpop.f32.mrf.mxu1 }
 0x2b5   : > { %v1379_v51 = vadd.f32 %v1974_v45, %v1134_v48  ;;  %v1126_v52 = vadd.f32 %v1125_v50, %v956_v31 }
 0x2b6   : > { %v1975_v53 = vpop.f32.mrf.mxu0  ;;  %v1957_v54 = vpop.f32.mrf.mxu1 }
 0x2b7   : > { %v1845_v55 = vpack.c.bf16 %v1379_v51, %v1379_v51  ;;  %v1377_v56 = vadd.f32 %v1314_v49, %v1126_v52  ;;  %v1137_v9 = vadd.f32 %v1957_v54, %v1939_v33  ;;  %v1515_v4 = vmul.f32 %v1379_v51, %v1379_v51 }
 0x2b8   : > { %v1317_v0 = vpop.f32.mrf.mxu0  ;;  %v1128_v57 = vpop.f32.mrf.mxu1  ;;  %v1477_v13 = vsel %vm577_vm6, %v1379_v51, 0.0 }
 0x2b9   : > { %1460 = vst.msk [vmem:[%s2322_s29 + $0x8] sm:$0xf] %vm1457_vm11, %v1845_v55  ;;  %v1843_v58 = vpack.c.bf16 %v1377_v56, %v1377_v56  ;;  %v1380_v60 = vadd.f32 %v1975_v53, %v1137_v9  ;;  %v1129_v61 = vadd.f32 %v1128_v57, %v959_v35  ;;  %v1513_v62 = vmul.f32 %v1377_v56, %v1377_v56 }
 0x2ba   : > { %v1978_v59 = vpop.f32.mrf.mxu0  ;;  %v1960_v27 = vpop.f32.mrf.mxu1  ;;  %v1474_v8 = vsel %vm577_vm6, %v1377_v56, 0.0  ;;  %v1532_v24 = vsel %vm577_vm6, %v1515_v4, 0.0 }
 0x2bb   : > { %1458 = vst.msk [vmem:[%s2322_s29] sm:$0xf] %vm1457_vm11, %v1843_v58  ;;  %v1150_v21 = vadd.f32 %v1960_v27, %v1942_v37  ;;  %v1846_v1 = vpack.c.bf16 %v1380_v60, %v1380_v60  ;;  %v1378_v2 = vadd.f32 %v1317_v0, %v1129_v61  ;;  %v1529_v14 = vsel %vm577_vm6, %v1513_v62, 0.0 }
 0x2bc   : > { %v1330_v63 = vpop.f32.mrf.mxu0  ;;  %v1141_v3 = vpop.f32.mrf.mxu1  ;;  %v1516_v18 = vmul.f32 %v1380_v60, %v1380_v60  ;;  %v1479_v31 = vsel %vm577_vm6, %v1380_v60, 0.0 }
 0x2bd   : > { %v1383_v5 = vadd.f32 %v1978_v59, %v1150_v21  ;;  %v1142_v6 = vadd.f32 %v1141_v3, %v972_v39  ;;  %1461 = vst.msk [vmem:[%s2322_s29 + $0xc] sm:$0xf] %vm1457_vm11, %v1846_v1  ;;  %v1844_v10 = vpack.c.bf16 %v1378_v2, %v1378_v2  ;;  %v1475_v11 = vsel %vm577_vm6, %v1378_v2, 0.0 }
 0x2be   : > { %v1979_v7 = vpop.f32.mrf.mxu0  ;;  %v1514_v47 = vmul.f32 %v1378_v2, %v1378_v2  ;;  %v1961_v12 = vpop.f32.mrf.mxu1  ;;  %v1476_v15 = vadd.f32 %v1475_v11, %v1474_v8  ;;  %v1534_v50 = vsel %vm577_vm6, %v1516_v18, 0.0 }
 0x2bf   : > { %v1849_v16 = vpack.c.bf16 %v1383_v5, %v1383_v5  ;;  %1459 = vst.msk [vmem:[%s2322_s29 + $0x4] sm:$0xf] %vm1457_vm11, %v1844_v10  ;;  %v1381_v20 = vadd.f32 %v1330_v63, %v1142_v6  ;;  %v1153_v22 = vadd.f32 %v1961_v12, %v1943_v41  ;;  %v1519_v51 = vmul.f32 %v1383_v5, %v1383_v5 }
 0x2c0   : > { %v1333_v17 = vpop.f32.mrf.mxu0  ;;  %v1530_v19 = vsel %vm577_vm6, %v1514_v47, 0.0  ;;  %v1144_v23 = vpop.f32.mrf.mxu1  ;;  %v1478_v25 = vadd.f32 %v1477_v13, %v1476_v15  ;;  %v1485_v63 = vsel %vm577_vm6, %v1383_v5, 0.0 }
 0x2c1   : > { %v1531_v26 = vadd.f32 %v1530_v19, %v1529_v14  ;;  %1464 = vst.msk [vmem:[%s2322_s29 + $0x18] sm:$0xf] %vm1457_vm11, %v1849_v16  ;;  %v1145_v28 = vadd.f32 %v1144_v23, %v975_v43  ;;  %v1847_v33 = vpack.c.bf16 %v1381_v20, %v1381_v20  ;;  %v1517_v35 = vmul.f32 %v1381_v20, %v1381_v20 }
 0x2c2   : > { %v1982_v29 = vpop.f32.mrf.mxu0  ;;  %v1384_v37 = vadd.f32 %v1979_v7, %v1153_v22  ;;  %v1964_v39 = vpop.f32.mrf.mxu1  ;;  %v1480_v46 = vadd.f32 %v1479_v31, %v1478_v25  ;;  %v1481_v43 = vsel %vm577_vm6, %v1381_v20, 0.0  ;;  %v1540_v11 = vsel %vm577_vm6, %v1519_v51, 0.0 }
 0x2c3   : > { %v1533_v45 = vadd.f32 %v1532_v24, %v1531_v26  ;;  %v1382_v41 = vadd.f32 %v1333_v17, %v1145_v28  ;;  %v1166_v48 = vadd.f32 %v1964_v39, %v2487_v30  ;;  %1462 = vst.msk [vmem:[%s2322_s29 + $0x10] sm:$0xf] %vm1457_vm11, %v1847_v33  ;;  %v1536_v57 = vsel %vm577_vm6, %v1517_v35, 0.0 }
 0x2c4   : > { %v1346_v49 = vpop.f32.mrf.mxu0  ;;  %v1850_v52 = vpack.c.bf16 %v1384_v37, %v1384_v37  ;;  %v1157_v53 = vpop.f32.mrf.mxu1  ;;  %v1482_v54 = vadd.f32 %v1481_v43, %v1480_v46  ;;  %v1520_v1 = vmul.f32 %v1384_v37, %v1384_v37  ;;  %v1487_v47 = vsel %vm577_vm6, %v1384_v37, 0.0 }
 0x2c5   : > { %v1535_v55 = vadd.f32 %v1534_v50, %v1533_v45  ;;  %v1848_v56 = vpack.c.bf16 %v1382_v41, %v1382_v41  ;;  %v1483_v0 = vsel %vm577_vm6, %v1382_v41, 0.0  ;;  %v1518_v30 = vmul.f32 %v1382_v41, %v1382_v41 }
 0x2c6   : > { %v1983_v9 = vpop.f32.mrf.mxu0  ;;  %1465 = vst.msk [vmem:[%s2322_s29 + $0x1c] sm:$0xf] %vm1457_vm11, %v1850_v52  ;;  %v1387_v58 = vadd.f32 %v1982_v29, %v1166_v48  ;;  %v1158_v59 = vadd.f32 %v1157_v53, %v2489_v32  ;;  %v1965_v60 = vpop.f32.mrf.mxu1  ;;  %v1484_v27 = vadd.f32 %v1483_v0, %v1482_v54  ;;  %v1542_v16 = vsel %vm577_vm6, %v1520_v1, 0.0 }
 0x2c7   : > { %v1537_v61 = vadd.f32 %v1536_v57, %v1535_v55  ;;  %1463 = vst.msk [vmem:[%s2322_s29 + $0x14] sm:$0xf] %vm1457_vm11, %v1848_v56  ;;  %v1169_v62 = vadd.f32 %v1965_v60, %v2491_v34  ;;  %v1538_v2 = vsel %vm577_vm6, %v1518_v30, 0.0 }
 0x2c8   : > { %v1349_v21 = vpop.f32.mrf.mxu0  ;;  %v1853_v3 = vpack.c.bf16 %v1387_v58, %v1387_v58  ;;  %v1160_v4 = vpop.f32.mrf.mxu1  ;;  %v1486_v6 = vadd.f32 %v1485_v63, %v1484_v27  ;;  %v1385_v8 = vadd.f32 %v1346_v49, %v1158_v59  ;;  %v1523_v25 = vmul.f32 %v1387_v58, %v1387_v58 }
 0x2c9   : > { %v1539_v7 = vadd.f32 %v1538_v2, %v1537_v61  ;;  %v1388_v32 = vadd.f32 %v1983_v9, %v1169_v62  ;;  %v1161_v34 = vadd.f32 %v1160_v4, %v2493_v36  ;;  %v1493_v49 = vsel %vm577_vm6, %v1387_v58, 0.0 }
 0x2ca   : > { %v1986_v10 = vpop.f32.mrf.mxu0  ;;  %1468 = vst.msk [vmem:[%s2322_s29 + $0x28] sm:$0xf] %vm1457_vm11, %v1853_v3  ;;  %v1968_v5 = vpop.f32.mrf.mxu1  ;;  %v1851_v13 = vpack.c.bf16 %v1385_v8, %v1385_v8  ;;  %v1488_v14 = vadd.f32 %v1487_v47, %v1486_v6  ;;  %v1489_v17 = vsel %vm577_vm6, %v1385_v8, 0.0  ;;  %v1521_v18 = vmul.f32 %v1385_v8, %v1385_v8 }
 0x2cb   : > { %v1541_v12 = vadd.f32 %v1540_v11, %v1539_v7  ;;  %v1854_v19 = vpack.c.bf16 %v1388_v32, %v1388_v32  ;;  %v1386_v24 = vadd.f32 %v1349_v21, %v1161_v34  ;;  %v1182_v36 = vadd.f32 %v1968_v5, %v2495_v38 }
 0x2cc   : > { %v1362_v15 = vpop.f32.mrf.mxu0  ;;  %v1173_v20 = vpop.f32.mrf.mxu1  ;;  %1466 = vst.msk [vmem:[%s2322_s29 + $0x20] sm:$0xf] %vm1457_vm11, %v1851_v13  ;;  %v1490_v22 = vadd.f32 %v1489_v17, %v1488_v14  ;;  %v1544_v26 = vsel %vm577_vm6, %v1521_v18, 0.0  ;;  %v1524_v50 = vmul.f32 %v1388_v32, %v1388_v32  ;;  %v1548_v54 = vsel %vm577_vm6, %v1523_v25, 0.0 }
 0x2cd   : > { %v1543_v23 = vadd.f32 %v1542_v16, %v1541_v12  ;;  %1469 = vst.msk [vmem:[%s2322_s29 + $0x2c] sm:$0xf] %vm1457_vm11, %v1854_v19  ;;  %v1174_v28 = vadd.f32 %v1173_v20, %v2497_v40  ;;  %v1852_v33 = vpack.c.bf16 %v1386_v24, %v1386_v24  ;;  %v1491_v35 = vsel %vm577_vm6, %v1386_v24, 0.0 }
 0x2ce   : > { %v1969_v29 = vpop.f32.mrf.mxu1  ;;  %v1522_v37 = vmul.f32 %v1386_v24, %v1386_v24  ;;  %v1987_v39 = vpop.f32.mrf.mxu0  ;;  %v1492_v45 = vadd.f32 %v1491_v35, %v1490_v22  ;;  %v1391_v46 = vadd.f32 %v1986_v10, %v1182_v36  ;;  %v1495_v55 = vsel %vm577_vm6, %v1388_v32, 0.0 }
 0x2cf   : > { %v1545_v31 = vadd.f32 %v1544_v26, %v1543_v23  ;;  %v1389_v41 = vadd.f32 %v1362_v15, %v1174_v28  ;;  %v1185_v38 = vadd.f32 %v1969_v29, %v2499_v42  ;;  %1467 = vst.msk [vmem:[%s2322_s29 + $0x24] sm:$0xf] %vm1457_vm11, %v1852_v33  ;;  %v1550_v59 = vsel %vm577_vm6, %v1524_v50, 0.0 }
 0x2d0   : > { %v1176_v48 = vpop.f32.mrf.mxu1  ;;  %v1546_v40 = vsel %vm577_vm6, %v1522_v37, 0.0  ;;  %v1494_v43 = vadd.f32 %v1493_v49, %v1492_v45  ;;  %v1857_v53 = vpack.c.bf16 %v1391_v46, %v1391_v46  ;;  %v1365_v0 = vpop.f32.mrf.mxu0  ;;  %v1527_v60 = vmul.f32 %v1391_v46, %v1391_v46 }
 0x2d1   : > { %v1177_v51 = vadd.f32 %v1176_v48, %v2501_v44  ;;  %v1547_v52 = vadd.f32 %v1546_v40, %v1545_v31  ;;  %v1855_v42 = vpack.c.bf16 %v1389_v41, %v1389_v41  ;;  %v1525_v56 = vmul.f32 %v1389_v41, %v1389_v41 }
 0x2d2   : > { %1472 = vst.msk [vmem:[%s2322_s29 + $0x38] sm:$0xf] %vm1457_vm11, %v1857_v53  ;;  %v1496_v57 = vadd.f32 %v1495_v55, %v1494_v43  ;;  %v1392_v30 = vadd.f32 %v1987_v39, %v1185_v38  ;;  %v1497_v44 = vsel %vm577_vm6, %v1389_v41, 0.0  ;;  %v1501_v6 = vsel %vm577_vm6, %v1391_v46, 0.0 }
 0x2d3   : > { %v1549_v9 = vadd.f32 %v1548_v54, %v1547_v52  ;;  %v1390_v58 = vadd.f32 %v1365_v0, %v1177_v51  ;;  %1470 = vst.msk [vmem:[%s2322_s29 + $0x30] sm:$0xf] %vm1457_vm11, %v1855_v42  ;;  %v1552_v21 = vsel %vm577_vm6, %v1525_v56, 0.0  ;;  %v1556_v11 = vsel %vm577_vm6, %v1527_v60, 0.0 }
 0x2d4   : > { %v1498_v61 = vadd.f32 %v1497_v44, %v1496_v57  ;;  %v1858_v62 = vpack.c.bf16 %v1392_v30, %v1392_v30  ;;  %v1528_v7 = vmul.f32 %v1392_v30, %v1392_v30  ;;  %v1503_v47 = vsel %vm577_vm6, %v1392_v30, 0.0 }
 0x2d5   : > { %v1551_v27 = vadd.f32 %v1550_v59, %v1549_v9  ;;  %v1856_v63 = vpack.c.bf16 %v1390_v58, %v1390_v58  ;;  %v1499_v1 = vsel %vm577_vm6, %v1390_v58, 0.0  ;;  %v1526_v2 = vmul.f32 %v1390_v58, %v1390_v58 }
 0x2d6   : > { %1473 = vst.msk [vmem:[%s2322_s29 + $0x3c] sm:$0xf] %vm1457_vm11, %v1858_v62  ;;  %v1500_v4 = vadd.f32 %v1499_v1, %v1498_v61  ;;  %v1558_v12 = vsel %vm577_vm6, %v1528_v7, 0.0 }
 0x2d7   : > { %v1553_v3 = vadd.f32 %v1552_v21, %v1551_v27  ;;  %1471 = vst.msk [vmem:[%s2322_s29 + $0x34] sm:$0xf] %vm1457_vm11, %v1856_v63  ;;  %v1554_v8 = vsel %vm577_vm6, %v1526_v2, 0.0 }
 0x2d8   : > { %v1502_v32 = vadd.f32 %v1501_v6, %v1500_v4 }
 0x2d9   : > { %v1555_v10 = vadd.f32 %v1554_v8, %v1553_v3 }
 0x2da   : > { %v1504_v34 = vadd.f32 %v1503_v47, %v1502_v32 }
 0x2db   : > { %v1557_v5 = vadd.f32 %v1556_v11, %v1555_v10 }
 0x2dc   : > { %v1505_v13 = vrot.slane %v1504_v34, 4 }
 0x2dd   : > { %v1559_v14 = vadd.f32 %v1558_v12, %v1557_v5 }
 0x2de   : > { %v1506_v15 = vadd.f32 %v1505_v13, %v1504_v34 }
 0x2df   : > { %v1560_v16 = vrot.slane %v1559_v14, 4 }
 0x2e0   : > { %v1507_v17 = vrot.slane %v1506_v15, 2 }
 0x2e1   : > { %v1561_v18 = vadd.f32 %v1560_v16, %v1559_v14 }
 0x2e2   : > { %v1508_v19 = vadd.f32 %v1507_v17, %v1506_v15 }
 0x2e3   : > { %v1562_v20 = vrot.slane %v1561_v18, 2 }
 0x2e4   : > { %v1509_v22 = vrot.slane %v1508_v19, 1 }
 0x2e5   : > { %v1563_v23 = vadd.f32 %v1562_v20, %v1561_v18 }
 0x2e6   : > { %v1510_v24 = vadd.f32 %v1509_v22, %v1508_v19 }
 0x2e7   : > { %v1564_v36 = vrot.slane %v1563_v23, 1 }
 0x2e8   : > { %1512 = vst.msk [vmem:[%s302_s8] sm:$0x1] %vm1511_vm12, %v1510_v24 }
 0x2e9   : > { %v1565_v25 = vadd.f32 %v1564_v36, %v1563_v23 }
 0x2eb   : > { %1566 = vst.msk [vmem:[%s309_s13] sm:$0x1] %vm1511_vm12, %v1565_v25 }
 0x2ec PF: > { %s17_s25 = sadd.s32 1, %s2107_s25   ;;  %s2611_s21 = smov %s2099_s23 }
 0x2ed   : > { %p14_p12 = scmp.ge.s32.totalorder %s17_s25, 6   ;;  %s2612_s22 = smov %s2103_s24 }
 0x2ee   : > { %s2613_s23 = smov %s2616_s26  ;;  %s2614_s24 = smov %s2620_s27 }
 0x2ef   :  { %16 = sbr.rel (!%p14_p12) target bundleno = 3 (0x3), region = 115 }

</bundles_post_ra>
